<compile_context>
chip_gen: v5e
topology: v5e:2x2
jax: 0.10.0
libtpu: 0.0.40
codegen_flags: <defaults>
</compile_context>

<pallas_src>
import jax
import jax.numpy as jnp
from jax import lax
from jax.experimental import pallas as pl
from jax.experimental.pallas import tpu as pltpu

EPS = 1e-5


def _choose_batch_tile(N, HW, max_positions=8192):
    """Largest divisor of N keeping the block modest, preferring >= 2 grid steps
    (so the 'parallel' axis can still shard across v7x's two TensorCores)."""
    divisors = [d for d in range(1, N + 1) if N % d == 0]
    fits = [d for d in divisors if d * HW <= max_positions] or [1]
    two_step = [d for d in fits if N // d >= 2]
    return max(two_step) if two_step else max(fits)


def _make_kernel(W, HW, batch_tile, Cmid, Cout, tap_rows):
    def kernel(x_ref, w1_ref, w2_ref, w3_ref, b_ref, m_ref, o_ref):
        # x_ref : (batch_tile, Cin, HW)  f32
        # w1_ref: (Cmid, Cin)            bf16   (BN1 scale folded in)
        # w2_ref: (Cmid, 9*tap_rows)     bf16   (BN2 scale folded, taps padded to 8 rows)
        # w3_ref: (Cout, Cmid)           bf16   (BN3 scale folded in)
        # b_ref : (2*Cmid + Cout, 1)     f32    [bias1; bias2; bias3]
        # m_ref : (9, HW)                f32    precomputed border masks
        # o_ref : (batch_tile, Cout, HW) f32
        def sigmoid(z):
            # single EUP push (tanh) instead of exp + reciprocal; exact.
            return 0.5 * jnp.tanh(0.5 * z) + 0.5

        w1 = w1_ref[...]
        w2 = w2_ref[...]
        w3 = w3_ref[...]

        biases = b_ref[...]
        b1 = biases[0:Cmid]                  # (Cmid, 1)
        b2 = biases[Cmid:2 * Cmid]           # (Cmid, 1)
        b3 = biases[2 * Cmid:]               # (Cout, 1)

        masks = m_ref[...]                                   # (9, HW)
        mask_rows = [masks[t:t + 1, :] for t in range(9)]    # hoisted out of b loop

        # hoisted constant (JAX does not CSE broadcast_in_dim inside loops)
        zero_pad = (jnp.zeros((tap_rows - Cmid, HW), jnp.float32)
                    if tap_rows > Cmid else None)

        for b in range(batch_tile):
            x_f32 = x_ref[b]                                 # (Cin, HW); residual copy
            x_bf = x_f32.astype(jnp.bfloat16)

            # ---- conv1 (1x1, BN folded) + bias + sigmoid -------------------
            y1 = jnp.dot(w1, x_bf, preferred_element_type=jnp.float32)
            y1 = sigmoid(y1 + b1)                            # (Cmid, HW) f32

            # ---- conv2 (3x3, stride 1, pad 1): aligned im2col -> 1 matmul --
            y1p = (jnp.concatenate([y1, zero_pad], axis=0)
                   if zero_pad is not None else y1)          # (tap_rows, HW)
            taps = []
            for ky in range(3):
                for kx in range(3):
                    dy, dx = ky - 1, kx - 1
                    t = ky * 3 + kx
                    if dy == 0 and dx == 0:
                        taps.append(y1p)                     # center tap: no mask
                    else:
                        shift = (-(dy * W + dx)) % HW
                        rolled = pltpu.roll(y1p, shift=shift, axis=1)
                        taps.append(rolled * mask_rows[t])
            patches = jnp.concatenate(taps, axis=0)          # (9*tap_rows, HW) f32
            patches = patches.astype(jnp.bfloat16)

            y2 = jnp.dot(w2, patches, preferred_element_type=jnp.float32)
            y2 = sigmoid(y2 + b2)                            # (Cmid, HW) f32

            # ---- conv3 (1x1, BN folded) + bias -----------------------------
            y3 = jnp.dot(w3, y2.astype(jnp.bfloat16),
                         preferred_element_type=jnp.float32)
            y3 = y3 + b3                                     # (Cout, HW) f32

            # ---- residual add + sigmoid ------------------------------------
            o_ref[b] = sigmoid(y3 + x_f32).astype(o_ref.dtype)

    return kernel


def _fold_bn(conv_bias, gamma, beta, mean, var, eps=EPS):
    """Fold conv bias + eval-mode BatchNorm into per-out-channel (scale, bias)."""
    scale = gamma / jnp.sqrt(var + eps)
    bias = (conv_bias - mean) * scale + beta
    return scale.astype(jnp.float32), bias.astype(jnp.float32)


def bottleneck_forward(x_nchw, params, *, batch_tile=None):
    N, Cin, H, W = x_nchw.shape
    HW = H * W
    w1, w2, w3 = params["w1"], params["w2"], params["w3"]
    Cmid = w1.shape[0]
    Cout = w3.shape[0]
    # No i_downsample => residual requires Cin == out_channels * expansion.
    assert Cout == Cin, "identity path requires in_channels == out_channels * 4"

    if batch_tile is None:
        batch_tile = _choose_batch_tile(N, HW)
    assert N % batch_tile == 0

    tap_rows = ((Cmid + 7) // 8) * 8        # pad each im2col tap to a sublane tile

    # Fold BN scale into bf16 conv weights; keep only per-channel f32 biases.
    s1, b1 = _fold_bn(params["bc1"], *params["bn1"])
    s2, b2 = _fold_bn(params["bc2"], *params["bn2"])
    s3, b3 = _fold_bn(params["bc3"], *params["bn3"])

    w1f = (w1 * s1[:, None]).astype(jnp.bfloat16)                      # (Cmid, Cin)
    w2_oc = jnp.transpose(w2, (3, 0, 1, 2)) * s2[:, None, None, None]  # (co,ky,kx,ci)
    w2_oc = w2_oc.reshape(Cmid, 9, Cmid)
    w2_pad = jnp.pad(w2_oc, ((0, 0), (0, 0), (0, tap_rows - Cmid)))    # zero pad cols
    w2f = w2_pad.reshape(Cmid, 9 * tap_rows).astype(jnp.bfloat16)
    w3f = (w3 * s3[:, None]).astype(jnp.bfloat16)                      # (Cout, Cmid)

    bias_all = jnp.concatenate([b1, b2, b3]).reshape(-1, 1)            # (2*Cmid+Cout, 1)

    # Precomputed border masks for the 9 taps (1 inside, 0 where window leaves image).
    pos = jnp.arange(HW, dtype=jnp.int32)
    hh, ww = pos // W, pos % W
    rows = []
    for ky in range(3):
        for kx in range(3):
            dy, dx = ky - 1, kx - 1
            valid = ((hh + dy >= 0) & (hh + dy < H) &
                     (ww + dx >= 0) & (ww + dx < W))
            rows.append(valid.astype(jnp.float32))
    tap_mask = jnp.stack(rows, axis=0)                                 # (9, HW)

    # No wrapper transpose: NCHW -> (N, Cin, HW) is a pure reshape.
    x3 = x_nchw.reshape(N, Cin, HW).astype(jnp.float32)

    kernel = _make_kernel(W, HW, batch_tile, Cmid, Cout, tap_rows)

    out3 = pl.pallas_call(
        kernel,
        out_shape=jax.ShapeDtypeStruct((N, Cout, HW), jnp.float32),
        grid=(N // batch_tile,),
        in_specs=[
            pl.BlockSpec((batch_tile, Cin, HW), lambda n: (n, 0, 0)),
            pl.BlockSpec((Cmid, Cin), lambda n: (0, 0)),
            pl.BlockSpec((Cmid, 9 * tap_rows), lambda n: (0, 0)),
            pl.BlockSpec((Cout, Cmid), lambda n: (0, 0)),
            pl.BlockSpec((2 * Cmid + Cout, 1), lambda n: (0, 0)),
            pl.BlockSpec((9, HW), lambda n: (0, 0)),
        ],
        out_specs=pl.BlockSpec((batch_tile, Cout, HW), lambda n: (n, 0, 0)),
        compiler_params=pltpu.CompilerParams(
            dimension_semantics=("parallel",)),
    )(x3, w1f, w2f, w3f, bias_all, tap_mask)

    out = out3.reshape(N, Cout, H, W)
    return jnp.squeeze(out)   # torch.squeeze semantics (no size-1 dims here)


def bottleneck_reference(x_nchw, params):
    """Pure-JAX f32 reference of the PyTorch forward (eval-mode BN)."""
    def bn(y, gamma, beta, mean, var):
        return (y - mean) / jnp.sqrt(var + EPS) * gamma + beta

    x = jnp.transpose(x_nchw, (0, 2, 3, 1)).astype(jnp.float32)   # NHWC
    y = jnp.einsum("nhwc,fc->nhwf", x, params["w1"]) + params["bc1"]
    y = jax.nn.sigmoid(bn(y, *params["bn1"]))
    y = lax.conv_general_dilated(
        y, params["w2"], window_strides=(1, 1), padding="SAME",
        dimension_numbers=("NHWC", "HWIO", "NHWC")) + params["bc2"]
    y = jax.nn.sigmoid(bn(y, *params["bn2"]))
    y = jnp.einsum("nhwc,fc->nhwf", y, params["w3"]) + params["bc3"]
    y = bn(y, *params["bn3"])
    y = jax.nn.sigmoid(y + x)
    return jnp.squeeze(jnp.transpose(y, (0, 3, 1, 2)))


def make_params(key, in_channels, out_channels):
    expansion = 4
    Cin, Cmid, Cout = in_channels, out_channels, out_channels * expansion
    ks = jax.random.split(key, 9)

    def bn_params(k, c):
        k1, k2, k3, k4 = jax.random.split(k, 4)
        gamma = 1.0 + 0.1 * jax.random.normal(k1, (c,), jnp.float32)
        beta = 0.1 * jax.random.normal(k2, (c,), jnp.float32)
        mean = 0.1 * jax.random.normal(k3, (c,), jnp.float32)
        var = jax.random.uniform(k4, (c,), jnp.float32, 0.5, 1.5)
        return (gamma, beta, mean, var)

    return {
        "w1": 0.2 * jax.random.normal(ks[0], (Cmid, Cin), jnp.float32),
        "bc1": 0.1 * jax.random.normal(ks[1], (Cmid,), jnp.float32),
        "bn1": bn_params(ks[2], Cmid),
        "w2": 0.2 * jax.random.normal(ks[3], (3, 3, Cmid, Cmid), jnp.float32),  # HWIO
        "bc2": 0.1 * jax.random.normal(ks[4], (Cmid,), jnp.float32),
        "bn2": bn_params(ks[5], Cmid),
        "w3": 0.2 * jax.random.normal(ks[6], (Cout, Cmid), jnp.float32),
        "bc3": 0.1 * jax.random.normal(ks[7], (Cout,), jnp.float32),
        "bn3": bn_params(ks[8], Cout),
    }


if __name__ == "__main__":
    # Bottleneck(in_channels=16, out_channels=4, stride=1, i_downsample=None)
    # => residual add requires Cin == 4*4 == 16.  N=16 lets batch_tile=8 fold
    # several images per grid step while keeping 2 parallel steps (v7x megacore).
    N, Cin, H, W = 16, 16, 16, 16
    out_channels = 4

    key = jax.random.PRNGKey(0)
    k_x, k_p = jax.random.split(key)
    x = jax.random.normal(k_x, (N, Cin, H, W), jnp.float32)   # NCHW like PyTorch
    params = make_params(k_p, Cin, out_channels)

    out = jax.block_until_ready(bottleneck_forward(x, params))
    ref = jax.block_until_ready(bottleneck_reference(x, params))

    assert out.shape == ref.shape, (out.shape, ref.shape)
    # bf16 MXU inputs (f32 accumulation) => compare at bf16-level tolerance.
    assert jnp.allclose(out, ref, atol=2e-2, rtol=2e-2), (
        "mismatch: max abs err = %e" % float(jnp.max(jnp.abs(out - ref))))
    print("KERNEL_OK")
</pallas_src>

<mosaic_0001>
module attributes {stable_mosaic.version = 11 : i64} {
  func.func @kernel(%arg0: i32, %arg1: memref<8x16x256xf32, #tpu.memory_space<vmem>>, %arg2: memref<4x16xbf16, #tpu.memory_space<vmem>>, %arg3: memref<4x72xbf16, #tpu.memory_space<vmem>>, %arg4: memref<16x4xbf16, #tpu.memory_space<vmem>>, %arg5: memref<24x1xf32, #tpu.memory_space<vmem>>, %arg6: memref<9x256xf32, #tpu.memory_space<vmem>>, %arg7: memref<8x16x256xf32, #tpu.memory_space<vmem>>) attributes {dimension_semantics = [#tpu.dimension_semantics<parallel>], iteration_bounds = array<i64: 2>, scalar_prefetch = 0 : i64, scratch_operands = 0 : i64, tpu.core_type = #tpu.core_type<tc>, window_params = [{transform_indices = @transform_0, window_bounds = array<i64: 8, 16, 256>}, {pipeline_mode = #tpu.pipeline_mode<synchronous>, transform_indices = @transform_1, window_bounds = array<i64: 4, 16>}, {pipeline_mode = #tpu.pipeline_mode<synchronous>, transform_indices = @transform_2, window_bounds = array<i64: 4, 72>}, {pipeline_mode = #tpu.pipeline_mode<synchronous>, transform_indices = @transform_3, window_bounds = array<i64: 16, 4>}, {pipeline_mode = #tpu.pipeline_mode<synchronous>, transform_indices = @transform_4, window_bounds = array<i64: 24, 1>}, {pipeline_mode = #tpu.pipeline_mode<synchronous>, transform_indices = @transform_5, window_bounds = array<i64: 9, 256>}, {transform_indices = @transform_6, window_bounds = array<i64: 8, 16, 256>}]} {
    %c0 = arith.constant 0 : index
    %c0_0 = arith.constant 0 : index
    %0 = vector.load %arg2[%c0, %c0_0] : memref<4x16xbf16, #tpu.memory_space<vmem>>, vector<4x16xbf16>
    %c0_1 = arith.constant 0 : index
    %c0_2 = arith.constant 0 : index
    %1 = vector.load %arg3[%c0_1, %c0_2] : memref<4x72xbf16, #tpu.memory_space<vmem>>, vector<4x72xbf16>
    %c0_3 = arith.constant 0 : index
    %c0_4 = arith.constant 0 : index
    %2 = vector.load %arg4[%c0_3, %c0_4] : memref<16x4xbf16, #tpu.memory_space<vmem>>, vector<16x4xbf16>
    %c0_5 = arith.constant 0 : index
    %c0_6 = arith.constant 0 : index
    %3 = vector.load %arg5[%c0_5, %c0_6] : memref<24x1xf32, #tpu.memory_space<vmem>>, vector<24x1xf32>
    %4 = vector.extract_strided_slice %3 {offsets = [0, 0], sizes = [4, 1], strides = [1, 1]} : vector<24x1xf32> to vector<4x1xf32>
    %5 = vector.extract_strided_slice %3 {offsets = [4, 0], sizes = [4, 1], strides = [1, 1]} : vector<24x1xf32> to vector<4x1xf32>
    %6 = vector.extract_strided_slice %3 {offsets = [8, 0], sizes = [16, 1], strides = [1, 1]} : vector<24x1xf32> to vector<16x1xf32>
    %c0_7 = arith.constant 0 : index
    %c0_8 = arith.constant 0 : index
    %7 = vector.load %arg6[%c0_7, %c0_8] : memref<9x256xf32, #tpu.memory_space<vmem>>, vector<9x256xf32>
    %8 = vector.extract_strided_slice %7 {offsets = [0, 0], sizes = [1, 256], strides = [1, 1]} : vector<9x256xf32> to vector<1x256xf32>
    %9 = vector.extract_strided_slice %7 {offsets = [1, 0], sizes = [1, 256], strides = [1, 1]} : vector<9x256xf32> to vector<1x256xf32>
    %10 = vector.extract_strided_slice %7 {offsets = [2, 0], sizes = [1, 256], strides = [1, 1]} : vector<9x256xf32> to vector<1x256xf32>
    %11 = vector.extract_strided_slice %7 {offsets = [3, 0], sizes = [1, 256], strides = [1, 1]} : vector<9x256xf32> to vector<1x256xf32>
    %12 = vector.extract_strided_slice %7 {offsets = [5, 0], sizes = [1, 256], strides = [1, 1]} : vector<9x256xf32> to vector<1x256xf32>
    %13 = vector.extract_strided_slice %7 {offsets = [6, 0], sizes = [1, 256], strides = [1, 1]} : vector<9x256xf32> to vector<1x256xf32>
    %14 = vector.extract_strided_slice %7 {offsets = [7, 0], sizes = [1, 256], strides = [1, 1]} : vector<9x256xf32> to vector<1x256xf32>
    %15 = vector.extract_strided_slice %7 {offsets = [8, 0], sizes = [1, 256], strides = [1, 1]} : vector<9x256xf32> to vector<1x256xf32>
    %cst = arith.constant 0.000000e+00 : f32
    %16 = vector.broadcast %cst : f32 to vector<4x256xf32>
    %c0_9 = arith.constant 0 : index
    %c0_10 = arith.constant 0 : index
    %c0_11 = arith.constant 0 : index
    %17 = vector.load %arg1[%c0_9, %c0_10, %c0_11] : memref<8x16x256xf32, #tpu.memory_space<vmem>>, vector<1x16x256xf32>
    %18 = vector.shape_cast %17 : vector<1x16x256xf32> to vector<16x256xf32>
    %19 = arith.truncf %18 : vector<16x256xf32> to vector<16x256xbf16>
    %cst_12 = arith.constant dense<0.000000e+00> : vector<4x256xf32>
    %20 = tpu.matmul %0, %19, %cst_12 {dimension_numbers = #tpu.dot_dimension_numbers<[1], [0], [0], [1], [0, 0, 1, 1], [], []>} : vector<4x16xbf16>, vector<16x256xbf16>, vector<4x256xf32> -> vector<4x256xf32>
    %21 = vector.broadcast %4 : vector<4x1xf32> to vector<4x256xf32>
    %22 = arith.addf %20, %21 : vector<4x256xf32>
    %cst_13 = arith.constant 5.000000e-01 : f32
    %23 = vector.broadcast %cst_13 : f32 to vector<4x256xf32>
    %24 = arith.mulf %23, %22 : vector<4x256xf32>
    %25 = math.tanh %24 : vector<4x256xf32>
    %cst_14 = arith.constant 5.000000e-01 : f32
    %26 = vector.broadcast %cst_14 : f32 to vector<4x256xf32>
    %27 = arith.mulf %26, %25 : vector<4x256xf32>
    %cst_15 = arith.constant 5.000000e-01 : f32
    %28 = vector.broadcast %cst_15 : f32 to vector<4x256xf32>
    %29 = arith.addf %27, %28 : vector<4x256xf32>
    %30 = tpu.concatenate %29, %16 in 0 : vector<4x256xf32>, vector<4x256xf32> -> vector<8x256xf32>
    %c17_i32 = arith.constant 17 : i32
    %31 = tpu.dynamic_rotate %30 by %c17_i32 dim 1 : vector<8x256xf32>, i32 -> vector<8x256xf32>
    %32 = vector.broadcast %8 : vector<1x256xf32> to vector<8x256xf32>
    %33 = arith.mulf %31, %32 : vector<8x256xf32>
    %c16_i32 = arith.constant 16 : i32
    %34 = tpu.dynamic_rotate %30 by %c16_i32 dim 1 : vector<8x256xf32>, i32 -> vector<8x256xf32>
    %35 = vector.broadcast %9 : vector<1x256xf32> to vector<8x256xf32>
    %36 = arith.mulf %34, %35 : vector<8x256xf32>
    %c15_i32 = arith.constant 15 : i32
    %37 = tpu.dynamic_rotate %30 by %c15_i32 dim 1 : vector<8x256xf32>, i32 -> vector<8x256xf32>
    %38 = vector.broadcast %10 : vector<1x256xf32> to vector<8x256xf32>
    %39 = arith.mulf %37, %38 : vector<8x256xf32>
    %c1_i32 = arith.constant 1 : i32
    %40 = tpu.dynamic_rotate %30 by %c1_i32 dim 1 : vector<8x256xf32>, i32 -> vector<8x256xf32>
    %41 = vector.broadcast %11 : vector<1x256xf32> to vector<8x256xf32>
    %42 = arith.mulf %40, %41 : vector<8x256xf32>
    %c255_i32 = arith.constant 255 : i32
    %43 = tpu.dynamic_rotate %30 by %c255_i32 dim 1 : vector<8x256xf32>, i32 -> vector<8x256xf32>
    %44 = vector.broadcast %12 : vector<1x256xf32> to vector<8x256xf32>
    %45 = arith.mulf %43, %44 : vector<8x256xf32>
    %c241_i32 = arith.constant 241 : i32
    %46 = tpu.dynamic_rotate %30 by %c241_i32 dim 1 : vector<8x256xf32>, i32 -> vector<8x256xf32>
    %47 = vector.broadcast %13 : vector<1x256xf32> to vector<8x256xf32>
    %48 = arith.mulf %46, %47 : vector<8x256xf32>
    %c240_i32 = arith.constant 240 : i32
    %49 = tpu.dynamic_rotate %30 by %c240_i32 dim 1 : vector<8x256xf32>, i32 -> vector<8x256xf32>
    %50 = vector.broadcast %14 : vector<1x256xf32> to vector<8x256xf32>
    %51 = arith.mulf %49, %50 : vector<8x256xf32>
    %c239_i32 = arith.constant 239 : i32
    %52 = tpu.dynamic_rotate %30 by %c239_i32 dim 1 : vector<8x256xf32>, i32 -> vector<8x256xf32>
    %53 = vector.broadcast %15 : vector<1x256xf32> to vector<8x256xf32>
    %54 = arith.mulf %52, %53 : vector<8x256xf32>
    %55 = tpu.concatenate %33, %36, %39, %42, %30, %45, %48, %51, %54 in 0 : vector<8x256xf32>, vector<8x256xf32>, vector<8x256xf32>, vector<8x256xf32>, vector<8x256xf32>, vector<8x256xf32>, vector<8x256xf32>, vector<8x256xf32>, vector<8x256xf32> -> vector<72x256xf32>
    %56 = arith.truncf %55 : vector<72x256xf32> to vector<72x256xbf16>
    %cst_16 = arith.constant dense<0.000000e+00> : vector<4x256xf32>
    %57 = tpu.matmul %1, %56, %cst_16 {dimension_numbers = #tpu.dot_dimension_numbers<[1], [0], [0], [1], [0, 0, 1, 1], [], []>} : vector<4x72xbf16>, vector<72x256xbf16>, vector<4x256xf32> -> vector<4x256xf32>
    %58 = vector.broadcast %5 : vector<4x1xf32> to vector<4x256xf32>
    %59 = arith.addf %57, %58 : vector<4x256xf32>
    %cst_17 = arith.constant 5.000000e-01 : f32
    %60 = vector.broadcast %cst_17 : f32 to vector<4x256xf32>
    %61 = arith.mulf %60, %59 : vector<4x256xf32>
    %62 = math.tanh %61 : vector<4x256xf32>
    %cst_18 = arith.constant 5.000000e-01 : f32
    %63 = vector.broadcast %cst_18 : f32 to vector<4x256xf32>
    %64 = arith.mulf %63, %62 : vector<4x256xf32>
    %cst_19 = arith.constant 5.000000e-01 : f32
    %65 = vector.broadcast %cst_19 : f32 to vector<4x256xf32>
    %66 = arith.addf %64, %65 : vector<4x256xf32>
    %67 = arith.truncf %66 : vector<4x256xf32> to vector<4x256xbf16>
    %cst_20 = arith.constant dense<0.000000e+00> : vector<16x256xf32>
    %68 = tpu.matmul %2, %67, %cst_20 {dimension_numbers = #tpu.dot_dimension_numbers<[1], [0], [0], [1], [0, 0, 1, 1], [], []>} : vector<16x4xbf16>, vector<4x256xbf16>, vector<16x256xf32> -> vector<16x256xf32>
    %69 = vector.broadcast %6 : vector<16x1xf32> to vector<16x256xf32>
    %70 = arith.addf %68, %69 : vector<16x256xf32>
    %71 = arith.addf %70, %18 : vector<16x256xf32>
    %cst_21 = arith.constant 5.000000e-01 : f32
    %72 = vector.broadcast %cst_21 : f32 to vector<16x256xf32>
    %73 = arith.mulf %72, %71 : vector<16x256xf32>
    %74 = math.tanh %73 : vector<16x256xf32>
    %cst_22 = arith.constant 5.000000e-01 : f32
    %75 = vector.broadcast %cst_22 : f32 to vector<16x256xf32>
    %76 = arith.mulf %75, %74 : vector<16x256xf32>
    %cst_23 = arith.constant 5.000000e-01 : f32
    %77 = vector.broadcast %cst_23 : f32 to vector<16x256xf32>
    %78 = arith.addf %76, %77 : vector<16x256xf32>
    %c0_24 = arith.constant 0 : index
    %c0_25 = arith.constant 0 : index
    %c0_26 = arith.constant 0 : index
    %79 = vector.load %arg7[%c0_24, %c0_25, %c0_26] : memref<8x16x256xf32, #tpu.memory_space<vmem>>, vector<1x16x256xf32>
    %80 = vector.shape_cast %79 : vector<1x16x256xf32> to vector<16x256xf32>
    %81 = vector.shape_cast %78 : vector<16x256xf32> to vector<1x16x256xf32>
    tpu.vector_store %arg7[%c0_24, %c0_25, %c0_26], %81 {strides = array<i32>} : memref<8x16x256xf32, #tpu.memory_space<vmem>>, vector<1x16x256xf32>,
    %c1 = arith.constant 1 : index
    %c0_27 = arith.constant 0 : index
    %c0_28 = arith.constant 0 : index
    %82 = vector.load %arg1[%c1, %c0_27, %c0_28] : memref<8x16x256xf32, #tpu.memory_space<vmem>>, vector<1x16x256xf32>
    %83 = vector.shape_cast %82 : vector<1x16x256xf32> to vector<16x256xf32>
    %84 = arith.truncf %83 : vector<16x256xf32> to vector<16x256xbf16>
    %cst_29 = arith.constant dense<0.000000e+00> : vector<4x256xf32>
    %85 = tpu.matmul %0, %84, %cst_29 {dimension_numbers = #tpu.dot_dimension_numbers<[1], [0], [0], [1], [0, 0, 1, 1], [], []>} : vector<4x16xbf16>, vector<16x256xbf16>, vector<4x256xf32> -> vector<4x256xf32>
    %86 = vector.broadcast %4 : vector<4x1xf32> to vector<4x256xf32>
    %87 = arith.addf %85, %86 : vector<4x256xf32>
    %cst_30 = arith.constant 5.000000e-01 : f32
    %88 = vector.broadcast %cst_30 : f32 to vector<4x256xf32>
    %89 = arith.mulf %88, %87 : vector<4x256xf32>
    %90 = math.tanh %89 : vector<4x256xf32>
    %cst_31 = arith.constant 5.000000e-01 : f32
    %91 = vector.broadcast %cst_31 : f32 to vector<4x256xf32>
    %92 = arith.mulf %91, %90 : vector<4x256xf32>
    %cst_32 = arith.constant 5.000000e-01 : f32
    %93 = vector.broadcast %cst_32 : f32 to vector<4x256xf32>
    %94 = arith.addf %92, %93 : vector<4x256xf32>
    %95 = tpu.concatenate %94, %16 in 0 : vector<4x256xf32>, vector<4x256xf32> -> vector<8x256xf32>
    %c17_i32_33 = arith.constant 17 : i32
    %96 = tpu.dynamic_rotate %95 by %c17_i32_33 dim 1 : vector<8x256xf32>, i32 -> vector<8x256xf32>
    %97 = vector.broadcast %8 : vector<1x256xf32> to vector<8x256xf32>
    %98 = arith.mulf %96, %97 : vector<8x256xf32>
    %c16_i32_34 = arith.constant 16 : i32
    %99 = tpu.dynamic_rotate %95 by %c16_i32_34 dim 1 : vector<8x256xf32>, i32 -> vector<8x256xf32>
    %100 = vector.broadcast %9 : vector<1x256xf32> to vector<8x256xf32>
    %101 = arith.mulf %99, %100 : vector<8x256xf32>
    %c15_i32_35 = arith.constant 15 : i32
    %102 = tpu.dynamic_rotate %95 by %c15_i32_35 dim 1 : vector<8x256xf32>, i32 -> vector<8x256xf32>
    %103 = vector.broadcast %10 : vector<1x256xf32> to vector<8x256xf32>
    %104 = arith.mulf %102, %103 : vector<8x256xf32>
    %c1_i32_36 = arith.constant 1 : i32
    %105 = tpu.dynamic_rotate %95 by %c1_i32_36 dim 1 : vector<8x256xf32>, i32 -> vector<8x256xf32>
    %106 = vector.broadcast %11 : vector<1x256xf32> to vector<8x256xf32>
    %107 = arith.mulf %105, %106 : vector<8x256xf32>
    %c255_i32_37 = arith.constant 255 : i32
    %108 = tpu.dynamic_rotate %95 by %c255_i32_37 dim 1 : vector<8x256xf32>, i32 -> vector<8x256xf32>
    %109 = vector.broadcast %12 : vector<1x256xf32> to vector<8x256xf32>
    %110 = arith.mulf %108, %109 : vector<8x256xf32>
    %c241_i32_38 = arith.constant 241 : i32
    %111 = tpu.dynamic_rotate %95 by %c241_i32_38 dim 1 : vector<8x256xf32>, i32 -> vector<8x256xf32>
    %112 = vector.broadcast %13 : vector<1x256xf32> to vector<8x256xf32>
    %113 = arith.mulf %111, %112 : vector<8x256xf32>
    %c240_i32_39 = arith.constant 240 : i32
    %114 = tpu.dynamic_rotate %95 by %c240_i32_39 dim 1 : vector<8x256xf32>, i32 -> vector<8x256xf32>
    %115 = vector.broadcast %14 : vector<1x256xf32> to vector<8x256xf32>
    %116 = arith.mulf %114, %115 : vector<8x256xf32>
    %c239_i32_40 = arith.constant 239 : i32
    %117 = tpu.dynamic_rotate %95 by %c239_i32_40 dim 1 : vector<8x256xf32>, i32 -> vector<8x256xf32>
    %118 = vector.broadcast %15 : vector<1x256xf32> to vector<8x256xf32>
    %119 = arith.mulf %117, %118 : vector<8x256xf32>
    %120 = tpu.concatenate %98, %101, %104, %107, %95, %110, %113, %116, %119 in 0 : vector<8x256xf32>, vector<8x256xf32>, vector<8x256xf32>, vector<8x256xf32>, vector<8x256xf32>, vector<8x256xf32>, vector<8x256xf32>, vector<8x256xf32>, vector<8x256xf32> -> vector<72x256xf32>
    %121 = arith.truncf %120 : vector<72x256xf32> to vector<72x256xbf16>
    %cst_41 = arith.constant dense<0.000000e+00> : vector<4x256xf32>
    %122 = tpu.matmul %1, %121, %cst_41 {dimension_numbers = #tpu.dot_dimension_numbers<[1], [0], [0], [1], [0, 0, 1, 1], [], []>} : vector<4x72xbf16>, vector<72x256xbf16>, vector<4x256xf32> -> vector<4x256xf32>
    %123 = vector.broadcast %5 : vector<4x1xf32> to vector<4x256xf32>
    %124 = arith.addf %122, %123 : vector<4x256xf32>
    %cst_42 = arith.constant 5.000000e-01 : f32
    %125 = vector.broadcast %cst_42 : f32 to vector<4x256xf32>
    %126 = arith.mulf %125, %124 : vector<4x256xf32>
    %127 = math.tanh %126 : vector<4x256xf32>
    %cst_43 = arith.constant 5.000000e-01 : f32
    %128 = vector.broadcast %cst_43 : f32 to vector<4x256xf32>
    %129 = arith.mulf %128, %127 : vector<4x256xf32>
    %cst_44 = arith.constant 5.000000e-01 : f32
    %130 = vector.broadcast %cst_44 : f32 to vector<4x256xf32>
    %131 = arith.addf %129, %130 : vector<4x256xf32>
    %132 = arith.truncf %131 : vector<4x256xf32> to vector<4x256xbf16>
    %cst_45 = arith.constant dense<0.000000e+00> : vector<16x256xf32>
    %133 = tpu.matmul %2, %132, %cst_45 {dimension_numbers = #tpu.dot_dimension_numbers<[1], [0], [0], [1], [0, 0, 1, 1], [], []>} : vector<16x4xbf16>, vector<4x256xbf16>, vector<16x256xf32> -> vector<16x256xf32>
    %134 = vector.broadcast %6 : vector<16x1xf32> to vector<16x256xf32>
    %135 = arith.addf %133, %134 : vector<16x256xf32>
    %136 = arith.addf %135, %83 : vector<16x256xf32>
    %cst_46 = arith.constant 5.000000e-01 : f32
    %137 = vector.broadcast %cst_46 : f32 to vector<16x256xf32>
    %138 = arith.mulf %137, %136 : vector<16x256xf32>
    %139 = math.tanh %138 : vector<16x256xf32>
    %cst_47 = arith.constant 5.000000e-01 : f32
    %140 = vector.broadcast %cst_47 : f32 to vector<16x256xf32>
    %141 = arith.mulf %140, %139 : vector<16x256xf32>
    %cst_48 = arith.constant 5.000000e-01 : f32
    %142 = vector.broadcast %cst_48 : f32 to vector<16x256xf32>
    %143 = arith.addf %141, %142 : vector<16x256xf32>
    %c1_49 = arith.constant 1 : index
    %c0_50 = arith.constant 0 : index
    %c0_51 = arith.constant 0 : index
    %144 = vector.load %arg7[%c1_49, %c0_50, %c0_51] : memref<8x16x256xf32, #tpu.memory_space<vmem>>, vector<1x16x256xf32>
    %145 = vector.shape_cast %144 : vector<1x16x256xf32> to vector<16x256xf32>
    %146 = vector.shape_cast %143 : vector<16x256xf32> to vector<1x16x256xf32>
    tpu.vector_store %arg7[%c1_49, %c0_50, %c0_51], %146 {strides = array<i32>} : memref<8x16x256xf32, #tpu.memory_space<vmem>>, vector<1x16x256xf32>,
    %c2 = arith.constant 2 : index
    %c0_52 = arith.constant 0 : index
    %c0_53 = arith.constant 0 : index
    %147 = vector.load %arg1[%c2, %c0_52, %c0_53] : memref<8x16x256xf32, #tpu.memory_space<vmem>>, vector<1x16x256xf32>
    %148 = vector.shape_cast %147 : vector<1x16x256xf32> to vector<16x256xf32>
    %149 = arith.truncf %148 : vector<16x256xf32> to vector<16x256xbf16>
    %cst_54 = arith.constant dense<0.000000e+00> : vector<4x256xf32>
    %150 = tpu.matmul %0, %149, %cst_54 {dimension_numbers = #tpu.dot_dimension_numbers<[1], [0], [0], [1], [0, 0, 1, 1], [], []>} : vector<4x16xbf16>, vector<16x256xbf16>, vector<4x256xf32> -> vector<4x256xf32>
    %151 = vector.broadcast %4 : vector<4x1xf32> to vector<4x256xf32>
    %152 = arith.addf %150, %151 : vector<4x256xf32>
    %cst_55 = arith.constant 5.000000e-01 : f32
    %153 = vector.broadcast %cst_55 : f32 to vector<4x256xf32>
    %154 = arith.mulf %153, %152 : vector<4x256xf32>
    %155 = math.tanh %154 : vector<4x256xf32>
    %cst_56 = arith.constant 5.000000e-01 : f32
    %156 = vector.broadcast %cst_56 : f32 to vector<4x256xf32>
    %157 = arith.mulf %156, %155 : vector<4x256xf32>
    %cst_57 = arith.constant 5.000000e-01 : f32
    %158 = vector.broadcast %cst_57 : f32 to vector<4x256xf32>
    %159 = arith.addf %157, %158 : vector<4x256xf32>
    %160 = tpu.concatenate %159, %16 in 0 : vector<4x256xf32>, vector<4x256xf32> -> vector<8x256xf32>
    %c17_i32_58 = arith.constant 17 : i32
    %161 = tpu.dynamic_rotate %160 by %c17_i32_58 dim 1 : vector<8x256xf32>, i32 -> vector<8x256xf32>
    %162 = vector.broadcast %8 : vector<1x256xf32> to vector<8x256xf32>
    %163 = arith.mulf %161, %162 : vector<8x256xf32>
    %c16_i32_59 = arith.constant 16 : i32
    %164 = tpu.dynamic_rotate %160 by %c16_i32_59 dim 1 : vector<8x256xf32>, i32 -> vector<8x256xf32>
    %165 = vector.broadcast %9 : vector<1x256xf32> to vector<8x256xf32>
    %166 = arith.mulf %164, %165 : vector<8x256xf32>
    %c15_i32_60 = arith.constant 15 : i32
    %167 = tpu.dynamic_rotate %160 by %c15_i32_60 dim 1 : vector<8x256xf32>, i32 -> vector<8x256xf32>
    %168 = vector.broadcast %10 : vector<1x256xf32> to vector<8x256xf32>
    %169 = arith.mulf %167, %168 : vector<8x256xf32>
    %c1_i32_61 = arith.constant 1 : i32
    %170 = tpu.dynamic_rotate %160 by %c1_i32_61 dim 1 : vector<8x256xf32>, i32 -> vector<8x256xf32>
    %171 = vector.broadcast %11 : vector<1x256xf32> to vector<8x256xf32>
    %172 = arith.mulf %170, %171 : vector<8x256xf32>
    %c255_i32_62 = arith.constant 255 : i32
    %173 = tpu.dynamic_rotate %160 by %c255_i32_62 dim 1 : vector<8x256xf32>, i32 -> vector<8x256xf32>
    %174 = vector.broadcast %12 : vector<1x256xf32> to vector<8x256xf32>
    %175 = arith.mulf %173, %174 : vector<8x256xf32>
    %c241_i32_63 = arith.constant 241 : i32
    %176 = tpu.dynamic_rotate %160 by %c241_i32_63 dim 1 : vector<8x256xf32>, i32 -> vector<8x256xf32>
    %177 = vector.broadcast %13 : vector<1x256xf32> to vector<8x256xf32>
    %178 = arith.mulf %176, %177 : vector<8x256xf32>
    %c240_i32_64 = arith.constant 240 : i32
    %179 = tpu.dynamic_rotate %160 by %c240_i32_64 dim 1 : vector<8x256xf32>, i32 -> vector<8x256xf32>
    %180 = vector.broadcast %14 : vector<1x256xf32> to vector<8x256xf32>
    %181 = arith.mulf %179, %180 : vector<8x256xf32>
    %c239_i32_65 = arith.constant 239 : i32
    %182 = tpu.dynamic_rotate %160 by %c239_i32_65 dim 1 : vector<8x256xf32>, i32 -> vector<8x256xf32>
    %183 = vector.broadcast %15 : vector<1x256xf32> to vector<8x256xf32>
    %184 = arith.mulf %182, %183 : vector<8x256xf32>
    %185 = tpu.concatenate %163, %166, %169, %172, %160, %175, %178, %181, %184 in 0 : vector<8x256xf32>, vector<8x256xf32>, vector<8x256xf32>, vector<8x256xf32>, vector<8x256xf32>, vector<8x256xf32>, vector<8x256xf32>, vector<8x256xf32>, vector<8x256xf32> -> vector<72x256xf32>
    %186 = arith.truncf %185 : vector<72x256xf32> to vector<72x256xbf16>
    %cst_66 = arith.constant dense<0.000000e+00> : vector<4x256xf32>
    %187 = tpu.matmul %1, %186, %cst_66 {dimension_numbers = #tpu.dot_dimension_numbers<[1], [0], [0], [1], [0, 0, 1, 1], [], []>} : vector<4x72xbf16>, vector<72x256xbf16>, vector<4x256xf32> -> vector<4x256xf32>
    %188 = vector.broadcast %5 : vector<4x1xf32> to vector<4x256xf32>
    %189 = arith.addf %187, %188 : vector<4x256xf32>
    %cst_67 = arith.constant 5.000000e-01 : f32
    %190 = vector.broadcast %cst_67 : f32 to vector<4x256xf32>
    %191 = arith.mulf %190, %189 : vector<4x256xf32>
    %192 = math.tanh %191 : vector<4x256xf32>
    %cst_68 = arith.constant 5.000000e-01 : f32
    %193 = vector.broadcast %cst_68 : f32 to vector<4x256xf32>
    %194 = arith.mulf %193, %192 : vector<4x256xf32>
    %cst_69 = arith.constant 5.000000e-01 : f32
    %195 = vector.broadcast %cst_69 : f32 to vector<4x256xf32>
    %196 = arith.addf %194, %195 : vector<4x256xf32>
    %197 = arith.truncf %196 : vector<4x256xf32> to vector<4x256xbf16>
    %cst_70 = arith.constant dense<0.000000e+00> : vector<16x256xf32>
    %198 = tpu.matmul %2, %197, %cst_70 {dimension_numbers = #tpu.dot_dimension_numbers<[1], [0], [0], [1], [0, 0, 1, 1], [], []>} : vector<16x4xbf16>, vector<4x256xbf16>, vector<16x256xf32> -> vector<16x256xf32>
    %199 = vector.broadcast %6 : vector<16x1xf32> to vector<16x256xf32>
    %200 = arith.addf %198, %199 : vector<16x256xf32>
    %201 = arith.addf %200, %148 : vector<16x256xf32>
    %cst_71 = arith.constant 5.000000e-01 : f32
    %202 = vector.broadcast %cst_71 : f32 to vector<16x256xf32>
    %203 = arith.mulf %202, %201 : vector<16x256xf32>
    %204 = math.tanh %203 : vector<16x256xf32>
    %cst_72 = arith.constant 5.000000e-01 : f32
    %205 = vector.broadcast %cst_72 : f32 to vector<16x256xf32>
    %206 = arith.mulf %205, %204 : vector<16x256xf32>
    %cst_73 = arith.constant 5.000000e-01 : f32
    %207 = vector.broadcast %cst_73 : f32 to vector<16x256xf32>
    %208 = arith.addf %206, %207 : vector<16x256xf32>
    %c2_74 = arith.constant 2 : index
    %c0_75 = arith.constant 0 : index
    %c0_76 = arith.constant 0 : index
    %209 = vector.load %arg7[%c2_74, %c0_75, %c0_76] : memref<8x16x256xf32, #tpu.memory_space<vmem>>, vector<1x16x256xf32>
    %210 = vector.shape_cast %209 : vector<1x16x256xf32> to vector<16x256xf32>
    %211 = vector.shape_cast %208 : vector<16x256xf32> to vector<1x16x256xf32>
    tpu.vector_store %arg7[%c2_74, %c0_75, %c0_76], %211 {strides = array<i32>} : memref<8x16x256xf32, #tpu.memory_space<vmem>>, vector<1x16x256xf32>,
    %c3 = arith.constant 3 : index
    %c0_77 = arith.constant 0 : index
    %c0_78 = arith.constant 0 : index
    %212 = vector.load %arg1[%c3, %c0_77, %c0_78] : memref<8x16x256xf32, #tpu.memory_space<vmem>>, vector<1x16x256xf32>
    %213 = vector.shape_cast %212 : vector<1x16x256xf32> to vector<16x256xf32>
    %214 = arith.truncf %213 : vector<16x256xf32> to vector<16x256xbf16>
    %cst_79 = arith.constant dense<0.000000e+00> : vector<4x256xf32>
    %215 = tpu.matmul %0, %214, %cst_79 {dimension_numbers = #tpu.dot_dimension_numbers<[1], [0], [0], [1], [0, 0, 1, 1], [], []>} : vector<4x16xbf16>, vector<16x256xbf16>, vector<4x256xf32> -> vector<4x256xf32>
    %216 = vector.broadcast %4 : vector<4x1xf32> to vector<4x256xf32>
    %217 = arith.addf %215, %216 : vector<4x256xf32>
    %cst_80 = arith.constant 5.000000e-01 : f32
    %218 = vector.broadcast %cst_80 : f32 to vector<4x256xf32>
    %219 = arith.mulf %218, %217 : vector<4x256xf32>
    %220 = math.tanh %219 : vector<4x256xf32>
    %cst_81 = arith.constant 5.000000e-01 : f32
    %221 = vector.broadcast %cst_81 : f32 to vector<4x256xf32>
    %222 = arith.mulf %221, %220 : vector<4x256xf32>
    %cst_82 = arith.constant 5.000000e-01 : f32
    %223 = vector.broadcast %cst_82 : f32 to vector<4x256xf32>
    %224 = arith.addf %222, %223 : vector<4x256xf32>
    %225 = tpu.concatenate %224, %16 in 0 : vector<4x256xf32>, vector<4x256xf32> -> vector<8x256xf32>
    %c17_i32_83 = arith.constant 17 : i32
    %226 = tpu.dynamic_rotate %225 by %c17_i32_83 dim 1 : vector<8x256xf32>, i32 -> vector<8x256xf32>
    %227 = vector.broadcast %8 : vector<1x256xf32> to vector<8x256xf32>
    %228 = arith.mulf %226, %227 : vector<8x256xf32>
    %c16_i32_84 = arith.constant 16 : i32
    %229 = tpu.dynamic_rotate %225 by %c16_i32_84 dim 1 : vector<8x256xf32>, i32 -> vector<8x256xf32>
    %230 = vector.broadcast %9 : vector<1x256xf32> to vector<8x256xf32>
    %231 = arith.mulf %229, %230 : vector<8x256xf32>
    %c15_i32_85 = arith.constant 15 : i32
    %232 = tpu.dynamic_rotate %225 by %c15_i32_85 dim 1 : vector<8x256xf32>, i32 -> vector<8x256xf32>
    %233 = vector.broadcast %10 : vector<1x256xf32> to vector<8x256xf32>
    %234 = arith.mulf %232, %233 : vector<8x256xf32>
    %c1_i32_86 = arith.constant 1 : i32
    %235 = tpu.dynamic_rotate %225 by %c1_i32_86 dim 1 : vector<8x256xf32>, i32 -> vector<8x256xf32>
    %236 = vector.broadcast %11 : vector<1x256xf32> to vector<8x256xf32>
    %237 = arith.mulf %235, %236 : vector<8x256xf32>
    %c255_i32_87 = arith.constant 255 : i32
    %238 = tpu.dynamic_rotate %225 by %c255_i32_87 dim 1 : vector<8x256xf32>, i32 -> vector<8x256xf32>
    %239 = vector.broadcast %12 : vector<1x256xf32> to vector<8x256xf32>
    %240 = arith.mulf %238, %239 : vector<8x256xf32>
    %c241_i32_88 = arith.constant 241 : i32
    %241 = tpu.dynamic_rotate %225 by %c241_i32_88 dim 1 : vector<8x256xf32>, i32 -> vector<8x256xf32>
    %242 = vector.broadcast %13 : vector<1x256xf32> to vector<8x256xf32>
    %243 = arith.mulf %241, %242 : vector<8x256xf32>
    %c240_i32_89 = arith.constant 240 : i32
    %244 = tpu.dynamic_rotate %225 by %c240_i32_89 dim 1 : vector<8x256xf32>, i32 -> vector<8x256xf32>
    %245 = vector.broadcast %14 : vector<1x256xf32> to vector<8x256xf32>
    %246 = arith.mulf %244, %245 : vector<8x256xf32>
    %c239_i32_90 = arith.constant 239 : i32
    %247 = tpu.dynamic_rotate %225 by %c239_i32_90 dim 1 : vector<8x256xf32>, i32 -> vector<8x256xf32>
    %248 = vector.broadcast %15 : vector<1x256xf32> to vector<8x256xf32>
    %249 = arith.mulf %247, %248 : vector<8x256xf32>
    %250 = tpu.concatenate %228, %231, %234, %237, %225, %240, %243, %246, %249 in 0 : vector<8x256xf32>, vector<8x256xf32>, vector<8x256xf32>, vector<8x256xf32>, vector<8x256xf32>, vector<8x256xf32>, vector<8x256xf32>, vector<8x256xf32>, vector<8x256xf32> -> vector<72x256xf32>
    %251 = arith.truncf %250 : vector<72x256xf32> to vector<72x256xbf16>
    %cst_91 = arith.constant dense<0.000000e+00> : vector<4x256xf32>
    %252 = tpu.matmul %1, %251, %cst_91 {dimension_numbers = #tpu.dot_dimension_numbers<[1], [0], [0], [1], [0, 0, 1, 1], [], []>} : vector<4x72xbf16>, vector<72x256xbf16>, vector<4x256xf32> -> vector<4x256xf32>
    %253 = vector.broadcast %5 : vector<4x1xf32> to vector<4x256xf32>
    %254 = arith.addf %252, %253 : vector<4x256xf32>
    %cst_92 = arith.constant 5.000000e-01 : f32
    %255 = vector.broadcast %cst_92 : f32 to vector<4x256xf32>
    %256 = arith.mulf %255, %254 : vector<4x256xf32>
    %257 = math.tanh %256 : vector<4x256xf32>
    %cst_93 = arith.constant 5.000000e-01 : f32
    %258 = vector.broadcast %cst_93 : f32 to vector<4x256xf32>
    %259 = arith.mulf %258, %257 : vector<4x256xf32>
    %cst_94 = arith.constant 5.000000e-01 : f32
    %260 = vector.broadcast %cst_94 : f32 to vector<4x256xf32>
    %261 = arith.addf %259, %260 : vector<4x256xf32>
    %262 = arith.truncf %261 : vector<4x256xf32> to vector<4x256xbf16>
    %cst_95 = arith.constant dense<0.000000e+00> : vector<16x256xf32>
    %263 = tpu.matmul %2, %262, %cst_95 {dimension_numbers = #tpu.dot_dimension_numbers<[1], [0], [0], [1], [0, 0, 1, 1], [], []>} : vector<16x4xbf16>, vector<4x256xbf16>, vector<16x256xf32> -> vector<16x256xf32>
    %264 = vector.broadcast %6 : vector<16x1xf32> to vector<16x256xf32>
    %265 = arith.addf %263, %264 : vector<16x256xf32>
    %266 = arith.addf %265, %213 : vector<16x256xf32>
    %cst_96 = arith.constant 5.000000e-01 : f32
    %267 = vector.broadcast %cst_96 : f32 to vector<16x256xf32>
    %268 = arith.mulf %267, %266 : vector<16x256xf32>
    %269 = math.tanh %268 : vector<16x256xf32>
    %cst_97 = arith.constant 5.000000e-01 : f32
    %270 = vector.broadcast %cst_97 : f32 to vector<16x256xf32>
    %271 = arith.mulf %270, %269 : vector<16x256xf32>
    %cst_98 = arith.constant 5.000000e-01 : f32
    %272 = vector.broadcast %cst_98 : f32 to vector<16x256xf32>
    %273 = arith.addf %271, %272 : vector<16x256xf32>
    %c3_99 = arith.constant 3 : index
    %c0_100 = arith.constant 0 : index
    %c0_101 = arith.constant 0 : index
    %274 = vector.load %arg7[%c3_99, %c0_100, %c0_101] : memref<8x16x256xf32, #tpu.memory_space<vmem>>, vector<1x16x256xf32>
    %275 = vector.shape_cast %274 : vector<1x16x256xf32> to vector<16x256xf32>
    %276 = vector.shape_cast %273 : vector<16x256xf32> to vector<1x16x256xf32>
    tpu.vector_store %arg7[%c3_99, %c0_100, %c0_101], %276 {strides = array<i32>} : memref<8x16x256xf32, #tpu.memory_space<vmem>>, vector<1x16x256xf32>,
    %c4 = arith.constant 4 : index
    %c0_102 = arith.constant 0 : index
    %c0_103 = arith.constant 0 : index
    %277 = vector.load %arg1[%c4, %c0_102, %c0_103] : memref<8x16x256xf32, #tpu.memory_space<vmem>>, vector<1x16x256xf32>
    %278 = vector.shape_cast %277 : vector<1x16x256xf32> to vector<16x256xf32>
    %279 = arith.truncf %278 : vector<16x256xf32> to vector<16x256xbf16>
    %cst_104 = arith.constant dense<0.000000e+00> : vector<4x256xf32>
    %280 = tpu.matmul %0, %279, %cst_104 {dimension_numbers = #tpu.dot_dimension_numbers<[1], [0], [0], [1], [0, 0, 1, 1], [], []>} : vector<4x16xbf16>, vector<16x256xbf16>, vector<4x256xf32> -> vector<4x256xf32>
    %281 = vector.broadcast %4 : vector<4x1xf32> to vector<4x256xf32>
    %282 = arith.addf %280, %281 : vector<4x256xf32>
    %cst_105 = arith.constant 5.000000e-01 : f32
    %283 = vector.broadcast %cst_105 : f32 to vector<4x256xf32>
    %284 = arith.mulf %283, %282 : vector<4x256xf32>
    %285 = math.tanh %284 : vector<4x256xf32>
    %cst_106 = arith.constant 5.000000e-01 : f32
    %286 = vector.broadcast %cst_106 : f32 to vector<4x256xf32>
    %287 = arith.mulf %286, %285 : vector<4x256xf32>
    %cst_107 = arith.constant 5.000000e-01 : f32
    %288 = vector.broadcast %cst_107 : f32 to vector<4x256xf32>
    %289 = arith.addf %287, %288 : vector<4x256xf32>
    %290 = tpu.concatenate %289, %16 in 0 : vector<4x256xf32>, vector<4x256xf32> -> vector<8x256xf32>
    %c17_i32_108 = arith.constant 17 : i32
    %291 = tpu.dynamic_rotate %290 by %c17_i32_108 dim 1 : vector<8x256xf32>, i32 -> vector<8x256xf32>
    %292 = vector.broadcast %8 : vector<1x256xf32> to vector<8x256xf32>
    %293 = arith.mulf %291, %292 : vector<8x256xf32>
    %c16_i32_109 = arith.constant 16 : i32
    %294 = tpu.dynamic_rotate %290 by %c16_i32_109 dim 1 : vector<8x256xf32>, i32 -> vector<8x256xf32>
    %295 = vector.broadcast %9 : vector<1x256xf32> to vector<8x256xf32>
    %296 = arith.mulf %294, %295 : vector<8x256xf32>
    %c15_i32_110 = arith.constant 15 : i32
    %297 = tpu.dynamic_rotate %290 by %c15_i32_110 dim 1 : vector<8x256xf32>, i32 -> vector<8x256xf32>
    %298 = vector.broadcast %10 : vector<1x256xf32> to vector<8x256xf32>
    %299 = arith.mulf %297, %298 : vector<8x256xf32>
    %c1_i32_111 = arith.constant 1 : i32
    %300 = tpu.dynamic_rotate %290 by %c1_i32_111 dim 1 : vector<8x256xf32>, i32 -> vector<8x256xf32>
    %301 = vector.broadcast %11 : vector<1x256xf32> to vector<8x256xf32>
    %302 = arith.mulf %300, %301 : vector<8x256xf32>
    %c255_i32_112 = arith.constant 255 : i32
    %303 = tpu.dynamic_rotate %290 by %c255_i32_112 dim 1 : vector<8x256xf32>, i32 -> vector<8x256xf32>
    %304 = vector.broadcast %12 : vector<1x256xf32> to vector<8x256xf32>
    %305 = arith.mulf %303, %304 : vector<8x256xf32>
    %c241_i32_113 = arith.constant 241 : i32
    %306 = tpu.dynamic_rotate %290 by %c241_i32_113 dim 1 : vector<8x256xf32>, i32 -> vector<8x256xf32>
    %307 = vector.broadcast %13 : vector<1x256xf32> to vector<8x256xf32>
    %308 = arith.mulf %306, %307 : vector<8x256xf32>
    %c240_i32_114 = arith.constant 240 : i32
    %309 = tpu.dynamic_rotate %290 by %c240_i32_114 dim 1 : vector<8x256xf32>, i32 -> vector<8x256xf32>
    %310 = vector.broadcast %14 : vector<1x256xf32> to vector<8x256xf32>
    %311 = arith.mulf %309, %310 : vector<8x256xf32>
    %c239_i32_115 = arith.constant 239 : i32
    %312 = tpu.dynamic_rotate %290 by %c239_i32_115 dim 1 : vector<8x256xf32>, i32 -> vector<8x256xf32>
    %313 = vector.broadcast %15 : vector<1x256xf32> to vector<8x256xf32>
    %314 = arith.mulf %312, %313 : vector<8x256xf32>
    %315 = tpu.concatenate %293, %296, %299, %302, %290, %305, %308, %311, %314 in 0 : vector<8x256xf32>, vector<8x256xf32>, vector<8x256xf32>, vector<8x256xf32>, vector<8x256xf32>, vector<8x256xf32>, vector<8x256xf32>, vector<8x256xf32>, vector<8x256xf32> -> vector<72x256xf32>
    %316 = arith.truncf %315 : vector<72x256xf32> to vector<72x256xbf16>
    %cst_116 = arith.constant dense<0.000000e+00> : vector<4x256xf32>
    %317 = tpu.matmul %1, %316, %cst_116 {dimension_numbers = #tpu.dot_dimension_numbers<[1], [0], [0], [1], [0, 0, 1, 1], [], []>} : vector<4x72xbf16>, vector<72x256xbf16>, vector<4x256xf32> -> vector<4x256xf32>
    %318 = vector.broadcast %5 : vector<4x1xf32> to vector<4x256xf32>
    %319 = arith.addf %317, %318 : vector<4x256xf32>
    %cst_117 = arith.constant 5.000000e-01 : f32
    %320 = vector.broadcast %cst_117 : f32 to vector<4x256xf32>
    %321 = arith.mulf %320, %319 : vector<4x256xf32>
    %322 = math.tanh %321 : vector<4x256xf32>
    %cst_118 = arith.constant 5.000000e-01 : f32
    %323 = vector.broadcast %cst_118 : f32 to vector<4x256xf32>
    %324 = arith.mulf %323, %322 : vector<4x256xf32>
    %cst_119 = arith.constant 5.000000e-01 : f32
    %325 = vector.broadcast %cst_119 : f32 to vector<4x256xf32>
    %326 = arith.addf %324, %325 : vector<4x256xf32>
    %327 = arith.truncf %326 : vector<4x256xf32> to vector<4x256xbf16>
    %cst_120 = arith.constant dense<0.000000e+00> : vector<16x256xf32>
    %328 = tpu.matmul %2, %327, %cst_120 {dimension_numbers = #tpu.dot_dimension_numbers<[1], [0], [0], [1], [0, 0, 1, 1], [], []>} : vector<16x4xbf16>, vector<4x256xbf16>, vector<16x256xf32> -> vector<16x256xf32>
    %329 = vector.broadcast %6 : vector<16x1xf32> to vector<16x256xf32>
    %330 = arith.addf %328, %329 : vector<16x256xf32>
    %331 = arith.addf %330, %278 : vector<16x256xf32>
    %cst_121 = arith.constant 5.000000e-01 : f32
    %332 = vector.broadcast %cst_121 : f32 to vector<16x256xf32>
    %333 = arith.mulf %332, %331 : vector<16x256xf32>
    %334 = math.tanh %333 : vector<16x256xf32>
    %cst_122 = arith.constant 5.000000e-01 : f32
    %335 = vector.broadcast %cst_122 : f32 to vector<16x256xf32>
    %336 = arith.mulf %335, %334 : vector<16x256xf32>
    %cst_123 = arith.constant 5.000000e-01 : f32
    %337 = vector.broadcast %cst_123 : f32 to vector<16x256xf32>
    %338 = arith.addf %336, %337 : vector<16x256xf32>
    %c4_124 = arith.constant 4 : index
    %c0_125 = arith.constant 0 : index
    %c0_126 = arith.constant 0 : index
    %339 = vector.load %arg7[%c4_124, %c0_125, %c0_126] : memref<8x16x256xf32, #tpu.memory_space<vmem>>, vector<1x16x256xf32>
    %340 = vector.shape_cast %339 : vector<1x16x256xf32> to vector<16x256xf32>
    %341 = vector.shape_cast %338 : vector<16x256xf32> to vector<1x16x256xf32>
    tpu.vector_store %arg7[%c4_124, %c0_125, %c0_126], %341 {strides = array<i32>} : memref<8x16x256xf32, #tpu.memory_space<vmem>>, vector<1x16x256xf32>,
    %c5 = arith.constant 5 : index
    %c0_127 = arith.constant 0 : index
    %c0_128 = arith.constant 0 : index
    %342 = vector.load %arg1[%c5, %c0_127, %c0_128] : memref<8x16x256xf32, #tpu.memory_space<vmem>>, vector<1x16x256xf32>
    %343 = vector.shape_cast %342 : vector<1x16x256xf32> to vector<16x256xf32>
    %344 = arith.truncf %343 : vector<16x256xf32> to vector<16x256xbf16>
    %cst_129 = arith.constant dense<0.000000e+00> : vector<4x256xf32>
    %345 = tpu.matmul %0, %344, %cst_129 {dimension_numbers = #tpu.dot_dimension_numbers<[1], [0], [0], [1], [0, 0, 1, 1], [], []>} : vector<4x16xbf16>, vector<16x256xbf16>, vector<4x256xf32> -> vector<4x256xf32>
    %346 = vector.broadcast %4 : vector<4x1xf32> to vector<4x256xf32>
    %347 = arith.addf %345, %346 : vector<4x256xf32>
    %cst_130 = arith.constant 5.000000e-01 : f32
    %348 = vector.broadcast %cst_130 : f32 to vector<4x256xf32>
    %349 = arith.mulf %348, %347 : vector<4x256xf32>
    %350 = math.tanh %349 : vector<4x256xf32>
    %cst_131 = arith.constant 5.000000e-01 : f32
    %351 = vector.broadcast %cst_131 : f32 to vector<4x256xf32>
    %352 = arith.mulf %351, %350 : vector<4x256xf32>
    %cst_132 = arith.constant 5.000000e-01 : f32
    %353 = vector.broadcast %cst_132 : f32 to vector<4x256xf32>
    %354 = arith.addf %352, %353 : vector<4x256xf32>
    %355 = tpu.concatenate %354, %16 in 0 : vector<4x256xf32>, vector<4x256xf32> -> vector<8x256xf32>
    %c17_i32_133 = arith.constant 17 : i32
    %356 = tpu.dynamic_rotate %355 by %c17_i32_133 dim 1 : vector<8x256xf32>, i32 -> vector<8x256xf32>
    %357 = vector.broadcast %8 : vector<1x256xf32> to vector<8x256xf32>
    %358 = arith.mulf %356, %357 : vector<8x256xf32>
    %c16_i32_134 = arith.constant 16 : i32
    %359 = tpu.dynamic_rotate %355 by %c16_i32_134 dim 1 : vector<8x256xf32>, i32 -> vector<8x256xf32>
    %360 = vector.broadcast %9 : vector<1x256xf32> to vector<8x256xf32>
    %361 = arith.mulf %359, %360 : vector<8x256xf32>
    %c15_i32_135 = arith.constant 15 : i32
    %362 = tpu.dynamic_rotate %355 by %c15_i32_135 dim 1 : vector<8x256xf32>, i32 -> vector<8x256xf32>
    %363 = vector.broadcast %10 : vector<1x256xf32> to vector<8x256xf32>
    %364 = arith.mulf %362, %363 : vector<8x256xf32>
    %c1_i32_136 = arith.constant 1 : i32
    %365 = tpu.dynamic_rotate %355 by %c1_i32_136 dim 1 : vector<8x256xf32>, i32 -> vector<8x256xf32>
    %366 = vector.broadcast %11 : vector<1x256xf32> to vector<8x256xf32>
    %367 = arith.mulf %365, %366 : vector<8x256xf32>
    %c255_i32_137 = arith.constant 255 : i32
    %368 = tpu.dynamic_rotate %355 by %c255_i32_137 dim 1 : vector<8x256xf32>, i32 -> vector<8x256xf32>
    %369 = vector.broadcast %12 : vector<1x256xf32> to vector<8x256xf32>
    %370 = arith.mulf %368, %369 : vector<8x256xf32>
    %c241_i32_138 = arith.constant 241 : i32
    %371 = tpu.dynamic_rotate %355 by %c241_i32_138 dim 1 : vector<8x256xf32>, i32 -> vector<8x256xf32>
    %372 = vector.broadcast %13 : vector<1x256xf32> to vector<8x256xf32>
    %373 = arith.mulf %371, %372 : vector<8x256xf32>
    %c240_i32_139 = arith.constant 240 : i32
    %374 = tpu.dynamic_rotate %355 by %c240_i32_139 dim 1 : vector<8x256xf32>, i32 -> vector<8x256xf32>
    %375 = vector.broadcast %14 : vector<1x256xf32> to vector<8x256xf32>
    %376 = arith.mulf %374, %375 : vector<8x256xf32>
    %c239_i32_140 = arith.constant 239 : i32
    %377 = tpu.dynamic_rotate %355 by %c239_i32_140 dim 1 : vector<8x256xf32>, i32 -> vector<8x256xf32>
    %378 = vector.broadcast %15 : vector<1x256xf32> to vector<8x256xf32>
    %379 = arith.mulf %377, %378 : vector<8x256xf32>
    %380 = tpu.concatenate %358, %361, %364, %367, %355, %370, %373, %376, %379 in 0 : vector<8x256xf32>, vector<8x256xf32>, vector<8x256xf32>, vector<8x256xf32>, vector<8x256xf32>, vector<8x256xf32>, vector<8x256xf32>, vector<8x256xf32>, vector<8x256xf32> -> vector<72x256xf32>
    %381 = arith.truncf %380 : vector<72x256xf32> to vector<72x256xbf16>
    %cst_141 = arith.constant dense<0.000000e+00> : vector<4x256xf32>
    %382 = tpu.matmul %1, %381, %cst_141 {dimension_numbers = #tpu.dot_dimension_numbers<[1], [0], [0], [1], [0, 0, 1, 1], [], []>} : vector<4x72xbf16>, vector<72x256xbf16>, vector<4x256xf32> -> vector<4x256xf32>
    %383 = vector.broadcast %5 : vector<4x1xf32> to vector<4x256xf32>
    %384 = arith.addf %382, %383 : vector<4x256xf32>
    %cst_142 = arith.constant 5.000000e-01 : f32
    %385 = vector.broadcast %cst_142 : f32 to vector<4x256xf32>
    %386 = arith.mulf %385, %384 : vector<4x256xf32>
    %387 = math.tanh %386 : vector<4x256xf32>
    %cst_143 = arith.constant 5.000000e-01 : f32
    %388 = vector.broadcast %cst_143 : f32 to vector<4x256xf32>
    %389 = arith.mulf %388, %387 : vector<4x256xf32>
    %cst_144 = arith.constant 5.000000e-01 : f32
    %390 = vector.broadcast %cst_144 : f32 to vector<4x256xf32>
    %391 = arith.addf %389, %390 : vector<4x256xf32>
    %392 = arith.truncf %391 : vector<4x256xf32> to vector<4x256xbf16>
    %cst_145 = arith.constant dense<0.000000e+00> : vector<16x256xf32>
    %393 = tpu.matmul %2, %392, %cst_145 {dimension_numbers = #tpu.dot_dimension_numbers<[1], [0], [0], [1], [0, 0, 1, 1], [], []>} : vector<16x4xbf16>, vector<4x256xbf16>, vector<16x256xf32> -> vector<16x256xf32>
    %394 = vector.broadcast %6 : vector<16x1xf32> to vector<16x256xf32>
    %395 = arith.addf %393, %394 : vector<16x256xf32>
    %396 = arith.addf %395, %343 : vector<16x256xf32>
    %cst_146 = arith.constant 5.000000e-01 : f32
    %397 = vector.broadcast %cst_146 : f32 to vector<16x256xf32>
    %398 = arith.mulf %397, %396 : vector<16x256xf32>
    %399 = math.tanh %398 : vector<16x256xf32>
    %cst_147 = arith.constant 5.000000e-01 : f32
    %400 = vector.broadcast %cst_147 : f32 to vector<16x256xf32>
    %401 = arith.mulf %400, %399 : vector<16x256xf32>
    %cst_148 = arith.constant 5.000000e-01 : f32
    %402 = vector.broadcast %cst_148 : f32 to vector<16x256xf32>
    %403 = arith.addf %401, %402 : vector<16x256xf32>
    %c5_149 = arith.constant 5 : index
    %c0_150 = arith.constant 0 : index
    %c0_151 = arith.constant 0 : index
    %404 = vector.load %arg7[%c5_149, %c0_150, %c0_151] : memref<8x16x256xf32, #tpu.memory_space<vmem>>, vector<1x16x256xf32>
    %405 = vector.shape_cast %404 : vector<1x16x256xf32> to vector<16x256xf32>
    %406 = vector.shape_cast %403 : vector<16x256xf32> to vector<1x16x256xf32>
    tpu.vector_store %arg7[%c5_149, %c0_150, %c0_151], %406 {strides = array<i32>} : memref<8x16x256xf32, #tpu.memory_space<vmem>>, vector<1x16x256xf32>,
    %c6 = arith.constant 6 : index
    %c0_152 = arith.constant 0 : index
    %c0_153 = arith.constant 0 : index
    %407 = vector.load %arg1[%c6, %c0_152, %c0_153] : memref<8x16x256xf32, #tpu.memory_space<vmem>>, vector<1x16x256xf32>
    %408 = vector.shape_cast %407 : vector<1x16x256xf32> to vector<16x256xf32>
    %409 = arith.truncf %408 : vector<16x256xf32> to vector<16x256xbf16>
    %cst_154 = arith.constant dense<0.000000e+00> : vector<4x256xf32>
    %410 = tpu.matmul %0, %409, %cst_154 {dimension_numbers = #tpu.dot_dimension_numbers<[1], [0], [0], [1], [0, 0, 1, 1], [], []>} : vector<4x16xbf16>, vector<16x256xbf16>, vector<4x256xf32> -> vector<4x256xf32>
    %411 = vector.broadcast %4 : vector<4x1xf32> to vector<4x256xf32>
    %412 = arith.addf %410, %411 : vector<4x256xf32>
    %cst_155 = arith.constant 5.000000e-01 : f32
    %413 = vector.broadcast %cst_155 : f32 to vector<4x256xf32>
    %414 = arith.mulf %413, %412 : vector<4x256xf32>
    %415 = math.tanh %414 : vector<4x256xf32>
    %cst_156 = arith.constant 5.000000e-01 : f32
    %416 = vector.broadcast %cst_156 : f32 to vector<4x256xf32>
    %417 = arith.mulf %416, %415 : vector<4x256xf32>
    %cst_157 = arith.constant 5.000000e-01 : f32
    %418 = vector.broadcast %cst_157 : f32 to vector<4x256xf32>
    %419 = arith.addf %417, %418 : vector<4x256xf32>
    %420 = tpu.concatenate %419, %16 in 0 : vector<4x256xf32>, vector<4x256xf32> -> vector<8x256xf32>
    %c17_i32_158 = arith.constant 17 : i32
    %421 = tpu.dynamic_rotate %420 by %c17_i32_158 dim 1 : vector<8x256xf32>, i32 -> vector<8x256xf32>
    %422 = vector.broadcast %8 : vector<1x256xf32> to vector<8x256xf32>
    %423 = arith.mulf %421, %422 : vector<8x256xf32>
    %c16_i32_159 = arith.constant 16 : i32
    %424 = tpu.dynamic_rotate %420 by %c16_i32_159 dim 1 : vector<8x256xf32>, i32 -> vector<8x256xf32>
    %425 = vector.broadcast %9 : vector<1x256xf32> to vector<8x256xf32>
    %426 = arith.mulf %424, %425 : vector<8x256xf32>
    %c15_i32_160 = arith.constant 15 : i32
    %427 = tpu.dynamic_rotate %420 by %c15_i32_160 dim 1 : vector<8x256xf32>, i32 -> vector<8x256xf32>
    %428 = vector.broadcast %10 : vector<1x256xf32> to vector<8x256xf32>
    %429 = arith.mulf %427, %428 : vector<8x256xf32>
    %c1_i32_161 = arith.constant 1 : i32
    %430 = tpu.dynamic_rotate %420 by %c1_i32_161 dim 1 : vector<8x256xf32>, i32 -> vector<8x256xf32>
    %431 = vector.broadcast %11 : vector<1x256xf32> to vector<8x256xf32>
    %432 = arith.mulf %430, %431 : vector<8x256xf32>
    %c255_i32_162 = arith.constant 255 : i32
    %433 = tpu.dynamic_rotate %420 by %c255_i32_162 dim 1 : vector<8x256xf32>, i32 -> vector<8x256xf32>
    %434 = vector.broadcast %12 : vector<1x256xf32> to vector<8x256xf32>
    %435 = arith.mulf %433, %434 : vector<8x256xf32>
    %c241_i32_163 = arith.constant 241 : i32
    %436 = tpu.dynamic_rotate %420 by %c241_i32_163 dim 1 : vector<8x256xf32>, i32 -> vector<8x256xf32>
    %437 = vector.broadcast %13 : vector<1x256xf32> to vector<8x256xf32>
    %438 = arith.mulf %436, %437 : vector<8x256xf32>
    %c240_i32_164 = arith.constant 240 : i32
    %439 = tpu.dynamic_rotate %420 by %c240_i32_164 dim 1 : vector<8x256xf32>, i32 -> vector<8x256xf32>
    %440 = vector.broadcast %14 : vector<1x256xf32> to vector<8x256xf32>
    %441 = arith.mulf %439, %440 : vector<8x256xf32>
    %c239_i32_165 = arith.constant 239 : i32
    %442 = tpu.dynamic_rotate %420 by %c239_i32_165 dim 1 : vector<8x256xf32>, i32 -> vector<8x256xf32>
    %443 = vector.broadcast %15 : vector<1x256xf32> to vector<8x256xf32>
    %444 = arith.mulf %442, %443 : vector<8x256xf32>
    %445 = tpu.concatenate %423, %426, %429, %432, %420, %435, %438, %441, %444 in 0 : vector<8x256xf32>, vector<8x256xf32>, vector<8x256xf32>, vector<8x256xf32>, vector<8x256xf32>, vector<8x256xf32>, vector<8x256xf32>, vector<8x256xf32>, vector<8x256xf32> -> vector<72x256xf32>
    %446 = arith.truncf %445 : vector<72x256xf32> to vector<72x256xbf16>
    %cst_166 = arith.constant dense<0.000000e+00> : vector<4x256xf32>
    %447 = tpu.matmul %1, %446, %cst_166 {dimension_numbers = #tpu.dot_dimension_numbers<[1], [0], [0], [1], [0, 0, 1, 1], [], []>} : vector<4x72xbf16>, vector<72x256xbf16>, vector<4x256xf32> -> vector<4x256xf32>
    %448 = vector.broadcast %5 : vector<4x1xf32> to vector<4x256xf32>
    %449 = arith.addf %447, %448 : vector<4x256xf32>
    %cst_167 = arith.constant 5.000000e-01 : f32
    %450 = vector.broadcast %cst_167 : f32 to vector<4x256xf32>
    %451 = arith.mulf %450, %449 : vector<4x256xf32>
    %452 = math.tanh %451 : vector<4x256xf32>
    %cst_168 = arith.constant 5.000000e-01 : f32
    %453 = vector.broadcast %cst_168 : f32 to vector<4x256xf32>
    %454 = arith.mulf %453, %452 : vector<4x256xf32>
    %cst_169 = arith.constant 5.000000e-01 : f32
    %455 = vector.broadcast %cst_169 : f32 to vector<4x256xf32>
    %456 = arith.addf %454, %455 : vector<4x256xf32>
    %457 = arith.truncf %456 : vector<4x256xf32> to vector<4x256xbf16>
    %cst_170 = arith.constant dense<0.000000e+00> : vector<16x256xf32>
    %458 = tpu.matmul %2, %457, %cst_170 {dimension_numbers = #tpu.dot_dimension_numbers<[1], [0], [0], [1], [0, 0, 1, 1], [], []>} : vector<16x4xbf16>, vector<4x256xbf16>, vector<16x256xf32> -> vector<16x256xf32>
    %459 = vector.broadcast %6 : vector<16x1xf32> to vector<16x256xf32>
    %460 = arith.addf %458, %459 : vector<16x256xf32>
    %461 = arith.addf %460, %408 : vector<16x256xf32>
    %cst_171 = arith.constant 5.000000e-01 : f32
    %462 = vector.broadcast %cst_171 : f32 to vector<16x256xf32>
    %463 = arith.mulf %462, %461 : vector<16x256xf32>
    %464 = math.tanh %463 : vector<16x256xf32>
    %cst_172 = arith.constant 5.000000e-01 : f32
    %465 = vector.broadcast %cst_172 : f32 to vector<16x256xf32>
    %466 = arith.mulf %465, %464 : vector<16x256xf32>
    %cst_173 = arith.constant 5.000000e-01 : f32
    %467 = vector.broadcast %cst_173 : f32 to vector<16x256xf32>
    %468 = arith.addf %466, %467 : vector<16x256xf32>
    %c6_174 = arith.constant 6 : index
    %c0_175 = arith.constant 0 : index
    %c0_176 = arith.constant 0 : index
    %469 = vector.load %arg7[%c6_174, %c0_175, %c0_176] : memref<8x16x256xf32, #tpu.memory_space<vmem>>, vector<1x16x256xf32>
    %470 = vector.shape_cast %469 : vector<1x16x256xf32> to vector<16x256xf32>
    %471 = vector.shape_cast %468 : vector<16x256xf32> to vector<1x16x256xf32>
    tpu.vector_store %arg7[%c6_174, %c0_175, %c0_176], %471 {strides = array<i32>} : memref<8x16x256xf32, #tpu.memory_space<vmem>>, vector<1x16x256xf32>,
    %c7 = arith.constant 7 : index
    %c0_177 = arith.constant 0 : index
    %c0_178 = arith.constant 0 : index
    %472 = vector.load %arg1[%c7, %c0_177, %c0_178] : memref<8x16x256xf32, #tpu.memory_space<vmem>>, vector<1x16x256xf32>
    %473 = vector.shape_cast %472 : vector<1x16x256xf32> to vector<16x256xf32>
    %474 = arith.truncf %473 : vector<16x256xf32> to vector<16x256xbf16>
    %cst_179 = arith.constant dense<0.000000e+00> : vector<4x256xf32>
    %475 = tpu.matmul %0, %474, %cst_179 {dimension_numbers = #tpu.dot_dimension_numbers<[1], [0], [0], [1], [0, 0, 1, 1], [], []>} : vector<4x16xbf16>, vector<16x256xbf16>, vector<4x256xf32> -> vector<4x256xf32>
    %476 = vector.broadcast %4 : vector<4x1xf32> to vector<4x256xf32>
    %477 = arith.addf %475, %476 : vector<4x256xf32>
    %cst_180 = arith.constant 5.000000e-01 : f32
    %478 = vector.broadcast %cst_180 : f32 to vector<4x256xf32>
    %479 = arith.mulf %478, %477 : vector<4x256xf32>
    %480 = math.tanh %479 : vector<4x256xf32>
    %cst_181 = arith.constant 5.000000e-01 : f32
    %481 = vector.broadcast %cst_181 : f32 to vector<4x256xf32>
    %482 = arith.mulf %481, %480 : vector<4x256xf32>
    %cst_182 = arith.constant 5.000000e-01 : f32
    %483 = vector.broadcast %cst_182 : f32 to vector<4x256xf32>
    %484 = arith.addf %482, %483 : vector<4x256xf32>
    %485 = tpu.concatenate %484, %16 in 0 : vector<4x256xf32>, vector<4x256xf32> -> vector<8x256xf32>
    %c17_i32_183 = arith.constant 17 : i32
    %486 = tpu.dynamic_rotate %485 by %c17_i32_183 dim 1 : vector<8x256xf32>, i32 -> vector<8x256xf32>
    %487 = vector.broadcast %8 : vector<1x256xf32> to vector<8x256xf32>
    %488 = arith.mulf %486, %487 : vector<8x256xf32>
    %c16_i32_184 = arith.constant 16 : i32
    %489 = tpu.dynamic_rotate %485 by %c16_i32_184 dim 1 : vector<8x256xf32>, i32 -> vector<8x256xf32>
    %490 = vector.broadcast %9 : vector<1x256xf32> to vector<8x256xf32>
    %491 = arith.mulf %489, %490 : vector<8x256xf32>
    %c15_i32_185 = arith.constant 15 : i32
    %492 = tpu.dynamic_rotate %485 by %c15_i32_185 dim 1 : vector<8x256xf32>, i32 -> vector<8x256xf32>
    %493 = vector.broadcast %10 : vector<1x256xf32> to vector<8x256xf32>
    %494 = arith.mulf %492, %493 : vector<8x256xf32>
    %c1_i32_186 = arith.constant 1 : i32
    %495 = tpu.dynamic_rotate %485 by %c1_i32_186 dim 1 : vector<8x256xf32>, i32 -> vector<8x256xf32>
    %496 = vector.broadcast %11 : vector<1x256xf32> to vector<8x256xf32>
    %497 = arith.mulf %495, %496 : vector<8x256xf32>
    %c255_i32_187 = arith.constant 255 : i32
    %498 = tpu.dynamic_rotate %485 by %c255_i32_187 dim 1 : vector<8x256xf32>, i32 -> vector<8x256xf32>
    %499 = vector.broadcast %12 : vector<1x256xf32> to vector<8x256xf32>
    %500 = arith.mulf %498, %499 : vector<8x256xf32>
    %c241_i32_188 = arith.constant 241 : i32
    %501 = tpu.dynamic_rotate %485 by %c241_i32_188 dim 1 : vector<8x256xf32>, i32 -> vector<8x256xf32>
    %502 = vector.broadcast %13 : vector<1x256xf32> to vector<8x256xf32>
    %503 = arith.mulf %501, %502 : vector<8x256xf32>
    %c240_i32_189 = arith.constant 240 : i32
    %504 = tpu.dynamic_rotate %485 by %c240_i32_189 dim 1 : vector<8x256xf32>, i32 -> vector<8x256xf32>
    %505 = vector.broadcast %14 : vector<1x256xf32> to vector<8x256xf32>
    %506 = arith.mulf %504, %505 : vector<8x256xf32>
    %c239_i32_190 = arith.constant 239 : i32
    %507 = tpu.dynamic_rotate %485 by %c239_i32_190 dim 1 : vector<8x256xf32>, i32 -> vector<8x256xf32>
    %508 = vector.broadcast %15 : vector<1x256xf32> to vector<8x256xf32>
    %509 = arith.mulf %507, %508 : vector<8x256xf32>
    %510 = tpu.concatenate %488, %491, %494, %497, %485, %500, %503, %506, %509 in 0 : vector<8x256xf32>, vector<8x256xf32>, vector<8x256xf32>, vector<8x256xf32>, vector<8x256xf32>, vector<8x256xf32>, vector<8x256xf32>, vector<8x256xf32>, vector<8x256xf32> -> vector<72x256xf32>
    %511 = arith.truncf %510 : vector<72x256xf32> to vector<72x256xbf16>
    %cst_191 = arith.constant dense<0.000000e+00> : vector<4x256xf32>
    %512 = tpu.matmul %1, %511, %cst_191 {dimension_numbers = #tpu.dot_dimension_numbers<[1], [0], [0], [1], [0, 0, 1, 1], [], []>} : vector<4x72xbf16>, vector<72x256xbf16>, vector<4x256xf32> -> vector<4x256xf32>
    %513 = vector.broadcast %5 : vector<4x1xf32> to vector<4x256xf32>
    %514 = arith.addf %512, %513 : vector<4x256xf32>
    %cst_192 = arith.constant 5.000000e-01 : f32
    %515 = vector.broadcast %cst_192 : f32 to vector<4x256xf32>
    %516 = arith.mulf %515, %514 : vector<4x256xf32>
    %517 = math.tanh %516 : vector<4x256xf32>
    %cst_193 = arith.constant 5.000000e-01 : f32
    %518 = vector.broadcast %cst_193 : f32 to vector<4x256xf32>
    %519 = arith.mulf %518, %517 : vector<4x256xf32>
    %cst_194 = arith.constant 5.000000e-01 : f32
    %520 = vector.broadcast %cst_194 : f32 to vector<4x256xf32>
    %521 = arith.addf %519, %520 : vector<4x256xf32>
    %522 = arith.truncf %521 : vector<4x256xf32> to vector<4x256xbf16>
    %cst_195 = arith.constant dense<0.000000e+00> : vector<16x256xf32>
    %523 = tpu.matmul %2, %522, %cst_195 {dimension_numbers = #tpu.dot_dimension_numbers<[1], [0], [0], [1], [0, 0, 1, 1], [], []>} : vector<16x4xbf16>, vector<4x256xbf16>, vector<16x256xf32> -> vector<16x256xf32>
    %524 = vector.broadcast %6 : vector<16x1xf32> to vector<16x256xf32>
    %525 = arith.addf %523, %524 : vector<16x256xf32>
    %526 = arith.addf %525, %473 : vector<16x256xf32>
    %cst_196 = arith.constant 5.000000e-01 : f32
    %527 = vector.broadcast %cst_196 : f32 to vector<16x256xf32>
    %528 = arith.mulf %527, %526 : vector<16x256xf32>
    %529 = math.tanh %528 : vector<16x256xf32>
    %cst_197 = arith.constant 5.000000e-01 : f32
    %530 = vector.broadcast %cst_197 : f32 to vector<16x256xf32>
    %531 = arith.mulf %530, %529 : vector<16x256xf32>
    %cst_198 = arith.constant 5.000000e-01 : f32
    %532 = vector.broadcast %cst_198 : f32 to vector<16x256xf32>
    %533 = arith.addf %531, %532 : vector<16x256xf32>
    %c7_199 = arith.constant 7 : index
    %c0_200 = arith.constant 0 : index
    %c0_201 = arith.constant 0 : index
    %534 = vector.load %arg7[%c7_199, %c0_200, %c0_201] : memref<8x16x256xf32, #tpu.memory_space<vmem>>, vector<1x16x256xf32>
    %535 = vector.shape_cast %534 : vector<1x16x256xf32> to vector<16x256xf32>
    %536 = vector.shape_cast %533 : vector<16x256xf32> to vector<1x16x256xf32>
    tpu.vector_store %arg7[%c7_199, %c0_200, %c0_201], %536 {strides = array<i32>} : memref<8x16x256xf32, #tpu.memory_space<vmem>>, vector<1x16x256xf32>,
    return
  }
  func.func @transform_0(%arg0: i32) -> (i32, i32, i32) {
    %c0_i32 = arith.constant 0 : i32
    %c0_i32_0 = arith.constant 0 : i32
    %c0_i32_1 = arith.constant 0 : i32
    return %arg0, %c0_i32, %c0_i32_0 : i32, i32, i32
  }
  func.func @transform_1(%arg0: i32) -> (i32, i32) {
    %c0_i32 = arith.constant 0 : i32
    %c0_i32_0 = arith.constant 0 : i32
    %c0_i32_1 = arith.constant 0 : i32
    return %c0_i32, %c0_i32_0 : i32, i32
  }
  func.func @transform_2(%arg0: i32) -> (i32, i32) {
    %c0_i32 = arith.constant 0 : i32
    %c0_i32_0 = arith.constant 0 : i32
    %c0_i32_1 = arith.constant 0 : i32
    return %c0_i32, %c0_i32_0 : i32, i32
  }
  func.func @transform_3(%arg0: i32) -> (i32, i32) {
    %c0_i32 = arith.constant 0 : i32
    %c0_i32_0 = arith.constant 0 : i32
    %c0_i32_1 = arith.constant 0 : i32
    return %c0_i32, %c0_i32_0 : i32, i32
  }
  func.func @transform_4(%arg0: i32) -> (i32, i32) {
    %c0_i32 = arith.constant 0 : i32
    %c0_i32_0 = arith.constant 0 : i32
    %c0_i32_1 = arith.constant 0 : i32
    return %c0_i32, %c0_i32_0 : i32, i32
  }
  func.func @transform_5(%arg0: i32) -> (i32, i32) {
    %c0_i32 = arith.constant 0 : i32
    %c0_i32_0 = arith.constant 0 : i32
    %c0_i32_1 = arith.constant 0 : i32
    return %c0_i32, %c0_i32_0 : i32, i32
  }
  func.func @transform_6(%arg0: i32) -> (i32, i32, i32) {
    %c0_i32 = arith.constant 0 : i32
    %c0_i32_0 = arith.constant 0 : i32
    %c0_i32_1 = arith.constant 0 : i32
    return %arg0, %c0_i32, %c0_i32_0 : i32, i32, i32
  }
}

</mosaic_0001>

<bundles_post_ra>
// kernel: tpu_custom_call.1
= control target key start
LH: loop header
LB: loop body
LE: loop exit
PB: predicated region body
PF: predicated region fallthrough
CT: control target
= control target key end

     0   :  { %s4050_s0 = inlined_call_operand.hbm [shape: f32[16,16,256], index: 0, kind: input, shape index: {}]   ;;  %s4051_s1 = inlined_call_operand.vmem [shape: bf16[4,16], index: 1, kind: input, shape index: {}]   ;;  %s4052_s2 = inlined_call_operand.hbm [shape: bf16[4,72], index: 2, kind: input, shape index: {}]   ;;  %s4053_s3 = inlined_call_operand.vmem [shape: bf16[16,4], index: 3, kind: input, shape index: {}]   ;;  %s4054_s4 = inlined_call_operand.vmem [shape: f32[24,1], index: 4, kind: input, shape index: {}]   ;;  %s4055_s5 = inlined_call_operand.vmem [shape: f32[9,256], index: 5, kind: input, shape index: {}]   ;;  %s4056_s6 = inlined_call_operand.hbm [shape: f32[16,16,256], index: 6, kind: output, shape index: {}]  }
   0x1   :  { %4066 = sst [smem:[#allocation23_spill]] %s4052_s2 }
   0x2   :  { %11 = vsyncpa [#allocation3], 0 }
   0x3   :  { %13 = vsyncpa [#allocation3 + $0x1], 0 }
   0x4   :  { %14 = vsyncpa [#allocation6], 0 }
   0x5   :  { %15 = vsyncpa [#allocation4], 0 }
   0x6   :  { %17 = vsyncpa [#allocation4 + $0x1], 0  ;;  %s2796_s21 = smov 0   ;;  %s2798_s22 = smov 0  }
   0x7   :  { %s2800_s23 = smov 0   ;;  %s2802_s24 = smov 0  }
   0x8 LB: > { %4067 = sst [smem:[#allocation11_spill]] %s2741_s23  ;;  %s2817_s25 = sadd.s32 4294967295, %s2745_s24   ;;  %s2745_s24 = sphi %s2802_s24, %s4103_s24   ;;  %s2741_s23 = sphi %s2800_s23, %s4100_s23   ;;  %s2737_s22 = sphi %s2798_s22, %s4102_s22   ;;  %s2733_s21 = sphi %s2796_s21, %s4101_s21  }
   0x9   : > { %s2206_s26 = sadd.s32 4294967294, %s2745_s24   ;;  %s2821_s27 = sadd.s32 1, %s2745_s24  }
   0xa   : > { %s30_s28 = sadd.s32 1, %s2741_s23  ;;  %s27_s29 = ssub.s32 %s2745_s24, %s2821_s27 }
   0xb   : > { %p37_p0 = scmp.ne.s32.totalorder %s2741_s23, %s2737_s22  ;;  %p28_p1 = scmp.eq.s32.totalorder %s27_s29, 0 }
   0xc   : > { %p38_p2 = scmp.eq.s32.totalorder %s2745_s24, 0  ;;  %p43_p3 = scmp.ne.s32.totalorder %s2737_s22, %s2733_s21 }
   0xd   : > { %p44_p4 = scmp.eq.s32.totalorder %s2817_s25, 0  ;;  %p172_p7 = scmp.eq.s32.totalorder %s2817_s25, 1 }
   0xe   : > { %s2833_s30 = scalar_select %p28_p1, %s2741_s23, %s30_s28  }
   0xf   : > { %p2835_p5 = por %p38_p2, %p37_p0  ;;  %p2841_p6 = por %p44_p4, %p43_p3 }
  0x10   : > { %4068 = sst [smem:[#allocation12_spill]] %s2833_s30  ;;  %p178_p8 = scmp.eq.s32.totalorder %s2206_s26, 1 }
  0x11   : > { %p2207_p9 = scmp.ge.s32.totalorder %s2745_s24, 1  ;;  %p185_p10 = scmp.lt.s32.totalorder %s2745_s24, 3 }
  0x12   : > { %p2848_p11 = por %p172_p7, %p37_p0  ;;  %p2852_p12 = por %p178_p8, %p43_p3 }
  0x13   : > { %p2856_p13 = pnand %p2207_p9, %p185_p10  ;;  %s4074_s2 = sld [smem:[#allocation23_spill]] }
  0x14   : > { %s2747_s15 = smov [#allocation5]   ;;  %p2406_p3 = scmp.lt.s32.totalorder %s2745_s24, 2 }
  0x15   : > { %p2393_p1 = pneg %p2856_p13  ;;  %s202_s16 = sshll.u32 %s2747_s15, 4  ;;  %s203_s16 = int_to_ptr.vmem [resolvable:$true] %s202_s16 }
  0x16   : > { %s222_s17 = sand.u32 1, %s2741_s23   ;;  %p2872_p7 = pnand %p2406_p3, %p2835_p5 }
  0x17   : > { %p2394_p2 = pnand %p2393_p1, %p44_p4  ;;  %s2210_s19 = sshll.u32 %s222_s17, 8 }
  0x18   : > { %s2381_s20 = sshll.u32 %s2745_s24, 8  ;;  %s226_s13 = scalar_lea.vmem [#allocation2], %s2210_s19 }
  0x19   : > { %s200_s14 = sshll.u32 %s4074_s2, 4  ;;  %s232_s29 = scalar_lea.hbm %s4050_s0, %s2381_s20  ;;  %s201_s14 = int_to_ptr.hbm [resolvable:$true] %s200_s14 }
  0x1a   : > { %2396 = dma.hbm_to_vmem [thread:$0]  (!%p2394_p2), %s201_s14, 32, %s203_s16, [#allocation6]  }
  0x1b   : > { %s233_s12 = sshll.u32 %s232_s29, 4  ;;  %s235_s15 = sshll.u32 %s226_s13, 4  ;;  %s234_s12 = int_to_ptr.hbm [resolvable:$true] %s233_s12  ;;  %s236_s15 = int_to_ptr.vmem [resolvable:$true] %s235_s15 }
  0x1c   : > { %s223_s2 = scalar_lea.sflag [#allocation3], %s222_s17  ;;  %s2645_s30 = sshra.s32 %s234_s12, 4  ;;  %s2646_s30 = int_to_ptr.hbm [resolvable:$true] %s2645_s30 }
  0x1d   : > { %s2647_s7 = scalar_lea.hbm %s2646_s30, 256  ;;  %p2649_p8 = pneg %p2872_p7 }
  0x1e   : > { %p2648_p5 = scmp.ne.s32.totalorder %s2646_s30, %s2647_s7  ;;  %s2652_s23 = scalar_lea.hbm %s4050_s0, 512 }
  0x1f   : > { %p2653_p1 = scmp.lt.s32.totalorder %s2646_s30, %s4050_s0  ;;  %p2654_p2 = scmp.lt.s32.totalorder %s2652_s23, %s2647_s7 }
  0x20   : > { %p2650_p9 = pnand %p2649_p8, %p2648_p5 }
  0x21   : > { %p2655_p3 = por %p2654_p2, %p2653_p1 }
  0x22   : > { %p2651_p10 = pneg %p2650_p9 }
  0x24   : > { %p2656_p0 = pnand %p2655_p3, %p2651_p10 }
  0x26   : > { %2659 = shalt.err (!%p2656_p0)
}
  0x27   : > { %s2748_s17 = smov 256   ;;  %s2749_s19 = smov 16  }
  0x28   : > { %2400 = dma.hbm_to_vmem [thread:$0]  (!%p2872_p7), %s234_s12, 4096, %s236_s15, %s223_s2, %s2748_s17, %s2748_s17, %s2749_s19  }
  0x29   : > { %247 = sbr.rel (%p2856_p13) target bundleno = 3071 (0xbff), region = 44 }
  0x2e   : > { %s2893_s28 = sand.u32 1, %s2737_s22  }
  0x2f   : > { %s2215_s30 = sshll.u32 %s2893_s28, 8  ;;  %s250_s23 = scalar_lea.sflag [#allocation3], %s2893_s28 }
  0x30   : > { %s2899_s29 = scalar_lea.vmem [#allocation2], %s2215_s30 }
  0x31   : > { %2720 = dma.done.wait (%p2841_p6), %s250_s23, 4096  }
  0x32   : > { %2722 = vsyncadd (%p2841_p6), %s250_s23, 4294963200 }
  0x33   : > { %2724 = dma.done.wait (%p44_p4), [#allocation6], 32  }
  0x34   : > { %2726 = vsyncadd (%p44_p4), [#allocation6], 4294967264  ;;  %v2750_v0 = vmov 0   ;;  %v302_v1 = vld [vmem:[%s2899_s29] sm:$0xff]  ;;  %v304_v2 = vld [vmem:[%s2899_s29 + $0x10] sm:$0xff]  ;;  %vm313_vm0 = vcmask 130048   ;;  %v358_v27 = vlaneseq }
  0x35   : > { %2455 = vset.pattern.permute.xlu0 %v2750_v0  ;;  %2456 = vset.pattern.permute.xlu1 %v2750_v0  ;;  %v303_v3 = vld [vmem:[%s2899_s29 + $0x8] sm:$0xff]  ;;  %v306_v4 = vpack.c.bf16 %v304_v2, %v302_v1  ;;  %v305_v5 = vld [vmem:[%s2899_s29 + $0x18] sm:$0xff]  ;;  %v295_v6 = vld [vmem:[%s4054_s4] sm:$0xff]  ;;  %vm351_vm1 = vcmask 1043456   ;;  %s2751_s12 = smov 112   ;;  %s2752_s13 = smov 113  }
  0x36   : > { %v307_v7 = vpack.c.bf16 %v305_v5, %v303_v3  ;;  %310 = vperm.xlu0 %2455, %v295_v6   ;;  %v2919_v8 = vld [vmem:[%s4051_s1] sm:$0x3]  ;;  %s2753_s15 = smov 111   ;;  %s2754_s7 = smov 127   ;;  %v2953_v30 = vand.u32 127, %v358_v27  ;;  %v2980_v41 = vld [vmem:[%s4055_s5 + $0x8] sm:$0xff] }
  0x37   : > { %324 = vmatpush.bf16.msra.mxu2 %v306_v4  ;;  %s2755_s14 = smov 15   ;;  %s2756_s16 = smov 1   ;;  %v2959_v32 = vld [vmem:[%s4055_s5 + $0x10] ss:$0 sm:$0xff]  ;;  %v2964_v33 = vld [vmem:[%s4055_s5 + $0x18] ss:$0 sm:$0xff] }
  0x38   : > { %337 = vmatpush.bf16.msra.mxu1 %v307_v7  ;;  %s2757_s26 = smov 17   ;;  %s2758_s20 = smov 16   ;;  %vm437_vm2 = vcmp.lt.s32.totalorder %v2953_v30, 111  ;;  %v2975_v40 = vld [vmem:[%s4055_s5] sm:$0xff]  ;;  %vm426_vm3 = vcmp.lt.s32.totalorder %v2953_v30, 112  ;;  %v2989_v48 = vperm.slane %v2980_v41, 7 }
  0x39   : > { %v2984_v44 = vperm.slane %v2975_v40, 7  ;;  %vm415_vm4 = vcmp.lt.s32.totalorder %v2953_v30, 113  ;;  %v2993_v49 = vperm.slane %v2975_v40, 6  ;;  %v2996_v50 = vperm.slane %v2980_v41, 6 }
  0x3a   : > { %2218 = vmatmul.msk.bf16.vlgmr.msra.gmra.mxu2 %vm313_vm0, %v2919_v8  ;;  %vm404_vm5 = vcmp.lt.s32.totalorder %v2953_v30, 127  ;;  %v3012_v63 = vperm.slane %v2975_v40, 5  ;;  %v3015_v0 = vperm.slane %v2980_v41, 5  ;;  %vm382_vm6 = vcmp.lt.s32.totalorder %v2953_v30, 15 }
  0x3b   : > { %2219 = vmatmul.msk.bf16.vlgmr.msra.gmra.mxu1 %vm313_vm0, %v2919_v8  ;;  %vm393_vm7 = vcmp.lt.s32.totalorder %v2953_v30, 1  ;;  %v3020_v3 = vperm.slane %v2975_v40, 2  ;;  %v3023_v4 = vperm.slane %v2980_v41, 2  ;;  %vm2759_vm8 = vmmov 1  }
  0x3c   : > { %vm3046_vm9 = vmpackc.low %vm2759_vm8, %vm351_vm1  ;;  %vm360_vm10 = vcmp.lt.s32.totalorder %v2953_v30, 17  ;;  %vm371_vm11 = vcmp.lt.s32.totalorder %v2953_v30, 16  ;;  %vm456_vm12 = vcmask 588800   ;;  %vm521_vm13 = vcmask 1041408  }
  0x3d   : > { %vm517_vm14 = vcmask 31744  }
  0xa8   : > { %v2925_v9 = vpop.permute.xlu0 %310 }
  0xb8   : > { %v339_v10 = vpop.f32.mrf.mxu1 }
  0xb9   : > { %v340_v11 = vadd.f32 %v339_v10, %v2925_v9 }
  0xbb   : > { %v344_v12 = vmul.f32 0.5, %v340_v11 }
  0xbd   : > { %2459 = vtanh.f32 %v344_v12  ;;  %v326_v13 = vpop.f32.mrf.mxu2  ;;  %v3034_v12 = vperm.slane %v2975_v40, 3 }
  0xbe   : > { %v327_v14 = vadd.f32 %v326_v13, %v2925_v9  ;;  %v3037_v13 = vperm.slane %v2980_v41, 3 }
  0xc0   : > { %v343_v15 = vmul.f32 0.5, %v327_v14  ;;  %v341_v16 = vpop.f32.mrf.mxu1 }
  0xc2   : > { %2461 = vtanh.f32 %v343_v15 }
  0xc3   : > { %v2460_v17 = vpop.eup %2459 }
  0xc4   : > { %v348_v18 = vmul.f32 0.5, %v2460_v17 }
  0xc5   : > { %v328_v19 = vpop.f32.mrf.mxu2 }
  0xc6   : > { %v2929_v20 = vadd.f32 0.5, %v348_v18 }
  0xc8   : > { %v2462_v21 = vpop.eup %2461  ;;  %v353_v22 = vsel %vm351_vm1, %v2929_v20, 0.0 }
  0xc9   : > { %v347_v23 = vmul.f32 0.5, %v2462_v21  ;;  %424 = vrot.lane.b32.xlu0 %v353_v22, %s2751_s12  ;;  %413 = vrot.lane.b32.xlu2 %v353_v22, %s2752_s13 }
  0xca   : > { %435 = vrot.lane.b32.xlu1 %v353_v22, %s2753_s15 }
  0xcb   : > { %v2936_v24 = vadd.f32 0.5, %v347_v23 }
  0xcd   : > { %v352_v25 = vsel %vm351_vm1, %v2936_v24, 0.0 }
  0xd1   : > { %402 = vrot.lane.b32.xlu2 %v353_v22, %s2754_s7  ;;  %433 = vrot.lane.b32.xlu0 %v352_v25, %s2753_s15 }
  0xd2   : > { %380 = vrot.lane.b32.xlu1 %v353_v22, %s2755_s14 }
  0xd9   : > { %422 = vrot.lane.b32.xlu2 %v352_v25, %s2751_s12  ;;  %391 = vrot.lane.b32.xlu0 %v353_v22, %s2756_s16 }
  0xda   : > { %411 = vrot.lane.b32.xlu1 %v352_v25, %s2752_s13 }
  0xe1   : > { %389 = vrot.lane.b32.xlu2 %v352_v25, %s2756_s16  ;;  %378 = vrot.lane.b32.xlu0 %v352_v25, %s2755_s14 }
  0xe2   : > { %400 = vrot.lane.b32.xlu1 %v352_v25, %s2754_s7 }
  0xe9   : > { %356 = vrot.lane.b32.xlu2 %v353_v22, %s2757_s26  ;;  %367 = vrot.lane.b32.xlu0 %v352_v25, %s2758_s20 }
  0xea   : > { %354 = vrot.lane.b32.xlu1 %v352_v25, %s2757_s26 }
  0xf2   : > { %369 = vrot.lane.b32.xlu1 %v353_v22, %s2758_s20 }
 0x123   : > { %v414_v26 = vpop.permute.xlu2 %413 }
 0x12b   : > { %v403_v31 = vpop.permute.xlu2 %402 }
 0x133   : > { %v423_v47 = vpop.permute.xlu2 %422 }
 0x13b   : > { %v425_v28 = vpop.permute.xlu0 %424  ;;  %v390_v11 = vpop.permute.xlu2 %389 }
 0x13c   : > { %v436_v29 = vpop.permute.xlu1 %435  ;;  %v427_v51 = vsel %vm426_vm3, %v423_v47, %v425_v28  ;;  %v428_v52 = vsel %vm426_vm3, %v425_v28, %v423_v47 }
 0x13d   : > { %v431_v57 = vmul.f32 %v2984_v44, %v427_v51  ;;  %v432_v58 = vmul.f32 %v2989_v48, %v428_v52  ;;  %v3086_v52 = vld [vmem:[#allocation5] sm:$0x3] }
 0x143   : > { %v434_v34 = vpop.permute.xlu0 %433 }
 0x144   : > { %v381_v35 = vpop.permute.xlu1 %380  ;;  %v438_v36 = vsel %vm437_vm2, %v434_v34, %v436_v29  ;;  %v439_v37 = vsel %vm437_vm2, %v436_v29, %v434_v34  ;;  %v3069_v34 = vperm.slane %v2975_v40, 1 }
 0x145   : > { %v442_v38 = vmul.f32 %v2959_v32, %v438_v36  ;;  %v443_v39 = vmul.f32 %v2964_v33, %v439_v37 }
 0x147   : > { %v452_v42 = vpack.c.bf16 %v442_v38, %v442_v38  ;;  %v453_v43 = vpack.c.bf16 %v443_v39, %v443_v39 }
 0x149   : > { %v461_v45 = vsel %vm351_vm1, %v452_v42, 0  ;;  %v464_v46 = vsel %vm351_vm1, %v453_v43, 0 }
 0x14a   : > { %469 = vmatpush.bf16.msrb.mxu2 %v461_v45  ;;  %482 = vmatpush.bf16.msra.mxu3 %v464_v46 }
 0x14b   : > { %v392_v53 = vpop.permute.xlu0 %391 }
 0x14c   : > { %v412_v54 = vpop.permute.xlu1 %411  ;;  %v394_v16 = vsel %vm393_vm7, %v390_v11, %v392_v53  ;;  %v395_v17 = vsel %vm393_vm7, %v392_v53, %v390_v11  ;;  %v3093_v53 = vrot.slane %v2925_v9, 4  ;;  %v2235_v11 = vld [vmem:[%s2899_s29 + $0x28] sm:$0xff] }
 0x14d   : > { %v416_v55 = vsel %vm415_vm4, %v412_v54, %v414_v26  ;;  %v417_v56 = vsel %vm415_vm4, %v414_v26, %v412_v54  ;;  %v398_v25 = vmul.f32 %v3034_v12, %v395_v17  ;;  %v399_v26 = vmul.f32 %v3037_v13, %v394_v16 }
 0x14e   : > { %v420_v59 = vmul.f32 %v2993_v49, %v416_v55  ;;  %v421_v60 = vmul.f32 %v2996_v50, %v417_v56 }
 0x150   : > { %v450_v61 = vpack.c.bf16 %v431_v57, %v420_v59  ;;  %v451_v62 = vpack.c.bf16 %v432_v58, %v421_v60 }
 0x152   : > { %470 = vmatpush.bf16.msrb.mxu2 %v450_v61  ;;  %483 = vmatpush.bf16.msra.mxu3 %v451_v62 }
 0x153   : > { %v379_v1 = vpop.permute.xlu0 %378 }
 0x154   : > { %v401_v2 = vpop.permute.xlu1 %400  ;;  %v383_v7 = vsel %vm382_vm6, %v379_v1, %v381_v35  ;;  %v384_v10 = vsel %vm382_vm6, %v381_v35, %v379_v1  ;;  %v3072_v35 = vperm.slane %v2980_v41, 1 }
 0x155   : > { %v405_v5 = vsel %vm404_vm5, %v401_v2, %v403_v31  ;;  %v406_v6 = vsel %vm404_vm5, %v403_v31, %v401_v2  ;;  %v387_v19 = vmul.f32 %v3020_v3, %v384_v10  ;;  %v388_v21 = vmul.f32 %v3023_v4, %v383_v7  ;;  %v2236_v7 = vld [vmem:[%s2899_s29 + $0x30] sm:$0xff] }
 0x156   : > { %v409_v14 = vmul.f32 %v3012_v63, %v405_v5  ;;  %v410_v15 = vmul.f32 %v3015_v0, %v406_v6  ;;  %v3065_v31 = vperm.slane %v2980_v41, 0  ;;  %v2234_v6 = vld [vmem:[%s2899_s29 + $0x20] sm:$0xff] }
 0x157   : > { %v446_v28 = vpack.c.bf16 %v398_v25, %v387_v19  ;;  %v447_v29 = vpack.c.bf16 %v399_v26, %v388_v21  ;;  %v585_v17 = vpack.c.bf16 %v2236_v7, %v2234_v6 }
 0x158   : > { %v2221_v22 = vpack.c.bf16 %v409_v14, %v2936_v24  ;;  %v2225_v23 = vpack.c.bf16 %v410_v15, %v2929_v20  ;;  %v3062_v24 = vperm.slane %v2975_v40, 0  ;;  %v357_v20 = vpop.permute.xlu2 %356  ;;  %v2237_v14 = vld [vmem:[%s2899_s29 + $0x38] sm:$0xff] }
 0x159   : > { %v586_v21 = vpack.c.bf16 %v2237_v14, %v2235_v11 }
 0x15a   : > { %2222 = vmatpush.bf16.msk.msrb.mxu2 %vm3046_vm9, %v2221_v22  ;;  %2226 = vmatpush.bf16.msk.msra.mxu3 %vm3046_vm9, %v2225_v23  ;;  %v3105_v23 = vld [vmem:[%s4053_s3] sm:$0xff] }
 0x15b   : > { %v368_v38 = vpop.permute.xlu0 %367 }
 0x15c   : > { %v355_v27 = vpop.permute.xlu1 %354 }
 0x15d   : > { %v361_v36 = vsel %vm360_vm10, %v355_v27, %v357_v20  ;;  %v362_v37 = vsel %vm360_vm10, %v357_v20, %v355_v27 }
 0x15e   : > { %472 = vmatpush.bf16.msrb.mxu2 %v446_v28  ;;  %485 = vmatpush.bf16.msra.mxu3 %v447_v29  ;;  %v365_v40 = vmul.f32 %v3062_v24, %v362_v37  ;;  %v366_v45 = vmul.f32 %v3065_v31, %v361_v36 }
 0x164   : > { %v370_v39 = vpop.permute.xlu1 %369 }
 0x165   : > { %v372_v42 = vsel %vm371_vm11, %v368_v38, %v370_v39  ;;  %v373_v43 = vsel %vm371_vm11, %v370_v39, %v368_v38 }
 0x166   : > { %v376_v41 = vmul.f32 %v3069_v34, %v373_v43  ;;  %v377_v46 = vmul.f32 %v3072_v35, %v372_v42 }
 0x168   : > { %v444_v47 = vpack.c.bf16 %v376_v41, %v365_v40  ;;  %v445_v51 = vpack.c.bf16 %v377_v46, %v366_v45 }
 0x16a   : > { %473 = vmatpush.bf16.msrb.mxu2 %v444_v47  ;;  %486 = vmatpush.bf16.msra.mxu3 %v445_v51 }
 0x16d   : > { %2223 = vmatmul.msk.bf16.vlgmr.msrb.gmra.mxu2 %vm456_vm12, %v3086_v52  ;;  %2227 = vmatmul.msk.bf16.vlgmr.msra.gmra.mxu3 %vm456_vm12, %v3086_v52 }
 0x1f0   : > { %v475_v54 = vpop.f32.mrf.mxu2  ;;  %v488_v55 = vpop.f32.mrf.mxu3 }
 0x1f1   : > { %v476_v56 = vadd.f32 %v475_v54, %v3093_v53  ;;  %v489_v57 = vadd.f32 %v488_v55, %v3093_v53 }
 0x1f3   : > { %v492_v58 = vmul.f32 0.5, %v476_v56  ;;  %v493_v59 = vmul.f32 0.5, %v489_v57 }
 0x1f5   : > { %2463 = vtanh.f32 %v492_v58 }
 0x1f6   : > { %2465 = vtanh.f32 %v493_v59 }
 0x1f8   : > { %v477_v60 = vpop.f32.mrf.mxu2  ;;  %v490_v61 = vpop.f32.mrf.mxu3 }
 0x1fb   : > { %v2464_v62 = vpop.eup %2463 }
 0x1fc   : > { %v2466_v1 = vpop.eup %2465  ;;  %v496_v2 = vmul.f32 0.5, %v2464_v62 }
 0x1fd   : > { %v497_v5 = vmul.f32 0.5, %v2466_v1 }
 0x1fe   : > { %v498_v10 = vadd.f32 0.5, %v496_v2 }
 0x1ff   : > { %v499_v15 = vadd.f32 0.5, %v497_v5 }
 0x200   : > { %v500_v16 = vpack.c.bf16 %v498_v10, %v498_v10 }
 0x201   : > { %v501_v19 = vpack.c.bf16 %v499_v15, %v499_v15 }
 0x202   : > { %v523_v22 = vsel %vm521_vm13, %v500_v16, 0 }
 0x203   : > { %535 = vmatpush.bf16.msra.mxu0 %v523_v22  ;;  %v526_v25 = vsel %vm521_vm13, %v501_v19, 0 }
 0x204   : > { %549 = vmatpush.bf16.msrb.mxu1 %v526_v25 }
 0x206   : > { %2232 = vmatmul.msk.bf16.vlgmr.msra.gmra.mxu0 %vm517_vm14, %v3105_v23 }
 0x207   : > { %594 = vmatpush.bf16.msrb.mxu0 %v585_v17  ;;  %2233 = vmatmul.msk.bf16.vlgmr.msrb.gmra.mxu1 %vm517_vm14, %v3105_v23 }
 0x208   : > { %607 = vmatpush.bf16.msra.mxu1 %v586_v21 }
 0x216   : > { %2238 = vmatmul.msk.bf16.vlgmr.msrb.gmra.mxu0 %vm313_vm0, %v2919_v8 }
 0x217   : > { %2239 = vmatmul.msk.bf16.vlgmr.msra.gmra.mxu1 %vm313_vm0, %v2919_v8 }
 0x283   : > { %v3116_v26 = vpop.f32.mrf.mxu0 }
 0x284   : > { %v3118_v27 = vpop.f32.mrf.mxu1 }
 0x28b   : > { %v3120_v28 = vpop.f32.mrf.mxu0 }
 0x28c   : > { %v3122_v29 = vpop.f32.mrf.mxu1 }
 0x293   : > { %v596_v20 = vpop.f32.mrf.mxu0 }
 0x294   : > { %v597_v36 = vadd.f32 %v596_v20, %v2925_v9  ;;  %v609_v37 = vpop.f32.mrf.mxu1 }
 0x295   : > { %v610_v38 = vadd.f32 %v609_v37, %v2925_v9 }
 0x296   : > { %v613_v39 = vmul.f32 0.5, %v597_v36 }
 0x297   : > { %v614_v42 = vmul.f32 0.5, %v610_v38 }
 0x298   : > { %2467 = vtanh.f32 %v613_v39 }
 0x299   : > { %2469 = vtanh.f32 %v614_v42 }
 0x29b   : > { %v598_v43 = vpop.f32.mrf.mxu0 }
 0x29c   : > { %v611_v40 = vpop.f32.mrf.mxu1 }
 0x29e   : > { %v2468_v45 = vpop.eup %2467 }
 0x29f   : > { %v2470_v41 = vpop.eup %2469  ;;  %v617_v46 = vmul.f32 0.5, %v2468_v45 }
 0x2a0   : > { %v618_v47 = vmul.f32 0.5, %v2470_v41 }
 0x2a1   : > { %v619_v51 = vadd.f32 0.5, %v617_v46 }
 0x2a2   : > { %v620_v54 = vadd.f32 0.5, %v618_v47 }
 0x2a3   : > { %v621_v55 = vsel %vm351_vm1, %v619_v51, 0.0 }
 0x2a4   : > { %v622_v56 = vsel %vm351_vm1, %v620_v54, 0.0  ;;  %663 = vrot.lane.b32.xlu1 %v621_v55, %s2752_s13  ;;  %679 = vrot.lane.b32.xlu2 %v621_v55, %s2753_s15 }
 0x2a5   : > { %681 = vrot.lane.b32.xlu0 %v622_v56, %s2753_s15 }
 0x2ac   : > { %673 = vrot.lane.b32.xlu1 %v622_v56, %s2751_s12  ;;  %665 = vrot.lane.b32.xlu2 %v622_v56, %s2752_s13 }
 0x2ad   : > { %671 = vrot.lane.b32.xlu0 %v621_v55, %s2751_s12 }
 0x2b4   : > { %639 = vrot.lane.b32.xlu1 %v621_v55, %s2755_s14  ;;  %655 = vrot.lane.b32.xlu2 %v621_v55, %s2754_s7 }
 0x2b5   : > { %657 = vrot.lane.b32.xlu0 %v622_v56, %s2754_s7 }
 0x2bc   : > { %649 = vrot.lane.b32.xlu1 %v622_v56, %s2756_s16  ;;  %641 = vrot.lane.b32.xlu2 %v622_v56, %s2755_s14 }
 0x2bd   : > { %647 = vrot.lane.b32.xlu0 %v621_v55, %s2756_s16 }
 0x2c4   : > { %631 = vrot.lane.b32.xlu1 %v621_v55, %s2758_s20  ;;  %623 = vrot.lane.b32.xlu2 %v621_v55, %s2757_s26 }
 0x2c5   : > { %625 = vrot.lane.b32.xlu0 %v622_v56, %s2757_s26 }
 0x2cc   : > { %633 = vrot.lane.b32.xlu2 %v622_v56, %s2758_s20 }
 0x2fe   : > { %v680_v57 = vpop.permute.xlu2 %679 }
 0x306   : > { %v666_v58 = vpop.permute.xlu2 %665 }
 0x30e   : > { %v656_v61 = vpop.permute.xlu2 %655 }
 0x316   : > { %v664_v59 = vpop.permute.xlu1 %663  ;;  %v642_v37 = vpop.permute.xlu2 %641 }
 0x317   : > { %v682_v60 = vpop.permute.xlu0 %681  ;;  %v667_v14 = vsel %vm415_vm4, %v664_v59, %v666_v58  ;;  %v668_v15 = vsel %vm415_vm4, %v666_v58, %v664_v59 }
 0x318   : > { %v683_v62 = vsel %vm437_vm2, %v680_v57, %v682_v60  ;;  %v684_v1 = vsel %vm437_vm2, %v682_v60, %v680_v57  ;;  %v669_v22 = vmul.f32 %v667_v14, %v2993_v49  ;;  %v670_v25 = vmul.f32 %v668_v15, %v2996_v50 }
 0x319   : > { %v685_v2 = vmul.f32 %v2959_v32, %v683_v62  ;;  %v686_v5 = vmul.f32 %v2964_v33, %v684_v1 }
 0x31b   : > { %v695_v6 = vpack.c.bf16 %v685_v2, %v685_v2  ;;  %v696_v7 = vpack.c.bf16 %v686_v5, %v686_v5 }
 0x31d   : > { %v698_v10 = vsel %vm351_vm1, %v695_v6, 0  ;;  %v701_v11 = vsel %vm351_vm1, %v696_v7, 0 }
 0x31e   : > { %706 = vmatpush.bf16.msra.mxu2 %v698_v10  ;;  %719 = vmatpush.bf16.msrb.mxu3 %v701_v11  ;;  %v674_v16 = vpop.permute.xlu1 %673  ;;  %v624_v56 = vpop.permute.xlu2 %623  ;;  %v2254_v11 = vld [vmem:[%s2899_s29 + $0x40] sm:$0xff] }
 0x31f   : > { %v672_v17 = vpop.permute.xlu0 %671 }
 0x320   : > { %v675_v19 = vsel %vm426_vm3, %v672_v17, %v674_v16  ;;  %v676_v21 = vsel %vm426_vm3, %v674_v16, %v672_v17  ;;  %v2256_v17 = vld [vmem:[%s2899_s29 + $0x50] sm:$0xff] }
 0x321   : > { %v677_v20 = vmul.f32 %v675_v19, %v2984_v44  ;;  %v678_v36 = vmul.f32 %v676_v21, %v2989_v48  ;;  %v2255_v19 = vld [vmem:[%s2899_s29 + $0x48] sm:$0xff]  ;;  %v2257_v21 = vld [vmem:[%s2899_s29 + $0x58] sm:$0xff] }
 0x323   : > { %v693_v38 = vpack.c.bf16 %v677_v20, %v669_v22  ;;  %v694_v39 = vpack.c.bf16 %v678_v36, %v670_v25 }
 0x325   : > { %707 = vmatpush.bf16.msra.mxu2 %v693_v38  ;;  %720 = vmatpush.bf16.msrb.mxu3 %v694_v39  ;;  %v803_v39 = vpack.c.bf16 %v2256_v17, %v2254_v11 }
 0x326   : > { %v640_v42 = vpop.permute.xlu1 %639  ;;  %v634_v7 = vpop.permute.xlu2 %633 }
 0x327   : > { %v658_v43 = vpop.permute.xlu0 %657  ;;  %v643_v57 = vsel %vm382_vm6, %v640_v42, %v642_v37  ;;  %v644_v58 = vsel %vm382_vm6, %v642_v37, %v640_v42  ;;  %v804_v42 = vpack.c.bf16 %v2257_v21, %v2255_v19 }
 0x328   : > { %v659_v40 = vsel %vm404_vm5, %v656_v61, %v658_v43  ;;  %v660_v45 = vsel %vm404_vm5, %v658_v43, %v656_v61  ;;  %v645_v61 = vmul.f32 %v644_v58, %v3020_v3  ;;  %v646_v62 = vmul.f32 %v643_v57, %v3023_v4 }
 0x329   : > { %v661_v41 = vmul.f32 %v659_v40, %v3012_v63  ;;  %v662_v46 = vmul.f32 %v660_v45, %v3015_v0 }
 0x32b   : > { %v2241_v47 = vpack.c.bf16 %v661_v41, %v619_v51  ;;  %v2245_v55 = vpack.c.bf16 %v662_v46, %v620_v54 }
 0x32d   : > { %2242 = vmatpush.bf16.msk.msra.mxu2 %vm3046_vm9, %v2241_v47  ;;  %2246 = vmatpush.bf16.msk.msrb.mxu3 %vm3046_vm9, %v2245_v55 }
 0x32e   : > { %v650_v59 = vpop.permute.xlu1 %649 }
 0x32f   : > { %v648_v60 = vpop.permute.xlu0 %647 }
 0x330   : > { %v651_v51 = vsel %vm393_vm7, %v648_v60, %v650_v59  ;;  %v652_v54 = vsel %vm393_vm7, %v650_v59, %v648_v60 }
 0x331   : > { %v653_v1 = vmul.f32 %v652_v54, %v3034_v12  ;;  %v654_v2 = vmul.f32 %v651_v51, %v3037_v13 }
 0x333   : > { %v689_v5 = vpack.c.bf16 %v653_v1, %v645_v61  ;;  %v690_v6 = vpack.c.bf16 %v654_v2, %v646_v62 }
 0x335   : > { %709 = vmatpush.bf16.msra.mxu2 %v689_v5  ;;  %722 = vmatpush.bf16.msrb.mxu3 %v690_v6 }
 0x336   : > { %v632_v10 = vpop.permute.xlu1 %631 }
 0x337   : > { %v635_v14 = vsel %vm371_vm11, %v632_v10, %v634_v7  ;;  %v636_v15 = vsel %vm371_vm11, %v634_v7, %v632_v10  ;;  %v626_v16 = vpop.permute.xlu0 %625 }
 0x338   : > { %v637_v22 = vmul.f32 %v636_v15, %v3069_v34  ;;  %v638_v25 = vmul.f32 %v635_v14, %v3072_v35  ;;  %v627_v20 = vsel %vm360_vm10, %v624_v56, %v626_v16  ;;  %v628_v36 = vsel %vm360_vm10, %v626_v16, %v624_v56 }
 0x339   : > { %v629_v37 = vmul.f32 %v628_v36, %v3062_v24  ;;  %v630_v38 = vmul.f32 %v627_v20, %v3065_v31 }
 0x33b   : > { %v687_v43 = vpack.c.bf16 %v637_v22, %v629_v37  ;;  %v688_v40 = vpack.c.bf16 %v638_v25, %v630_v38 }
 0x33d   : > { %710 = vmatpush.bf16.msra.mxu2 %v687_v43  ;;  %723 = vmatpush.bf16.msrb.mxu3 %v688_v40 }
 0x340   : > { %2243 = vmatmul.msk.bf16.vlgmr.msra.gmra.mxu2 %vm456_vm12, %v3086_v52  ;;  %2247 = vmatmul.msk.bf16.vlgmr.msrb.gmra.mxu3 %vm456_vm12, %v3086_v52 }
 0x341   : > { %812 = vmatpush.bf16.msrb.mxu2 %v803_v39  ;;  %825 = vmatpush.bf16.msra.mxu3 %v804_v42 }
 0x350   : > { %2258 = vmatmul.msk.bf16.vlgmr.msrb.gmra.mxu2 %vm313_vm0, %v2919_v8  ;;  %2259 = vmatmul.msk.bf16.vlgmr.msra.gmra.mxu3 %vm313_vm0, %v2919_v8 }
 0x3c3   : > { %v712_v45 = vpop.f32.mrf.mxu2  ;;  %v725_v41 = vpop.f32.mrf.mxu3 }
 0x3c4   : > { %v713_v46 = vadd.f32 %v712_v45, %v3093_v53  ;;  %v726_v47 = vadd.f32 %v725_v41, %v3093_v53 }
 0x3c6   : > { %v729_v55 = vmul.f32 0.5, %v713_v46  ;;  %v730_v56 = vmul.f32 0.5, %v726_v47 }
 0x3c8   : > { %2471 = vtanh.f32 %v729_v55 }
 0x3c9   : > { %2473 = vtanh.f32 %v730_v56 }
 0x3cb   : > { %v714_v57 = vpop.f32.mrf.mxu2  ;;  %v727_v58 = vpop.f32.mrf.mxu3 }
 0x3ce   : > { %v2472_v59 = vpop.eup %2471 }
 0x3cf   : > { %v2474_v60 = vpop.eup %2473  ;;  %v733_v51 = vmul.f32 0.5, %v2472_v59 }
 0x3d0   : > { %v734_v54 = vmul.f32 0.5, %v2474_v60 }
 0x3d1   : > { %v735_v61 = vadd.f32 0.5, %v733_v51 }
 0x3d2   : > { %v736_v62 = vadd.f32 0.5, %v734_v54 }
 0x3d3   : > { %v737_v1 = vpack.c.bf16 %v735_v61, %v735_v61  ;;  %v814_v2 = vpop.f32.mrf.mxu2  ;;  %v827_v5 = vpop.f32.mrf.mxu3 }
 0x3d4   : > { %v738_v6 = vpack.c.bf16 %v736_v62, %v736_v62  ;;  %v815_v7 = vadd.f32 %v814_v2, %v2925_v9  ;;  %v828_v10 = vadd.f32 %v827_v5, %v2925_v9 }
 0x3d5   : > { %v740_v11 = vsel %vm521_vm13, %v737_v1, 0 }
 0x3d6   : > { %v831_v14 = vmul.f32 0.5, %v815_v7  ;;  %v832_v15 = vmul.f32 0.5, %v828_v10  ;;  %752 = vmatpush.bf16.msra.mxu0 %v740_v11  ;;  %v743_v16 = vsel %vm521_vm13, %v738_v6, 0 }
 0x3d7   : > { %766 = vmatpush.bf16.msrb.mxu1 %v743_v16 }
 0x3d8   : > { %2475 = vtanh.f32 %v831_v14 }
 0x3d9   : > { %2477 = vtanh.f32 %v832_v15  ;;  %2248 = vmatmul.msk.bf16.vlgmr.msra.gmra.mxu0 %vm517_vm14, %v3105_v23 }
 0x3da   : > { %2249 = vmatmul.msk.bf16.vlgmr.msrb.gmra.mxu1 %vm517_vm14, %v3105_v23 }
 0x3db   : > { %v816_v17 = vpop.f32.mrf.mxu2  ;;  %v829_v19 = vpop.f32.mrf.mxu3 }
 0x3de   : > { %v2476_v21 = vpop.eup %2475 }
 0x3df   : > { %v2478_v22 = vpop.eup %2477  ;;  %v835_v25 = vmul.f32 0.5, %v2476_v21 }
 0x3e0   : > { %v836_v20 = vmul.f32 0.5, %v2478_v22 }
 0x3e1   : > { %v837_v36 = vadd.f32 0.5, %v835_v25 }
 0x3e2   : > { %v838_v37 = vadd.f32 0.5, %v836_v20 }
 0x3e3   : > { %v839_v38 = vsel %vm351_vm1, %v837_v36, 0.0 }
 0x3e4   : > { %v840_v39 = vsel %vm351_vm1, %v838_v37, 0.0  ;;  %881 = vrot.lane.b32.xlu2 %v839_v38, %s2752_s13  ;;  %897 = vrot.lane.b32.xlu0 %v839_v38, %s2753_s15 }
 0x3e5   : > { %899 = vrot.lane.b32.xlu1 %v840_v39, %s2753_s15 }
 0x3ec   : > { %891 = vrot.lane.b32.xlu2 %v840_v39, %s2751_s12  ;;  %883 = vrot.lane.b32.xlu0 %v840_v39, %s2752_s13 }
 0x3ed   : > { %889 = vrot.lane.b32.xlu1 %v839_v38, %s2751_s12 }
 0x3f4   : > { %857 = vrot.lane.b32.xlu2 %v839_v38, %s2755_s14  ;;  %873 = vrot.lane.b32.xlu0 %v839_v38, %s2754_s7 }
 0x3f5   : > { %875 = vrot.lane.b32.xlu1 %v840_v39, %s2754_s7 }
 0x3fc   : > { %867 = vrot.lane.b32.xlu2 %v840_v39, %s2756_s16  ;;  %859 = vrot.lane.b32.xlu0 %v840_v39, %s2755_s14 }
 0x3fd   : > { %865 = vrot.lane.b32.xlu1 %v839_v38, %s2756_s16 }
 0x404   : > { %849 = vrot.lane.b32.xlu2 %v839_v38, %s2758_s20  ;;  %841 = vrot.lane.b32.xlu0 %v839_v38, %s2757_s26 }
 0x405   : > { %843 = vrot.lane.b32.xlu1 %v840_v39, %s2757_s26 }
 0x40c   : > { %851 = vrot.lane.b32.xlu0 %v840_v39, %s2758_s20 }
 0x43e   : > { %v882_v42 = vpop.permute.xlu2 %881 }
 0x446   : > { %v892_v55 = vpop.permute.xlu2 %891 }
 0x44e   : > { %v858_v14 = vpop.permute.xlu2 %857 }
 0x456   : > { %v898_v43 = vpop.permute.xlu0 %897  ;;  %v868_v39 = vpop.permute.xlu2 %867 }
 0x457   : > { %v900_v40 = vpop.permute.xlu1 %899 }
 0x458   : > { %v901_v45 = vsel %vm437_vm2, %v898_v43, %v900_v40  ;;  %v902_v41 = vsel %vm437_vm2, %v900_v40, %v898_v43 }
 0x459   : > { %v903_v46 = vmul.f32 %v2959_v32, %v901_v45  ;;  %v904_v47 = vmul.f32 %v2964_v33, %v902_v41 }
 0x45b   : > { %v913_v56 = vpack.c.bf16 %v903_v46, %v903_v46  ;;  %v914_v57 = vpack.c.bf16 %v904_v47, %v904_v47 }
 0x45d   : > { %v916_v58 = vsel %vm351_vm1, %v913_v56, 0  ;;  %v919_v59 = vsel %vm351_vm1, %v914_v57, 0 }
 0x45e   : > { %924 = vmatpush.bf16.msrb.mxu0 %v916_v58  ;;  %937 = vmatpush.bf16.msra.mxu1 %v919_v59  ;;  %v884_v60 = vpop.permute.xlu0 %883 }
 0x45f   : > { %v885_v51 = vsel %vm415_vm4, %v882_v42, %v884_v60  ;;  %v886_v54 = vsel %vm415_vm4, %v884_v60, %v882_v42  ;;  %v890_v61 = vpop.permute.xlu1 %889 }
 0x460   : > { %v887_v62 = vmul.f32 %v885_v51, %v2993_v49  ;;  %v888_v1 = vmul.f32 %v886_v54, %v2996_v50  ;;  %v893_v2 = vsel %vm426_vm3, %v890_v61, %v892_v55  ;;  %v894_v5 = vsel %vm426_vm3, %v892_v55, %v890_v61  ;;  %v2274_v51 = vld [vmem:[%s2899_s29 + $0x60] sm:$0xff]  ;;  %v850_v54 = vpop.permute.xlu2 %849 }
 0x461   : > { %v895_v6 = vmul.f32 %v893_v2, %v2984_v44  ;;  %v896_v7 = vmul.f32 %v894_v5, %v2989_v48  ;;  %v2277_v2 = vld [vmem:[%s2899_s29 + $0x78] sm:$0xff] }
 0x463   : > { %v911_v10 = vpack.c.bf16 %v895_v6, %v887_v62  ;;  %v912_v11 = vpack.c.bf16 %v896_v7, %v888_v1  ;;  %v2276_v62 = vld [vmem:[%s2899_s29 + $0x70] sm:$0xff]  ;;  %v2275_v1 = vld [vmem:[%s2899_s29 + $0x68] sm:$0xff] }
 0x465   : > { %925 = vmatpush.bf16.msrb.mxu0 %v911_v10  ;;  %938 = vmatpush.bf16.msra.mxu1 %v912_v11 }
 0x466   : > { %v874_v15 = vpop.permute.xlu0 %873 }
 0x467   : > { %v876_v16 = vpop.permute.xlu1 %875 }
 0x468   : > { %v877_v17 = vsel %vm404_vm5, %v874_v15, %v876_v16  ;;  %v878_v19 = vsel %vm404_vm5, %v876_v16, %v874_v15  ;;  %v1021_v15 = vpack.c.bf16 %v2276_v62, %v2274_v51  ;;  %v1022_v16 = vpack.c.bf16 %v2277_v2, %v2275_v1 }
 0x469   : > { %v879_v21 = vmul.f32 %v877_v17, %v3012_v63  ;;  %v880_v22 = vmul.f32 %v878_v19, %v3015_v0 }
 0x46b   : > { %v2261_v25 = vpack.c.bf16 %v879_v21, %v837_v36  ;;  %v2265_v20 = vpack.c.bf16 %v880_v22, %v838_v37  ;;  %v3304_v21 = vpop.f32.mrf.mxu1  ;;  %v3306_v22 = vpop.f32.mrf.mxu0 }
 0x46d   : > { %2262 = vmatpush.bf16.msk.msrb.mxu0 %vm3046_vm9, %v2261_v25  ;;  %2266 = vmatpush.bf16.msk.msra.mxu1 %vm3046_vm9, %v2265_v20 }
 0x46e   : > { %v860_v38 = vpop.permute.xlu0 %859 }
 0x46f   : > { %v861_v42 = vsel %vm382_vm6, %v858_v14, %v860_v38  ;;  %v862_v43 = vsel %vm382_vm6, %v860_v38, %v858_v14  ;;  %v866_v40 = vpop.permute.xlu1 %865 }
 0x470   : > { %v863_v45 = vmul.f32 %v862_v43, %v3020_v3  ;;  %v864_v36 = vmul.f32 %v861_v42, %v3023_v4  ;;  %v869_v37 = vsel %vm393_vm7, %v866_v40, %v868_v39  ;;  %v870_v41 = vsel %vm393_vm7, %v868_v39, %v866_v40 }
 0x471   : > { %v871_v46 = vmul.f32 %v870_v41, %v3034_v12  ;;  %v872_v47 = vmul.f32 %v869_v37, %v3037_v13 }
 0x473   : > { %v907_v55 = vpack.c.bf16 %v871_v46, %v863_v45  ;;  %v908_v56 = vpack.c.bf16 %v872_v47, %v864_v36  ;;  %v3308_v25 = vpop.f32.mrf.mxu1  ;;  %v3310_v20 = vpop.f32.mrf.mxu0 }
 0x475   : > { %927 = vmatpush.bf16.msrb.mxu0 %v907_v55  ;;  %940 = vmatpush.bf16.msra.mxu1 %v908_v56 }
 0x476   : > { %v842_v57 = vpop.permute.xlu0 %841 }
 0x477   : > { %v844_v58 = vpop.permute.xlu1 %843 }
 0x478   : > { %v845_v59 = vsel %vm360_vm10, %v842_v57, %v844_v58  ;;  %v846_v60 = vsel %vm360_vm10, %v844_v58, %v842_v57 }
 0x479   : > { %v847_v7 = vmul.f32 %v846_v60, %v3062_v24  ;;  %v848_v10 = vmul.f32 %v845_v59, %v3065_v31 }
 0x47e   : > { %v852_v61 = vpop.permute.xlu0 %851 }
 0x47f   : > { %v853_v5 = vsel %vm371_vm11, %v850_v54, %v852_v61  ;;  %v854_v6 = vsel %vm371_vm11, %v852_v61, %v850_v54 }
 0x480   : > { %v855_v11 = vmul.f32 %v854_v6, %v3069_v34  ;;  %v856_v14 = vmul.f32 %v853_v5, %v3072_v35 }
 0x482   : > { %v905_v17 = vpack.c.bf16 %v855_v11, %v847_v7  ;;  %v906_v19 = vpack.c.bf16 %v856_v14, %v848_v10 }
 0x484   : > { %928 = vmatpush.bf16.msrb.mxu0 %v905_v17  ;;  %941 = vmatpush.bf16.msra.mxu1 %v906_v19 }
 0x487   : > { %2263 = vmatmul.msk.bf16.vlgmr.msrb.gmra.mxu0 %vm456_vm12, %v3086_v52  ;;  %2267 = vmatmul.msk.bf16.vlgmr.msra.gmra.mxu1 %vm456_vm12, %v3086_v52 }
 0x488   : > { %1030 = vmatpush.bf16.msra.mxu0 %v1021_v15  ;;  %1043 = vmatpush.bf16.msrb.mxu1 %v1022_v16 }
 0x497   : > { %2278 = vmatmul.msk.bf16.vlgmr.msra.gmra.mxu0 %vm313_vm0, %v2919_v8  ;;  %2279 = vmatmul.msk.bf16.vlgmr.msrb.gmra.mxu1 %vm313_vm0, %v2919_v8 }
 0x504   : > { %v930_v38 = vpop.f32.mrf.mxu0  ;;  %v943_v39 = vpop.f32.mrf.mxu1 }
 0x505   : > { %v931_v42 = vadd.f32 %v930_v38, %v3093_v53  ;;  %v944_v43 = vadd.f32 %v943_v39, %v3093_v53 }
 0x507   : > { %v947_v40 = vmul.f32 0.5, %v931_v42  ;;  %v948_v45 = vmul.f32 0.5, %v944_v43 }
 0x509   : > { %2479 = vtanh.f32 %v947_v40 }
 0x50a   : > { %2481 = vtanh.f32 %v948_v45 }
 0x50c   : > { %v932_v36 = vpop.f32.mrf.mxu0  ;;  %v945_v8 = vpop.f32.mrf.mxu1 }
 0x50f   : > { %v2480_v37 = vpop.eup %2479 }
 0x510   : > { %v2482_v41 = vpop.eup %2481  ;;  %v951_v46 = vmul.f32 0.5, %v2480_v37 }
 0x511   : > { %v952_v47 = vmul.f32 0.5, %v2482_v41 }
 0x512   : > { %v953_v55 = vadd.f32 0.5, %v951_v46 }
 0x513   : > { %v954_v56 = vadd.f32 0.5, %v952_v47 }
 0x514   : > { %v955_v57 = vpack.c.bf16 %v953_v55, %v953_v55  ;;  %v1032_v58 = vpop.f32.mrf.mxu0  ;;  %v1045_v59 = vpop.f32.mrf.mxu1 }
 0x515   : > { %v956_v60 = vpack.c.bf16 %v954_v56, %v954_v56  ;;  %v1033_v51 = vadd.f32 %v1032_v58, %v2925_v9  ;;  %v1046_v54 = vadd.f32 %v1045_v59, %v2925_v9 }
 0x516   : > { %v958_v61 = vsel %vm521_vm13, %v955_v57, 0 }
 0x517   : > { %v1049_v62 = vmul.f32 0.5, %v1033_v51  ;;  %v1050_v1 = vmul.f32 0.5, %v1046_v54  ;;  %970 = vmatpush.bf16.msra.mxu2 %v958_v61  ;;  %v961_v2 = vsel %vm521_vm13, %v956_v60, 0 }
 0x518   : > { %984 = vmatpush.bf16.msrb.mxu3 %v961_v2 }
 0x519   : > { %2483 = vtanh.f32 %v1049_v62 }
 0x51a   : > { %2485 = vtanh.f32 %v1050_v1  ;;  %2268 = vmatmul.msk.bf16.vlgmr.msra.gmra.mxu2 %vm517_vm14, %v3105_v23 }
 0x51b   : > { %2269 = vmatmul.msk.bf16.vlgmr.msrb.gmra.mxu3 %vm517_vm14, %v3105_v23 }
 0x51c   : > { %v1034_v5 = vpop.f32.mrf.mxu0  ;;  %v1047_v6 = vpop.f32.mrf.mxu1 }
 0x51f   : > { %v2484_v7 = vpop.eup %2483 }
 0x520   : > { %v2486_v10 = vpop.eup %2485  ;;  %v1053_v11 = vmul.f32 0.5, %v2484_v7 }
 0x521   : > { %v1054_v14 = vmul.f32 0.5, %v2486_v10 }
 0x522   : > { %v1055_v15 = vadd.f32 0.5, %v1053_v11 }
 0x523   : > { %v1056_v16 = vadd.f32 0.5, %v1054_v14 }
 0x524   : > { %v1057_v17 = vsel %vm351_vm1, %v1055_v15, 0.0 }
 0x525   : > { %v1058_v19 = vsel %vm351_vm1, %v1056_v16, 0.0  ;;  %1099 = vrot.lane.b32.xlu0 %v1057_v17, %s2752_s13  ;;  %1115 = vrot.lane.b32.xlu1 %v1057_v17, %s2753_s15 }
 0x526   : > { %1117 = vrot.lane.b32.xlu2 %v1058_v19, %s2753_s15 }
 0x52d   : > { %1109 = vrot.lane.b32.xlu0 %v1058_v19, %s2751_s12  ;;  %1101 = vrot.lane.b32.xlu1 %v1058_v19, %s2752_s13 }
 0x52e   : > { %1107 = vrot.lane.b32.xlu2 %v1057_v17, %s2751_s12 }
 0x535   : > { %1075 = vrot.lane.b32.xlu0 %v1057_v17, %s2755_s14  ;;  %1091 = vrot.lane.b32.xlu1 %v1057_v17, %s2754_s7 }
 0x536   : > { %1093 = vrot.lane.b32.xlu2 %v1058_v19, %s2754_s7 }
 0x53d   : > { %1085 = vrot.lane.b32.xlu0 %v1058_v19, %s2756_s16  ;;  %1077 = vrot.lane.b32.xlu1 %v1058_v19, %s2755_s14 }
 0x53e   : > { %1083 = vrot.lane.b32.xlu2 %v1057_v17, %s2756_s16 }
 0x545   : > { %1067 = vrot.lane.b32.xlu0 %v1057_v17, %s2758_s20  ;;  %1059 = vrot.lane.b32.xlu1 %v1057_v17, %s2757_s26 }
 0x546   : > { %1061 = vrot.lane.b32.xlu2 %v1058_v19, %s2757_s26 }
 0x54d   : > { %1069 = vrot.lane.b32.xlu1 %v1058_v19, %s2758_s20 }
 0x580   : > { %v1118_v38 = vpop.permute.xlu2 %1117 }
 0x588   : > { %v1108_v8 = vpop.permute.xlu2 %1107 }
 0x590   : > { %v1094_v1 = vpop.permute.xlu2 %1093 }
 0x597   : > { %v1100_v39 = vpop.permute.xlu0 %1099  ;;  %v1116_v42 = vpop.permute.xlu1 %1115 }
 0x598   : > { %v1119_v43 = vsel %vm437_vm2, %v1116_v42, %v1118_v38  ;;  %v1120_v40 = vsel %vm437_vm2, %v1118_v38, %v1116_v42  ;;  %v1084_v19 = vpop.permute.xlu2 %1083 }
 0x599   : > { %v1121_v45 = vmul.f32 %v2959_v32, %v1119_v43  ;;  %v1122_v36 = vmul.f32 %v2964_v33, %v1120_v40 }
 0x59b   : > { %v1131_v37 = vpack.c.bf16 %v1121_v45, %v1121_v45  ;;  %v1132_v41 = vpack.c.bf16 %v1122_v36, %v1122_v36 }
 0x59d   : > { %v1134_v46 = vsel %vm351_vm1, %v1131_v37, 0  ;;  %v1137_v47 = vsel %vm351_vm1, %v1132_v41, 0 }
 0x59e   : > { %1142 = vmatpush.bf16.msrb.mxu2 %v1134_v46  ;;  %1155 = vmatpush.bf16.msra.mxu3 %v1137_v47 }
 0x59f   : > { %v1110_v55 = vpop.permute.xlu0 %1109  ;;  %v1102_v56 = vpop.permute.xlu1 %1101 }
 0x5a0   : > { %v1111_v57 = vsel %vm426_vm3, %v1108_v8, %v1110_v55  ;;  %v1112_v58 = vsel %vm426_vm3, %v1110_v55, %v1108_v8  ;;  %v1103_v32 = vsel %vm415_vm4, %v1100_v39, %v1102_v56  ;;  %v1104_v33 = vsel %vm415_vm4, %v1102_v56, %v1100_v39  ;;  %v1062_v47 = vpop.permute.xlu2 %1061 }
 0x5a1   : > { %v1113_v59 = vmul.f32 %v1111_v57, %v2984_v44  ;;  %v1114_v60 = vmul.f32 %v1112_v58, %v2989_v48  ;;  %v1105_v51 = vmul.f32 %v1103_v32, %v2993_v49  ;;  %v1106_v54 = vmul.f32 %v1104_v33, %v2996_v50  ;;  %v2294_v57 = vld [vmem:[%s2899_s29 + $0x80] sm:$0xff]  ;;  %v2296_v33 = vld [vmem:[%s2899_s29 + $0x90] sm:$0xff] }
 0x5a3   : > { %v1129_v61 = vpack.c.bf16 %v1113_v59, %v1105_v51  ;;  %v1130_v62 = vpack.c.bf16 %v1114_v60, %v1106_v54  ;;  %v2295_v59 = vld [vmem:[%s2899_s29 + $0x88] sm:$0xff]  ;;  %v2297_v60 = vld [vmem:[%s2899_s29 + $0x98] sm:$0xff] }
 0x5a5   : > { %1143 = vmatpush.bf16.msrb.mxu2 %v1129_v61  ;;  %1156 = vmatpush.bf16.msra.mxu3 %v1130_v62 }
 0x5a7   : > { %v1076_v2 = vpop.permute.xlu0 %1075  ;;  %v1092_v5 = vpop.permute.xlu1 %1091 }
 0x5a8   : > { %v1095_v6 = vsel %vm404_vm5, %v1092_v5, %v1094_v1  ;;  %v1096_v7 = vsel %vm404_vm5, %v1094_v1, %v1092_v5  ;;  %v1239_v5 = vpack.c.bf16 %v2296_v33, %v2294_v57 }
 0x5a9   : > { %v1097_v10 = vmul.f32 %v1095_v6, %v3012_v63  ;;  %v1098_v11 = vmul.f32 %v1096_v7, %v3015_v0  ;;  %v1240_v6 = vpack.c.bf16 %v2297_v60, %v2295_v59 }
 0x5ab   : > { %v2281_v14 = vpack.c.bf16 %v1097_v10, %v1055_v15  ;;  %v2285_v17 = vpack.c.bf16 %v1098_v11, %v1056_v16  ;;  %v3405_v11 = vld [vmem:[%s4051_s1] sm:$0x3] }
 0x5ad   : > { %2282 = vmatpush.bf16.msk.msrb.mxu2 %vm3046_vm9, %v2281_v14  ;;  %2286 = vmatpush.bf16.msk.msra.mxu3 %vm3046_vm9, %v2285_v17  ;;  %v3411_v14 = vpop.f32.mrf.mxu2  ;;  %v3413_v17 = vpop.f32.mrf.mxu3 }
 0x5af   : > { %v1086_v38 = vpop.permute.xlu0 %1085  ;;  %v1078_v39 = vpop.permute.xlu1 %1077 }
 0x5b0   : > { %v1087_v42 = vsel %vm393_vm7, %v1084_v19, %v1086_v38  ;;  %v1088_v43 = vsel %vm393_vm7, %v1086_v38, %v1084_v19  ;;  %v1079_v15 = vsel %vm382_vm6, %v1076_v2, %v1078_v39  ;;  %v1080_v16 = vsel %vm382_vm6, %v1078_v39, %v1076_v2 }
 0x5b1   : > { %v1089_v40 = vmul.f32 %v1088_v43, %v3034_v12  ;;  %v1090_v45 = vmul.f32 %v1087_v42, %v3037_v13  ;;  %v1081_v36 = vmul.f32 %v1080_v16, %v3020_v3  ;;  %v1082_v8 = vmul.f32 %v1079_v15, %v3023_v4 }
 0x5b3   : > { %v1125_v37 = vpack.c.bf16 %v1089_v40, %v1081_v36  ;;  %v1126_v41 = vpack.c.bf16 %v1090_v45, %v1082_v8 }
 0x5b5   : > { %1145 = vmatpush.bf16.msrb.mxu2 %v1125_v37  ;;  %1158 = vmatpush.bf16.msra.mxu3 %v1126_v41  ;;  %v3415_v19 = vpop.f32.mrf.mxu2  ;;  %v3417_v38 = vpop.f32.mrf.mxu3 }
 0x5b7   : > { %v1060_v46 = vpop.permute.xlu1 %1059  ;;  %v1068_v58 = vpop.permute.xlu0 %1067 }
 0x5b8   : > { %v1063_v55 = vsel %vm360_vm10, %v1060_v46, %v1062_v47  ;;  %v1064_v56 = vsel %vm360_vm10, %v1062_v47, %v1060_v46 }
 0x5b9   : > { %v1065_v61 = vmul.f32 %v1064_v56, %v3062_v24  ;;  %v1066_v62 = vmul.f32 %v1063_v55, %v3065_v31 }
 0x5bf   : > { %v1070_v32 = vpop.permute.xlu1 %1069 }
 0x5c0   : > { %v1071_v51 = vsel %vm371_vm11, %v1068_v58, %v1070_v32  ;;  %v1072_v54 = vsel %vm371_vm11, %v1070_v32, %v1068_v58 }
 0x5c1   : > { %v1073_v1 = vmul.f32 %v1072_v54, %v3069_v34  ;;  %v1074_v2 = vmul.f32 %v1071_v51, %v3072_v35 }
 0x5c3   : > { %v1123_v7 = vpack.c.bf16 %v1073_v1, %v1065_v61  ;;  %v1124_v10 = vpack.c.bf16 %v1074_v2, %v1066_v62 }
 0x5c5   : > { %1146 = vmatpush.bf16.msrb.mxu2 %v1123_v7  ;;  %1159 = vmatpush.bf16.msra.mxu3 %v1124_v10 }
 0x5c8   : > { %2283 = vmatmul.msk.bf16.vlgmr.msrb.gmra.mxu2 %vm456_vm12, %v3086_v52  ;;  %2287 = vmatmul.msk.bf16.vlgmr.msra.gmra.mxu3 %vm456_vm12, %v3086_v52 }
 0x5c9   : > { %1248 = vmatpush.bf16.msra.mxu2 %v1239_v5  ;;  %1261 = vmatpush.bf16.msrb.mxu3 %v1240_v6 }
 0x5d8   : > { %2298 = vmatmul.msk.bf16.vlgmr.msra.gmra.mxu2 %vm313_vm0, %v3405_v11  ;;  %2299 = vmatmul.msk.bf16.vlgmr.msrb.gmra.mxu3 %vm313_vm0, %v3405_v11 }
 0x64b   : > { %v1148_v52 = vpop.f32.mrf.mxu2  ;;  %v1161_v39 = vpop.f32.mrf.mxu3 }
 0x64c   : > { %v1149_v42 = vadd.f32 %v1148_v52, %v3093_v53  ;;  %v1162_v43 = vadd.f32 %v1161_v39, %v3093_v53 }
 0x64e   : > { %v1165_v15 = vmul.f32 0.5, %v1149_v42  ;;  %v1166_v16 = vmul.f32 0.5, %v1162_v43 }
 0x650   : > { %2487 = vtanh.f32 %v1165_v15 }
 0x651   : > { %2489 = vtanh.f32 %v1166_v16 }
 0x653   : > { %v1150_v40 = vpop.f32.mrf.mxu2  ;;  %v1163_v45 = vpop.f32.mrf.mxu3 }
 0x656   : > { %v2488_v36 = vpop.eup %2487 }
 0x657   : > { %v2490_v8 = vpop.eup %2489  ;;  %v1169_v37 = vmul.f32 0.5, %v2488_v36  ;;  %v3454_v36 = vld [vmem:[%s4055_s5 + $0x10] ss:$0 sm:$0xff] }
 0x658   : > { %v1170_v41 = vmul.f32 0.5, %v2490_v8 }
 0x659   : > { %v1171_v46 = vadd.f32 0.5, %v1169_v37  ;;  %v3460_v37 = vld [vmem:[%s4055_s5 + $0x18] ss:$0 sm:$0xff] }
 0x65a   : > { %v1172_v47 = vadd.f32 0.5, %v1170_v41 }
 0x65b   : > { %v1173_v55 = vpack.c.bf16 %v1171_v46, %v1171_v46  ;;  %v1250_v56 = vpop.f32.mrf.mxu2  ;;  %v1263_v57 = vpop.f32.mrf.mxu3 }
 0x65c   : > { %v1174_v58 = vpack.c.bf16 %v1172_v47, %v1172_v47  ;;  %v1251_v32 = vadd.f32 %v1250_v56, %v2925_v9  ;;  %v1264_v33 = vadd.f32 %v1263_v57, %v2925_v9 }
 0x65d   : > { %v1176_v59 = vsel %vm521_vm13, %v1173_v55, 0 }
 0x65e   : > { %v1267_v60 = vmul.f32 0.5, %v1251_v32  ;;  %v1268_v51 = vmul.f32 0.5, %v1264_v33  ;;  %1188 = vmatpush.bf16.msrb.mxu0 %v1176_v59  ;;  %v1179_v54 = vsel %vm521_vm13, %v1174_v58, 0 }
 0x65f   : > { %1202 = vmatpush.bf16.msra.mxu1 %v1179_v54 }
 0x660   : > { %2491 = vtanh.f32 %v1267_v60 }
 0x661   : > { %2493 = vtanh.f32 %v1268_v51  ;;  %2288 = vmatmul.msk.bf16.vlgmr.msrb.gmra.mxu0 %vm517_vm14, %v3105_v23 }
 0x662   : > { %2289 = vmatmul.msk.bf16.vlgmr.msra.gmra.mxu1 %vm517_vm14, %v3105_v23 }
 0x663   : > { %v1252_v61 = vpop.f32.mrf.mxu2  ;;  %v1265_v62 = vpop.f32.mrf.mxu3 }
 0x666   : > { %v2492_v1 = vpop.eup %2491 }
 0x667   : > { %v2494_v2 = vpop.eup %2493  ;;  %v1271_v5 = vmul.f32 0.5, %v2492_v1 }
 0x668   : > { %v1272_v6 = vmul.f32 0.5, %v2494_v2 }
 0x669   : > { %v1273_v7 = vadd.f32 0.5, %v1271_v5 }
 0x66a   : > { %v1274_v10 = vadd.f32 0.5, %v1272_v6 }
 0x66b   : > { %v1275_v52 = vsel %vm351_vm1, %v1273_v7, 0.0 }
 0x66c   : > { %v1276_v39 = vsel %vm351_vm1, %v1274_v10, 0.0  ;;  %1317 = vrot.lane.b32.xlu1 %v1275_v52, %s2752_s13  ;;  %1333 = vrot.lane.b32.xlu2 %v1275_v52, %s2753_s15 }
 0x66d   : > { %1335 = vrot.lane.b32.xlu0 %v1276_v39, %s2753_s15 }
 0x674   : > { %1327 = vrot.lane.b32.xlu1 %v1276_v39, %s2751_s12  ;;  %1319 = vrot.lane.b32.xlu2 %v1276_v39, %s2752_s13 }
 0x675   : > { %1325 = vrot.lane.b32.xlu0 %v1275_v52, %s2751_s12 }
 0x67c   : > { %1293 = vrot.lane.b32.xlu1 %v1275_v52, %s2755_s14  ;;  %1309 = vrot.lane.b32.xlu2 %v1275_v52, %s2754_s7 }
 0x67d   : > { %1311 = vrot.lane.b32.xlu0 %v1276_v39, %s2754_s7 }
 0x684   : > { %1303 = vrot.lane.b32.xlu1 %v1276_v39, %s2756_s16  ;;  %1295 = vrot.lane.b32.xlu2 %v1276_v39, %s2755_s14 }
 0x685   : > { %1301 = vrot.lane.b32.xlu0 %v1275_v52, %s2756_s16 }
 0x68c   : > { %1285 = vrot.lane.b32.xlu1 %v1275_v52, %s2758_s20  ;;  %1277 = vrot.lane.b32.xlu2 %v1275_v52, %s2757_s26 }
 0x68d   : > { %1279 = vrot.lane.b32.xlu0 %v1276_v39, %s2757_s26 }
 0x694   : > { %1287 = vrot.lane.b32.xlu2 %v1276_v39, %s2758_s20 }
 0x6c6   : > { %v1334_v23 = vpop.permute.xlu2 %1333 }
 0x6ce   : > { %v1320_v42 = vpop.permute.xlu2 %1319 }
 0x6d6   : > { %v1310_v16 = vpop.permute.xlu2 %1309 }
 0x6de   : > { %v1318_v43 = vpop.permute.xlu1 %1317  ;;  %v1296_v1 = vpop.permute.xlu2 %1295 }
 0x6df   : > { %v1336_v15 = vpop.permute.xlu0 %1335  ;;  %v1321_v57 = vsel %vm415_vm4, %v1318_v43, %v1320_v42  ;;  %v1322_v58 = vsel %vm415_vm4, %v1320_v42, %v1318_v43 }
 0x6e0   : > { %v1337_v40 = vsel %vm437_vm2, %v1334_v23, %v1336_v15  ;;  %v1338_v45 = vsel %vm437_vm2, %v1336_v15, %v1334_v23  ;;  %v1323_v51 = vmul.f32 %v1321_v57, %v2993_v49  ;;  %v1324_v54 = vmul.f32 %v1322_v58, %v2996_v50 }
 0x6e1   : > { %v1339_v8 = vmul.f32 %v3454_v36, %v1337_v40  ;;  %v1340_v41 = vmul.f32 %v3460_v37, %v1338_v45 }
 0x6e3   : > { %v1349_v46 = vpack.c.bf16 %v1339_v8, %v1339_v8  ;;  %v1350_v47 = vpack.c.bf16 %v1340_v41, %v1340_v41 }
 0x6e5   : > { %v1352_v55 = vsel %vm351_vm1, %v1349_v46, 0  ;;  %v1355_v56 = vsel %vm351_vm1, %v1350_v47, 0 }
 0x6e6   : > { %1360 = vmatpush.bf16.msra.mxu0 %v1352_v55  ;;  %1373 = vmatpush.bf16.msrb.mxu1 %v1355_v56  ;;  %v1328_v32 = vpop.permute.xlu1 %1327  ;;  %v1278_v45 = vpop.permute.xlu2 %1277 }
 0x6e7   : > { %v1326_v33 = vpop.permute.xlu0 %1325 }
 0x6e8   : > { %v1329_v59 = vsel %vm426_vm3, %v1326_v33, %v1328_v32  ;;  %v1330_v60 = vsel %vm426_vm3, %v1328_v32, %v1326_v33 }
 0x6e9   : > { %v1331_v61 = vmul.f32 %v1329_v59, %v2984_v44  ;;  %v1332_v62 = vmul.f32 %v1330_v60, %v2989_v48  ;;  %v2314_v60 = vld [vmem:[%s2899_s29 + $0xa0] sm:$0xff] }
 0x6eb   : > { %v1347_v2 = vpack.c.bf16 %v1331_v61, %v1323_v51  ;;  %v1348_v5 = vpack.c.bf16 %v1332_v62, %v1324_v54  ;;  %v3505_v62 = vld [vmem:[%s2899_s29 + $0xb0] sm:$0xff] }
 0x6ed   : > { %1361 = vmatpush.bf16.msra.mxu0 %v1347_v2  ;;  %1374 = vmatpush.bf16.msrb.mxu1 %v1348_v5  ;;  %v3509_v2 = vld [vmem:[%s2899_s29 + $0xb8] sm:$0xff] }
 0x6ee   : > { %v1294_v6 = vpop.permute.xlu1 %1293  ;;  %v1288_v33 = vpop.permute.xlu2 %1287 }
 0x6ef   : > { %v1312_v52 = vpop.permute.xlu0 %1311  ;;  %v1297_v8 = vsel %vm382_vm6, %v1294_v6, %v1296_v1 }
 0x6f0   : > { %v1313_v39 = vsel %vm404_vm5, %v1310_v16, %v1312_v52  ;;  %v1314_v23 = vsel %vm404_vm5, %v1312_v52, %v1310_v16  ;;  %v1298_v16 = vsel %vm382_vm6, %v1296_v1, %v1294_v6  ;;  %v1300_v55 = vmul.f32 %v1297_v8, %v3023_v4  ;;  %v2315_v1 = vld [vmem:[%s2899_s29 + $0xa8] sm:$0xff] }
 0x6f1   : > { %v1315_v42 = vmul.f32 %v1313_v39, %v3012_v63  ;;  %v1316_v43 = vmul.f32 %v1314_v23, %v3015_v0  ;;  %v1299_v47 = vmul.f32 %v1298_v16, %v3020_v3  ;;  %v3521_v16 = vld [vmem:[#allocation5] sm:$0x3] }
 0x6f3   : > { %v2301_v15 = vpack.c.bf16 %v1315_v42, %v1273_v7  ;;  %v2305_v40 = vpack.c.bf16 %v1316_v43, %v1274_v10  ;;  %v1457_v43 = vpack.c.bf16 %v3505_v62, %v2314_v60 }
 0x6f5   : > { %2302 = vmatpush.bf16.msk.msra.mxu0 %vm3046_vm9, %v2301_v15  ;;  %2306 = vmatpush.bf16.msk.msrb.mxu1 %vm3046_vm9, %v2305_v40  ;;  %v1458_v15 = vpack.c.bf16 %v3509_v2, %v2315_v1 }
 0x6f6   : > { %v1304_v41 = vpop.permute.xlu1 %1303 }
 0x6f7   : > { %v1302_v46 = vpop.permute.xlu0 %1301 }
 0x6f8   : > { %v1305_v7 = vsel %vm393_vm7, %v1302_v46, %v1304_v41  ;;  %v1306_v10 = vsel %vm393_vm7, %v1304_v41, %v1302_v46  ;;  %v3533_v41 = vpop.f32.mrf.mxu0 }
 0x6f9   : > { %v1307_v56 = vmul.f32 %v1306_v10, %v3034_v12  ;;  %v1308_v57 = vmul.f32 %v1305_v7, %v3037_v13 }
 0x6fb   : > { %v1343_v58 = vpack.c.bf16 %v1307_v56, %v1299_v47  ;;  %v1344_v32 = vpack.c.bf16 %v1308_v57, %v1300_v55 }
 0x6fd   : > { %1363 = vmatpush.bf16.msra.mxu0 %v1343_v58  ;;  %1376 = vmatpush.bf16.msrb.mxu1 %v1344_v32 }
 0x6fe   : > { %v1286_v59 = vpop.permute.xlu1 %1285 }
 0x6ff   : > { %v1289_v51 = vsel %vm371_vm11, %v1286_v59, %v1288_v33  ;;  %v1290_v54 = vsel %vm371_vm11, %v1288_v33, %v1286_v59  ;;  %v1280_v61 = vpop.permute.xlu0 %1279 }
 0x700   : > { %v1291_v5 = vmul.f32 %v1290_v54, %v3069_v34  ;;  %v1292_v6 = vmul.f32 %v1289_v51, %v3072_v35  ;;  %v1281_v52 = vsel %vm360_vm10, %v1278_v45, %v1280_v61  ;;  %v1282_v39 = vsel %vm360_vm10, %v1280_v61, %v1278_v45  ;;  %v3531_v45 = vpop.f32.mrf.mxu1  ;;  %v3537_v7 = vpop.f32.mrf.mxu0 }
 0x701   : > { %v1283_v23 = vmul.f32 %v1282_v39, %v3062_v24  ;;  %v1284_v42 = vmul.f32 %v1281_v52, %v3065_v31 }
 0x703   : > { %v1341_v40 = vpack.c.bf16 %v1291_v5, %v1283_v23  ;;  %v1342_v8 = vpack.c.bf16 %v1292_v6, %v1284_v42 }
 0x705   : > { %1364 = vmatpush.bf16.msra.mxu0 %v1341_v40  ;;  %1377 = vmatpush.bf16.msrb.mxu1 %v1342_v8 }
 0x708   : > { %2303 = vmatmul.msk.bf16.vlgmr.msra.gmra.mxu0 %vm456_vm12, %v3521_v16  ;;  %2307 = vmatmul.msk.bf16.vlgmr.msrb.gmra.mxu1 %vm456_vm12, %v3521_v16  ;;  %v3535_v46 = vpop.f32.mrf.mxu1 }
 0x709   : > { %1466 = vmatpush.bf16.msrb.mxu0 %v1457_v43  ;;  %1479 = vmatpush.bf16.msra.mxu1 %v1458_v15 }
 0x718   : > { %2318 = vmatmul.msk.bf16.vlgmr.msrb.gmra.mxu0 %vm313_vm0, %v3405_v11  ;;  %2319 = vmatmul.msk.bf16.vlgmr.msra.gmra.mxu1 %vm313_vm0, %v3405_v11 }
 0x785   : > { %v1366_v10 = vpop.f32.mrf.mxu0  ;;  %v1379_v47 = vpop.f32.mrf.mxu1 }
 0x786   : > { %v1367_v55 = vadd.f32 %v1366_v10, %v3093_v53  ;;  %v1380_v56 = vadd.f32 %v1379_v47, %v3093_v53  ;;  %v3548_v10 = vld [vmem:[%s4053_s3] sm:$0xff] }
 0x788   : > { %v1383_v57 = vmul.f32 0.5, %v1367_v55  ;;  %v1384_v58 = vmul.f32 0.5, %v1380_v56 }
 0x78a   : > { %2495 = vtanh.f32 %v1383_v57 }
 0x78b   : > { %2497 = vtanh.f32 %v1384_v58 }
 0x78d   : > { %v1368_v32 = vpop.f32.mrf.mxu0  ;;  %v1381_v33 = vpop.f32.mrf.mxu1 }
 0x790   : > { %v2496_v59 = vpop.eup %2495 }
 0x791   : > { %v2498_v60 = vpop.eup %2497  ;;  %v1387_v51 = vmul.f32 0.5, %v2496_v59 }
 0x792   : > { %v1388_v54 = vmul.f32 0.5, %v2498_v60 }
 0x793   : > { %v1389_v61 = vadd.f32 0.5, %v1387_v51 }
 0x794   : > { %v1390_v1 = vadd.f32 0.5, %v1388_v54 }
 0x795   : > { %v1391_v5 = vpack.c.bf16 %v1389_v61, %v1389_v61  ;;  %v1468_v6 = vpop.f32.mrf.mxu0  ;;  %v1481_v52 = vpop.f32.mrf.mxu1 }
 0x796   : > { %v1392_v39 = vpack.c.bf16 %v1390_v1, %v1390_v1  ;;  %v1469_v23 = vadd.f32 %v1468_v6, %v2925_v9  ;;  %v1482_v42 = vadd.f32 %v1481_v52, %v2925_v9 }
 0x797   : > { %v1394_v43 = vsel %vm521_vm13, %v1391_v5, 0 }
 0x798   : > { %v1485_v15 = vmul.f32 0.5, %v1469_v23  ;;  %v1486_v40 = vmul.f32 0.5, %v1482_v42  ;;  %1406 = vmatpush.bf16.msrb.mxu2 %v1394_v43  ;;  %v1397_v8 = vsel %vm521_vm13, %v1392_v39, 0 }
 0x799   : > { %1420 = vmatpush.bf16.msra.mxu3 %v1397_v8 }
 0x79a   : > { %2499 = vtanh.f32 %v1485_v15 }
 0x79b   : > { %2501 = vtanh.f32 %v1486_v40  ;;  %2308 = vmatmul.msk.bf16.vlgmr.msrb.gmra.mxu2 %vm517_vm14, %v3548_v10 }
 0x79c   : > { %2309 = vmatmul.msk.bf16.vlgmr.msra.gmra.mxu3 %vm517_vm14, %v3548_v10 }
 0x79d   : > { %v1470_v47 = vpop.f32.mrf.mxu0  ;;  %v1483_v55 = vpop.f32.mrf.mxu1 }
 0x7a0   : > { %v2500_v56 = vpop.eup %2499 }
 0x7a1   : > { %v2502_v57 = vpop.eup %2501  ;;  %v1489_v58 = vmul.f32 0.5, %v2500_v56 }
 0x7a2   : > { %v1490_v32 = vmul.f32 0.5, %v2502_v57 }
 0x7a3   : > { %v1491_v33 = vadd.f32 0.5, %v1489_v58 }
 0x7a4   : > { %v1492_v59 = vadd.f32 0.5, %v1490_v32 }
 0x7a5   : > { %v1493_v60 = vsel %vm351_vm1, %v1491_v33, 0.0 }
 0x7a6   : > { %v1494_v51 = vsel %vm351_vm1, %v1492_v59, 0.0  ;;  %1535 = vrot.lane.b32.xlu2 %v1493_v60, %s2752_s13  ;;  %1551 = vrot.lane.b32.xlu0 %v1493_v60, %s2753_s15 }
 0x7a7   : > { %1553 = vrot.lane.b32.xlu1 %v1494_v51, %s2753_s15 }
 0x7ae   : > { %1545 = vrot.lane.b32.xlu2 %v1494_v51, %s2751_s12  ;;  %1537 = vrot.lane.b32.xlu0 %v1494_v51, %s2752_s13 }
 0x7af   : > { %1543 = vrot.lane.b32.xlu1 %v1493_v60, %s2751_s12 }
 0x7b6   : > { %1511 = vrot.lane.b32.xlu2 %v1493_v60, %s2755_s14  ;;  %1527 = vrot.lane.b32.xlu0 %v1493_v60, %s2754_s7 }
 0x7b7   : > { %1529 = vrot.lane.b32.xlu1 %v1494_v51, %s2754_s7 }
 0x7be   : > { %1521 = vrot.lane.b32.xlu2 %v1494_v51, %s2756_s16  ;;  %1513 = vrot.lane.b32.xlu0 %v1494_v51, %s2755_s14 }
 0x7bf   : > { %1519 = vrot.lane.b32.xlu1 %v1493_v60, %s2756_s16 }
 0x7c6   : > { %1503 = vrot.lane.b32.xlu2 %v1493_v60, %s2758_s20  ;;  %1495 = vrot.lane.b32.xlu0 %v1493_v60, %s2757_s26 }
 0x7c7   : > { %1497 = vrot.lane.b32.xlu1 %v1494_v51, %s2757_s26 }
 0x7ce   : > { %1505 = vrot.lane.b32.xlu0 %v1494_v51, %s2758_s20 }
 0x800   : > { %v1536_v54 = vpop.permute.xlu2 %1535 }
 0x808   : > { %v1546_v23 = vpop.permute.xlu2 %1545 }
 0x818   : > { %v1552_v61 = vpop.permute.xlu0 %1551 }
 0x819   : > { %v1554_v1 = vpop.permute.xlu1 %1553 }
 0x81a   : > { %v1555_v5 = vsel %vm437_vm2, %v1552_v61, %v1554_v1  ;;  %v1556_v6 = vsel %vm437_vm2, %v1554_v1, %v1552_v61 }
 0x81b   : > { %v1557_v52 = vmul.f32 %v3454_v36, %v1555_v5  ;;  %v1558_v39 = vmul.f32 %v3460_v37, %v1556_v6  ;;  %v1512_v6 = vpop.permute.xlu2 %1511 }
 0x81d   : > { %v1567_v42 = vpack.c.bf16 %v1557_v52, %v1557_v52  ;;  %v1568_v43 = vpack.c.bf16 %v1558_v39, %v1558_v39 }
 0x81f   : > { %v1570_v15 = vsel %vm351_vm1, %v1567_v42, 0  ;;  %v1573_v40 = vsel %vm351_vm1, %v1568_v43, 0 }
 0x820   : > { %1578 = vmatpush.bf16.msra.mxu2 %v1570_v15  ;;  %1591 = vmatpush.bf16.msrb.mxu3 %v1573_v40  ;;  %v1538_v8 = vpop.permute.xlu0 %1537 }
 0x821   : > { %v1539_v47 = vsel %vm415_vm4, %v1536_v54, %v1538_v8  ;;  %v1540_v55 = vsel %vm415_vm4, %v1538_v8, %v1536_v54  ;;  %v1544_v56 = vpop.permute.xlu1 %1543 }
 0x822   : > { %v1541_v57 = vmul.f32 %v1539_v47, %v2993_v49  ;;  %v1542_v58 = vmul.f32 %v1540_v55, %v2996_v50  ;;  %v1547_v32 = vsel %vm426_vm3, %v1544_v56, %v1546_v23  ;;  %v1548_v60 = vsel %vm426_vm3, %v1546_v23, %v1544_v56 }
 0x823   : > { %v1549_v51 = vmul.f32 %v1547_v32, %v2984_v44  ;;  %v1550_v61 = vmul.f32 %v1548_v60, %v2989_v48  ;;  %v1522_v47 = vpop.permute.xlu2 %1521 }
 0x825   : > { %v1565_v1 = vpack.c.bf16 %v1549_v51, %v1541_v57  ;;  %v1566_v5 = vpack.c.bf16 %v1550_v61, %v1542_v58 }
 0x827   : > { %1579 = vmatpush.bf16.msra.mxu2 %v1565_v1  ;;  %1592 = vmatpush.bf16.msrb.mxu3 %v1566_v5 }
 0x828   : > { %v1528_v54 = vpop.permute.xlu0 %1527 }
 0x829   : > { %v1530_v52 = vpop.permute.xlu1 %1529 }
 0x82a   : > { %v1531_v39 = vsel %vm404_vm5, %v1528_v54, %v1530_v52  ;;  %v1532_v42 = vsel %vm404_vm5, %v1530_v52, %v1528_v54 }
 0x82b   : > { %v1533_v43 = vmul.f32 %v1531_v39, %v3012_v63  ;;  %v1534_v23 = vmul.f32 %v1532_v42, %v3015_v0  ;;  %v3619_v39 = vld [vmem:[%s2899_s29 + $0xc0] sm:$0xff]  ;;  %v1504_v42 = vpop.permute.xlu2 %1503 }
 0x82c   : > { %4078 = vst [vmem:[#allocation13_spill] sm:$0xff] %v3619_v39 }
 0x82d   : > { %v2321_v15 = vpack.c.bf16 %v1533_v43, %v1491_v33  ;;  %v2325_v40 = vpack.c.bf16 %v1534_v23, %v1492_v59  ;;  %v3622_v23 = vld [vmem:[%s2899_s29 + $0xd0] sm:$0xff] }
 0x82e   : > { %4079 = vst [vmem:[#allocation14_spill] sm:$0xff] %v3622_v23 }
 0x82f   : > { %2322 = vmatpush.bf16.msk.msra.mxu2 %vm3046_vm9, %v2321_v15  ;;  %2326 = vmatpush.bf16.msk.msrb.mxu3 %vm3046_vm9, %v2325_v40  ;;  %v3625_v15 = vld [vmem:[%s2899_s29 + $0xc8] sm:$0xff]  ;;  %v3628_v40 = vld [vmem:[%s2899_s29 + $0xd8] sm:$0xff] }
 0x830   : > { %v1514_v8 = vpop.permute.xlu0 %1513  ;;  %4080 = vst [vmem:[#allocation15_spill] sm:$0xff] %v3625_v15 }
 0x831   : > { %v1515_v55 = vsel %vm382_vm6, %v1512_v6, %v1514_v8  ;;  %v1516_v56 = vsel %vm382_vm6, %v1514_v8, %v1512_v6  ;;  %v1520_v57 = vpop.permute.xlu1 %1519  ;;  %4081 = vst [vmem:[#allocation16_spill] sm:$0xff] %v3628_v40 }
 0x832   : > { %v1517_v58 = vmul.f32 %v1516_v56, %v3020_v3  ;;  %v1518_v33 = vmul.f32 %v1515_v55, %v3023_v4  ;;  %v1523_v59 = vsel %vm393_vm7, %v1520_v57, %v1522_v47  ;;  %v1524_v32 = vsel %vm393_vm7, %v1522_v47, %v1520_v57 }
 0x833   : > { %v1525_v60 = vmul.f32 %v1524_v32, %v3034_v12  ;;  %v1526_v51 = vmul.f32 %v1523_v59, %v3037_v13  ;;  %v1676_v59 = vpack.c.bf16 %v3628_v40, %v3625_v15 }
 0x835   : > { %v1561_v61 = vpack.c.bf16 %v1525_v60, %v1517_v58  ;;  %v1562_v1 = vpack.c.bf16 %v1526_v51, %v1518_v33  ;;  %v1675_v33 = vpack.c.bf16 %v3622_v23, %v3619_v39  ;;  %v3650_v51 = vpop.f32.mrf.mxu3 }
 0x837   : > { %1581 = vmatpush.bf16.msra.mxu2 %v1561_v61  ;;  %1594 = vmatpush.bf16.msrb.mxu3 %v1562_v1  ;;  %v3652_v61 = vpop.f32.mrf.mxu2 }
 0x838   : > { %v1496_v5 = vpop.permute.xlu0 %1495 }
 0x839   : > { %v1498_v6 = vpop.permute.xlu1 %1497 }
 0x83a   : > { %v1499_v54 = vsel %vm360_vm10, %v1496_v5, %v1498_v6  ;;  %v1500_v52 = vsel %vm360_vm10, %v1498_v6, %v1496_v5 }
 0x83b   : > { %v1501_v55 = vmul.f32 %v1500_v52, %v3062_v24  ;;  %v1502_v56 = vmul.f32 %v1499_v54, %v3065_v31 }
 0x83d   : > { %v3654_v1 = vpop.f32.mrf.mxu3 }
 0x83f   : > { %v3656_v5 = vpop.f32.mrf.mxu2 }
 0x840   : > { %v1506_v43 = vpop.permute.xlu0 %1505 }
 0x841   : > { %v1507_v8 = vsel %vm371_vm11, %v1504_v42, %v1506_v43  ;;  %v1508_v47 = vsel %vm371_vm11, %v1506_v43, %v1504_v42 }
 0x842   : > { %v1509_v57 = vmul.f32 %v1508_v47, %v3069_v34  ;;  %v1510_v58 = vmul.f32 %v1507_v8, %v3072_v35 }
 0x844   : > { %v1559_v32 = vpack.c.bf16 %v1509_v57, %v1501_v55  ;;  %v1560_v60 = vpack.c.bf16 %v1510_v58, %v1502_v56 }
 0x846   : > { %1582 = vmatpush.bf16.msra.mxu2 %v1559_v32  ;;  %1595 = vmatpush.bf16.msrb.mxu3 %v1560_v60 }
 0x849   : > { %2323 = vmatmul.msk.bf16.vlgmr.msra.gmra.mxu2 %vm456_vm12, %v3521_v16  ;;  %2327 = vmatmul.msk.bf16.vlgmr.msrb.gmra.mxu3 %vm456_vm12, %v3521_v16 }
 0x84a   : > { %1684 = vmatpush.bf16.msrb.mxu2 %v1675_v33  ;;  %1697 = vmatpush.bf16.msra.mxu3 %v1676_v59 }
 0x859   : > { %2338 = vmatmul.msk.bf16.vlgmr.msrb.gmra.mxu2 %vm313_vm0, %v3405_v11  ;;  %2339 = vmatmul.msk.bf16.vlgmr.msra.gmra.mxu3 %vm313_vm0, %v3405_v11 }
 0x8cc   : > { %v1584_v6 = vpop.f32.mrf.mxu2  ;;  %v1597_v54 = vpop.f32.mrf.mxu3 }
 0x8cd   : > { %v1585_v52 = vadd.f32 %v1584_v6, %v3093_v53  ;;  %v1598_v42 = vadd.f32 %v1597_v54, %v3093_v53 }
 0x8cf   : > { %v1601_v43 = vmul.f32 0.5, %v1585_v52  ;;  %v1602_v8 = vmul.f32 0.5, %v1598_v42 }
 0x8d1   : > { %2503 = vtanh.f32 %v1601_v43 }
 0x8d2   : > { %2505 = vtanh.f32 %v1602_v8 }
 0x8d4   : > { %v1586_v47 = vpop.f32.mrf.mxu2  ;;  %v1599_v55 = vpop.f32.mrf.mxu3 }
 0x8d7   : > { %v2504_v56 = vpop.eup %2503 }
 0x8d8   : > { %v2506_v57 = vpop.eup %2505  ;;  %v1605_v58 = vmul.f32 0.5, %v2504_v56 }
 0x8d9   : > { %v1606_v33 = vmul.f32 0.5, %v2506_v57 }
 0x8da   : > { %v1607_v59 = vadd.f32 0.5, %v1605_v58 }
 0x8db   : > { %v1608_v32 = vadd.f32 0.5, %v1606_v33 }
 0x8dc   : > { %v1609_v60 = vpack.c.bf16 %v1607_v59, %v1607_v59  ;;  %v1686_v40 = vpop.f32.mrf.mxu2  ;;  %v1699_v23 = vpop.f32.mrf.mxu3 }
 0x8dd   : > { %v1610_v15 = vpack.c.bf16 %v1608_v32, %v1608_v32  ;;  %v1687_v6 = vadd.f32 %v1686_v40, %v2925_v9  ;;  %v1700_v54 = vadd.f32 %v1699_v23, %v2925_v9 }
 0x8de   : > { %v1612_v52 = vsel %vm521_vm13, %v1609_v60, 0 }
 0x8df   : > { %v1703_v42 = vmul.f32 0.5, %v1687_v6  ;;  %v1704_v43 = vmul.f32 0.5, %v1700_v54  ;;  %1624 = vmatpush.bf16.msra.mxu0 %v1612_v52  ;;  %v1615_v8 = vsel %vm521_vm13, %v1610_v15, 0 }
 0x8e0   : > { %1638 = vmatpush.bf16.msrb.mxu1 %v1615_v8 }
 0x8e1   : > { %2507 = vtanh.f32 %v1703_v42 }
 0x8e2   : > { %2509 = vtanh.f32 %v1704_v43  ;;  %2328 = vmatmul.msk.bf16.vlgmr.msra.gmra.mxu0 %vm517_vm14, %v3548_v10 }
 0x8e3   : > { %2329 = vmatmul.msk.bf16.vlgmr.msrb.gmra.mxu1 %vm517_vm14, %v3548_v10 }
 0x8e4   : > { %v1688_v47 = vpop.f32.mrf.mxu2  ;;  %v1701_v40 = vpop.f32.mrf.mxu3 }
 0x8e7   : > { %v2508_v55 = vpop.eup %2507 }
 0x8e8   : > { %v2510_v23 = vpop.eup %2509  ;;  %v1707_v56 = vmul.f32 0.5, %v2508_v55 }
 0x8e9   : > { %v1708_v57 = vmul.f32 0.5, %v2510_v23 }
 0x8ea   : > { %v1709_v58 = vadd.f32 0.5, %v1707_v56 }
 0x8eb   : > { %v1710_v33 = vadd.f32 0.5, %v1708_v57 }
 0x8ec   : > { %v1711_v59 = vsel %vm351_vm1, %v1709_v58, 0.0 }
 0x8ed   : > { %v1712_v15 = vsel %vm351_vm1, %v1710_v33, 0.0  ;;  %1753 = vrot.lane.b32.xlu0 %v1711_v59, %s2752_s13  ;;  %1769 = vrot.lane.b32.xlu1 %v1711_v59, %s2753_s15 }
 0x8ee   : > { %1771 = vrot.lane.b32.xlu2 %v1712_v15, %s2753_s15 }
 0x8f5   : > { %1763 = vrot.lane.b32.xlu0 %v1712_v15, %s2751_s12  ;;  %1755 = vrot.lane.b32.xlu1 %v1712_v15, %s2752_s13 }
 0x8f6   : > { %1761 = vrot.lane.b32.xlu2 %v1711_v59, %s2751_s12 }
 0x8fd   : > { %1729 = vrot.lane.b32.xlu0 %v1711_v59, %s2755_s14  ;;  %1745 = vrot.lane.b32.xlu1 %v1711_v59, %s2754_s7 }
 0x8fe   : > { %1747 = vrot.lane.b32.xlu2 %v1712_v15, %s2754_s7 }
 0x905   : > { %1739 = vrot.lane.b32.xlu0 %v1712_v15, %s2756_s16  ;;  %1731 = vrot.lane.b32.xlu1 %v1712_v15, %s2755_s14 }
 0x906   : > { %1737 = vrot.lane.b32.xlu2 %v1711_v59, %s2756_s16 }
 0x90d   : > { %1721 = vrot.lane.b32.xlu0 %v1711_v59, %s2758_s20  ;;  %1713 = vrot.lane.b32.xlu1 %v1711_v59, %s2757_s26 }
 0x90e   : > { %1715 = vrot.lane.b32.xlu2 %v1712_v15, %s2757_s26 }
 0x915   : > { %1723 = vrot.lane.b32.xlu1 %v1712_v15, %s2758_s20 }
 0x948   : > { %v1772_v32 = vpop.permute.xlu2 %1771 }
 0x950   : > { %v1762_v8 = vpop.permute.xlu2 %1761 }
 0x95f   : > { %v1754_v60 = vpop.permute.xlu0 %1753  ;;  %v1770_v6 = vpop.permute.xlu1 %1769 }
 0x960   : > { %v1773_v54 = vsel %vm437_vm2, %v1770_v6, %v1772_v32  ;;  %v1774_v52 = vsel %vm437_vm2, %v1772_v32, %v1770_v6 }
 0x961   : > { %v1775_v42 = vmul.f32 %v3454_v36, %v1773_v54  ;;  %v1776_v43 = vmul.f32 %v3460_v37, %v1774_v52 }
 0x963   : > { %v1785_v47 = vpack.c.bf16 %v1775_v42, %v1775_v42  ;;  %v1786_v40 = vpack.c.bf16 %v1776_v43, %v1776_v43 }
 0x965   : > { %v1788_v55 = vsel %vm351_vm1, %v1785_v47, 0  ;;  %v1791_v23 = vsel %vm351_vm1, %v1786_v40, 0 }
 0x966   : > { %1796 = vmatpush.bf16.msrb.mxu0 %v1788_v55  ;;  %1809 = vmatpush.bf16.msra.mxu1 %v1791_v23  ;;  %v1748_v55 = vpop.permute.xlu2 %1747 }
 0x967   : > { %v1764_v56 = vpop.permute.xlu0 %1763  ;;  %v1756_v57 = vpop.permute.xlu1 %1755 }
 0x968   : > { %v1765_v59 = vsel %vm426_vm3, %v1762_v8, %v1764_v56  ;;  %v1766_v15 = vsel %vm426_vm3, %v1764_v56, %v1762_v8  ;;  %v1757_v32 = vsel %vm415_vm4, %v1754_v60, %v1756_v57  ;;  %v1758_v6 = vsel %vm415_vm4, %v1756_v57, %v1754_v60 }
 0x969   : > { %v1767_v54 = vmul.f32 %v1765_v59, %v2984_v44  ;;  %v1768_v52 = vmul.f32 %v1766_v15, %v2989_v48  ;;  %v1759_v42 = vmul.f32 %v1757_v32, %v2993_v49  ;;  %v1760_v43 = vmul.f32 %v1758_v6, %v2996_v50 }
 0x96b   : > { %v1783_v47 = vpack.c.bf16 %v1767_v54, %v1759_v42  ;;  %v1784_v40 = vpack.c.bf16 %v1768_v52, %v1760_v43 }
 0x96d   : > { %1797 = vmatpush.bf16.msrb.mxu0 %v1783_v47  ;;  %1810 = vmatpush.bf16.msra.mxu1 %v1784_v40 }
 0x96e   : > { %v1738_v6 = vpop.permute.xlu2 %1737 }
 0x96f   : > { %v1730_v8 = vpop.permute.xlu0 %1729  ;;  %v1746_v23 = vpop.permute.xlu1 %1745 }
 0x970   : > { %v1749_v56 = vsel %vm404_vm5, %v1746_v23, %v1748_v55  ;;  %v1750_v60 = vsel %vm404_vm5, %v1748_v55, %v1746_v23 }
 0x971   : > { %v1751_v57 = vmul.f32 %v1749_v56, %v3012_v63  ;;  %v1752_v59 = vmul.f32 %v1750_v60, %v3015_v0 }
 0x973   : > { %v2341_v15 = vpack.c.bf16 %v1751_v57, %v1709_v58  ;;  %v2345_v32 = vpack.c.bf16 %v1752_v59, %v1710_v33 }
 0x975   : > { %2342 = vmatpush.bf16.msk.msrb.mxu0 %vm3046_vm9, %v2341_v15  ;;  %2346 = vmatpush.bf16.msk.msra.mxu1 %vm3046_vm9, %v2345_v32  ;;  %v3733_v32 = vld [vmem:[%s2899_s29 + $0xe0] sm:$0xff] }
 0x976   : > { %v1716_v59 = vpop.permute.xlu2 %1715  ;;  %4082 = vst [vmem:[#allocation17_spill] sm:$0xff] %v3733_v32 }
 0x977   : > { %v1740_v54 = vpop.permute.xlu0 %1739  ;;  %v1732_v52 = vpop.permute.xlu1 %1731 }
 0x978   : > { %v1741_v42 = vsel %vm393_vm7, %v1738_v6, %v1740_v54  ;;  %v1742_v43 = vsel %vm393_vm7, %v1740_v54, %v1738_v6  ;;  %v1733_v58 = vsel %vm382_vm6, %v1730_v8, %v1732_v52  ;;  %v1734_v33 = vsel %vm382_vm6, %v1732_v52, %v1730_v8  ;;  %v3736_v52 = vld [vmem:[%s2899_s29 + $0xf0] sm:$0xff] }
 0x979   : > { %v1743_v47 = vmul.f32 %v1742_v43, %v3034_v12  ;;  %v1744_v40 = vmul.f32 %v1741_v42, %v3037_v13  ;;  %v1735_v55 = vmul.f32 %v1734_v33, %v3020_v3  ;;  %v1736_v23 = vmul.f32 %v1733_v58, %v3023_v4  ;;  %4083 = vst [vmem:[#allocation18_spill] sm:$0xff] %v3736_v52  ;;  %v3739_v42 = vld [vmem:[%s2899_s29 + $0xe8] sm:$0xff]  ;;  %v3742_v43 = vld [vmem:[%s2899_s29 + $0xf8] sm:$0xff] }
 0x97a   : > { %4084 = vst [vmem:[#allocation19_spill] sm:$0xff] %v3739_v42 }
 0x97b   : > { %v1779_v56 = vpack.c.bf16 %v1743_v47, %v1735_v55  ;;  %v1780_v60 = vpack.c.bf16 %v1744_v40, %v1736_v23  ;;  %4085 = vst [vmem:[#allocation20_spill] sm:$0xff] %v3742_v43 }
 0x97d   : > { %1799 = vmatpush.bf16.msrb.mxu0 %v1779_v56  ;;  %1812 = vmatpush.bf16.msra.mxu1 %v1780_v60  ;;  %v1893_v56 = vpack.c.bf16 %v3736_v52, %v3733_v32  ;;  %v1894_v60 = vpack.c.bf16 %v3742_v43, %v3739_v42 }
 0x97f   : > { %v1714_v57 = vpop.permute.xlu1 %1713  ;;  %v1722_v6 = vpop.permute.xlu0 %1721 }
 0x980   : > { %v1717_v8 = vsel %vm360_vm10, %v1714_v57, %v1716_v59  ;;  %v1718_v15 = vsel %vm360_vm10, %v1716_v59, %v1714_v57 }
 0x981   : > { %v1719_v47 = vmul.f32 %v1718_v15, %v3062_v24  ;;  %v1720_v40 = vmul.f32 %v1717_v8, %v3065_v31  ;;  %v3764_v8 = vpop.f32.mrf.mxu0  ;;  %v3766_v15 = vpop.f32.mrf.mxu1 }
 0x982   : > { %4086 = vst [vmem:[#allocation21_spill] sm:$0xff] %v3764_v8 }
 0x983   : > { %4087 = vst [vmem:[#allocation22_spill] sm:$0xff] %v3766_v15 }
 0x987   : > { %v1724_v54 = vpop.permute.xlu1 %1723 }
 0x988   : > { %v1725_v58 = vsel %vm371_vm11, %v1722_v6, %v1724_v54  ;;  %v1726_v33 = vsel %vm371_vm11, %v1724_v54, %v1722_v6 }
 0x989   : > { %v1727_v55 = vmul.f32 %v1726_v33, %v3069_v34  ;;  %v1728_v23 = vmul.f32 %v1725_v58, %v3072_v35  ;;  %v3768_v6 = vpop.f32.mrf.mxu0  ;;  %v3770_v54 = vpop.f32.mrf.mxu1 }
 0x98b   : > { %v1777_v57 = vpack.c.bf16 %v1727_v55, %v1719_v47  ;;  %v1778_v59 = vpack.c.bf16 %v1728_v23, %v1720_v40 }
 0x98d   : > { %1800 = vmatpush.bf16.msrb.mxu0 %v1777_v57  ;;  %1813 = vmatpush.bf16.msra.mxu1 %v1778_v59 }
 0x990   : > { %2343 = vmatmul.msk.bf16.vlgmr.msrb.gmra.mxu0 %vm456_vm12, %v3521_v16  ;;  %2347 = vmatmul.msk.bf16.vlgmr.msra.gmra.mxu1 %vm456_vm12, %v3521_v16 }
 0x991   : > { %1902 = vmatpush.bf16.msra.mxu0 %v1893_v56  ;;  %1915 = vmatpush.bf16.msrb.mxu1 %v1894_v60 }
 0x9a0   : > { %2358 = vmatmul.msk.bf16.vlgmr.msra.gmra.mxu0 %vm313_vm0, %v3405_v11  ;;  %2359 = vmatmul.msk.bf16.vlgmr.msrb.gmra.mxu1 %vm313_vm0, %v3405_v11 }
 0xa0d   : > { %v1802_v58 = vpop.f32.mrf.mxu0  ;;  %v1815_v33 = vpop.f32.mrf.mxu1 }
 0xa0e   : > { %v1803_v47 = vadd.f32 %v1802_v58, %v3093_v53  ;;  %v1816_v40 = vadd.f32 %v1815_v33, %v3093_v53 }
 0xa10   : > { %v1819_v55 = vmul.f32 0.5, %v1803_v47  ;;  %v1820_v23 = vmul.f32 0.5, %v1816_v40 }
 0xa12   : > { %2511 = vtanh.f32 %v1819_v55 }
 0xa13   : > { %2513 = vtanh.f32 %v1820_v23 }
 0xa15   : > { %v1804_v56 = vpop.f32.mrf.mxu0  ;;  %v1817_v11 = vpop.f32.mrf.mxu1 }
 0xa18   : > { %v2512_v60 = vpop.eup %2511 }
 0xa19   : > { %v2514_v57 = vpop.eup %2513  ;;  %v1823_v59 = vmul.f32 0.5, %v2512_v60  ;;  %v296_v60 = vld [vmem:[%s4054_s4 + $0x8] sm:$0xff] }
 0xa1a   : > { %v1824_v43 = vmul.f32 0.5, %v2514_v57 }
 0xa1b   : > { %v1825_v52 = vadd.f32 0.5, %v1823_v59 }
 0xa1c   : > { %v1826_v42 = vadd.f32 0.5, %v1824_v43 }
 0xa1d   : > { %v1827_v32 = vpack.c.bf16 %v1825_v52, %v1825_v52  ;;  %v1904_v39 = vpop.f32.mrf.mxu0  ;;  %v1917_v15 = vpop.f32.mrf.mxu1 }
 0xa1e   : > { %v1828_v8 = vpack.c.bf16 %v1826_v42, %v1826_v42  ;;  %v1905_v58 = vadd.f32 %v1904_v39, %v2925_v9  ;;  %v1918_v33 = vadd.f32 %v1917_v15, %v2925_v9 }
 0xa1f   : > { %v1830_v47 = vsel %vm521_vm13, %v1827_v32, 0 }
 0xa20   : > { %v1921_v40 = vmul.f32 0.5, %v1905_v58  ;;  %v1922_v55 = vmul.f32 0.5, %v1918_v33  ;;  %1842 = vmatpush.bf16.msra.mxu2 %v1830_v47  ;;  %v1833_v23 = vsel %vm521_vm13, %v1828_v8, 0 }
 0xa21   : > { %1856 = vmatpush.bf16.msrb.mxu3 %v1833_v23 }
 0xa22   : > { %2515 = vtanh.f32 %v1921_v40 }
 0xa23   : > { %2517 = vtanh.f32 %v1922_v55  ;;  %2348 = vmatmul.msk.bf16.vlgmr.msra.gmra.mxu2 %vm517_vm14, %v3548_v10 }
 0xa24   : > { %2349 = vmatmul.msk.bf16.vlgmr.msrb.gmra.mxu3 %vm517_vm14, %v3548_v10  ;;  %v297_v10 = vld [vmem:[%s4054_s4 + $0x10] sm:$0xff] }
 0xa25   : > { %v1906_v52 = vpop.f32.mrf.mxu0  ;;  %v1919_v39 = vpop.f32.mrf.mxu1 }
 0xa28   : > { %v2516_v42 = vpop.eup %2515 }
 0xa29   : > { %v2518_v9 = vpop.eup %2517  ;;  %v1925_v43 = vmul.f32 0.5, %v2516_v42 }
 0xa2a   : > { %v1926_v32 = vmul.f32 0.5, %v2518_v9 }
 0xa2b   : > { %v3782_v15 = vadd.f32 0.5, %v1925_v43 }
 0xa2c   : > { %v3784_v56 = vadd.f32 0.5, %v1926_v32 }
 0xa2d   : > { %v1929_v8 = vsel %vm351_vm1, %v3782_v15, 0.0 }
 0xa2e   : > { %v1930_v11 = vsel %vm351_vm1, %v3784_v56, 0.0  ;;  %1971 = vrot.lane.b32.xlu1 %v1929_v8, %s2752_s13  ;;  %1987 = vrot.lane.b32.xlu2 %v1929_v8, %s2753_s15 }
 0xa2f   : > { %1989 = vrot.lane.b32.xlu0 %v1930_v11, %s2753_s15 }
 0xa36   : > { %1981 = vrot.lane.b32.xlu1 %v1930_v11, %s2751_s12  ;;  %1973 = vrot.lane.b32.xlu2 %v1930_v11, %s2752_s13 }
 0xa37   : > { %1979 = vrot.lane.b32.xlu0 %v1929_v8, %s2751_s12  ;;  %s2695_s12 = scalar_lea.hbm %s4056_s6, 512 }
 0xa3e   : > { %1947 = vrot.lane.b32.xlu1 %v1929_v8, %s2755_s14  ;;  %1963 = vrot.lane.b32.xlu2 %v1929_v8, %s2754_s7 }
 0xa3f   : > { %1965 = vrot.lane.b32.xlu0 %v1930_v11, %s2754_s7  ;;  %s3933_s7 = scalar_lea.vmem [#allocation7], %s2215_s30 }
 0xa40   : > { %s2120_s18 = sshll.u32 %s3933_s7, 4  ;;  %s2121_s18 = int_to_ptr.vmem [resolvable:$true] %s2120_s18 }
 0xa46   : > { %1957 = vrot.lane.b32.xlu1 %v1930_v11, %s2756_s16  ;;  %1949 = vrot.lane.b32.xlu2 %v1930_v11, %s2755_s14  ;;  %s2384_s14 = sshll.u32 %s2817_s25, 8  ;;  %s2107_s25 = scalar_lea.sflag [#allocation4], %s2893_s28 }
 0xa47   : > { %1955 = vrot.lane.b32.xlu0 %v1929_v8, %s2756_s16  ;;  %s2119_s11 = scalar_lea.hbm %s4056_s6, %s2384_s14 }
 0xa48   : > { %s2122_s17 = sshll.u32 %s2119_s11, 4  ;;  %s2123_s17 = int_to_ptr.hbm [resolvable:$true] %s2122_s17 }
 0xa49   : > { %s2689_s19 = sshra.s32 %s2123_s17, 4  ;;  %s2690_s19 = int_to_ptr.hbm [resolvable:$true] %s2689_s19 }
 0xa4a   : > { %s2691_s23 = scalar_lea.hbm %s2690_s19, 256  ;;  %p2696_p0 = scmp.lt.s32.totalorder %s2690_s19, %s4056_s6 }
 0xa4b   : > { %p2692_p4 = scmp.ne.s32.totalorder %s2690_s19, %s2691_s23  ;;  %p2697_p7 = scmp.lt.s32.totalorder %s2695_s12, %s2691_s23 }
 0xa4d   : > { %p2693_p6 = pnand %p2692_p4, %p2848_p11  ;;  %p2698_p5 = por %p2697_p7, %p2696_p0 }
 0xa4e   : > { %1939 = vrot.lane.b32.xlu1 %v1929_v8, %s2758_s20  ;;  %1931 = vrot.lane.b32.xlu2 %v1929_v8, %s2757_s26 }
 0xa4f   : > { %1933 = vrot.lane.b32.xlu0 %v1930_v11, %s2757_s26  ;;  %p2694_p13 = pneg %p2693_p6 }
 0xa51   : > { %p2699_p8 = pnand %p2698_p5, %p2694_p13 }
 0xa56   : > { %509 = vperm.xlu1 %2456, %v297_v10   ;;  %1941 = vrot.lane.b32.xlu2 %v1930_v11, %s2758_s20 }
 0xa57   : > { %504 = vperm.xlu0 %2455, %v296_v60  }
 0xa88   : > { %v1988_v57 = vpop.permute.xlu2 %1987 }
 0xa90   : > { %v1974_v59 = vpop.permute.xlu2 %1973 }
 0xa98   : > { %v1964_v47 = vpop.permute.xlu2 %1963 }
 0xaa0   : > { %v1972_v58 = vpop.permute.xlu1 %1971 }
 0xaa1   : > { %v1990_v33 = vpop.permute.xlu0 %1989  ;;  %v1975_v32 = vsel %vm415_vm4, %v1972_v58, %v1974_v59  ;;  %v1976_v8 = vsel %vm415_vm4, %v1974_v59, %v1972_v58 }
 0xaa2   : > { %v1991_v40 = vsel %vm437_vm2, %v1988_v57, %v1990_v33  ;;  %v1992_v55 = vsel %vm437_vm2, %v1990_v33, %v1988_v57  ;;  %v1977_v60 = vmul.f32 %v1975_v32, %v2993_v49  ;;  %v1978_v57 = vmul.f32 %v1976_v8, %v2996_v50 }
 0xaa3   : > { %v1993_v23 = vmul.f32 %v3454_v36, %v1991_v40  ;;  %v1994_v52 = vmul.f32 %v3460_v37, %v1992_v55  ;;  %v1950_v55 = vpop.permute.xlu2 %1949 }
 0xaa5   : > { %v2003_v39 = vpack.c.bf16 %v1993_v23, %v1993_v23  ;;  %v2004_v42 = vpack.c.bf16 %v1994_v52, %v1994_v52 }
 0xaa7   : > { %v2006_v9 = vsel %vm351_vm1, %v2003_v39, 0  ;;  %v2009_v43 = vsel %vm351_vm1, %v2004_v42, 0 }
 0xaa8   : > { %2014 = vmatpush.bf16.msrb.mxu2 %v2006_v9  ;;  %2027 = vmatpush.bf16.msra.mxu3 %v2009_v43  ;;  %v1982_v11 = vpop.permute.xlu1 %1981 }
 0xaa9   : > { %v1980_v10 = vpop.permute.xlu0 %1979 }
 0xaaa   : > { %v1983_v36 = vsel %vm426_vm3, %v1980_v10, %v1982_v11  ;;  %v1984_v37 = vsel %vm426_vm3, %v1982_v11, %v1980_v10 }
 0xaab   : > { %v1985_v33 = vmul.f32 %v1983_v36, %v2984_v44  ;;  %v1986_v40 = vmul.f32 %v1984_v37, %v2989_v48  ;;  %v1932_v9 = vpop.permute.xlu2 %1931 }
 0xaad   : > { %v2001_v59 = vpack.c.bf16 %v1985_v33, %v1977_v60  ;;  %v2002_v58 = vpack.c.bf16 %v1986_v40, %v1978_v57 }
 0xaaf   : > { %2015 = vmatpush.bf16.msrb.mxu2 %v2001_v59  ;;  %2028 = vmatpush.bf16.msra.mxu3 %v2002_v58 }
 0xab0   : > { %v1948_v23 = vpop.permute.xlu1 %1947 }
 0xab1   : > { %v1966_v52 = vpop.permute.xlu0 %1965  ;;  %v1951_v43 = vsel %vm382_vm6, %v1948_v23, %v1950_v55 }
 0xab2   : > { %v1967_v39 = vsel %vm404_vm5, %v1964_v47, %v1966_v52  ;;  %v1968_v42 = vsel %vm404_vm5, %v1966_v52, %v1964_v47  ;;  %v1952_v47 = vsel %vm382_vm6, %v1950_v55, %v1948_v23  ;;  %v1954_v8 = vmul.f32 %v1951_v43, %v3023_v4 }
 0xab3   : > { %v1969_v49 = vmul.f32 %v1967_v39, %v3012_v63  ;;  %v1970_v50 = vmul.f32 %v1968_v42, %v3015_v0  ;;  %v1942_v37 = vpop.permute.xlu2 %1941  ;;  %v2593_v42 = vld [vmem:[%s2899_s29 + $0x18] sm:$0xff] }
 0xab5   : > { %v2361_v44 = vpack.c.bf16 %v1969_v49, %v3782_v15  ;;  %v2365_v48 = vpack.c.bf16 %v1970_v50, %v3784_v56  ;;  %v1953_v56 = vmul.f32 %v1952_v47, %v3020_v3 }
 0xab7   : > { %2362 = vmatpush.bf16.msk.msrb.mxu2 %vm3046_vm9, %v2361_v44  ;;  %2366 = vmatpush.bf16.msk.msra.mxu3 %vm3046_vm9, %v2365_v48  ;;  %v2595_v44 = vld [vmem:[%s2899_s29 + $0x38] sm:$0xff] }
 0xab8   : > { %v1958_v63 = vpop.permute.xlu1 %1957 }
 0xab9   : > { %v1956_v32 = vpop.permute.xlu0 %1955 }
 0xaba   : > { %v1959_v0 = vsel %vm393_vm7, %v1956_v32, %v1958_v63  ;;  %v1960_v15 = vsel %vm393_vm7, %v1958_v63, %v1956_v32  ;;  %v2599_v63 = vld [vmem:[%s2899_s29 + $0x78] sm:$0xff] }
 0xabb   : > { %v1961_v18 = vmul.f32 %v1960_v15, %v3034_v12  ;;  %v1962_v11 = vmul.f32 %v1959_v0, %v3037_v13 }
 0xabd   : > { %v1997_v10 = vpack.c.bf16 %v1961_v18, %v1953_v56  ;;  %v1998_v36 = vpack.c.bf16 %v1962_v11, %v1954_v8 }
 0xabf   : > { %2017 = vmatpush.bf16.msrb.mxu2 %v1997_v10  ;;  %2030 = vmatpush.bf16.msra.mxu3 %v1998_v36 }
 0xac0   : > { %v1940_v60 = vpop.permute.xlu1 %1939 }
 0xac1   : > { %v1943_v57 = vsel %vm371_vm11, %v1940_v60, %v1942_v37  ;;  %v1944_v33 = vsel %vm371_vm11, %v1942_v37, %v1940_v60  ;;  %v1934_v40 = vpop.permute.xlu0 %1933 }
 0xac2   : > { %v1945_v3 = vmul.f32 %v1944_v33, %v3069_v34  ;;  %v1946_v4 = vmul.f32 %v1943_v57, %v3072_v35  ;;  %v1935_v12 = vsel %vm360_vm10, %v1932_v9, %v1934_v40  ;;  %v1936_v13 = vsel %vm360_vm10, %v1934_v40, %v1932_v9  ;;  %v2597_v9 = vld [vmem:[%s2899_s29 + $0x58] sm:$0xff] }
 0xac3   : > { %v1937_v55 = vmul.f32 %v1936_v13, %v3062_v24  ;;  %v1938_v59 = vmul.f32 %v1935_v12, %v3065_v31  ;;  %v2601_v12 = vld [vmem:[%s2899_s29 + $0x98] sm:$0xff] }
 0xac5   : > { %v1995_v58 = vpack.c.bf16 %v1945_v3, %v1937_v55  ;;  %v1996_v23 = vpack.c.bf16 %v1946_v4, %v1938_v59  ;;  %v2600_v4 = vld [vmem:[%s2899_s29 + $0x90] sm:$0xff]  ;;  %v2602_v55 = vld [vmem:[%s2899_s29] sm:$0xff] }
 0xac7   : > { %2018 = vmatpush.bf16.msrb.mxu2 %v1995_v58  ;;  %2031 = vmatpush.bf16.msra.mxu3 %v1996_v23  ;;  %v2603_v58 = vld [vmem:[%s2899_s29 + $0x8] sm:$0xff] }
 0xac8   : > { %v3868_v34 = vpop.permute.xlu1 %509 }
 0xac9   : > { %v540_v35 = vadd.f32 %v3120_v28, %v3868_v34  ;;  %v554_v30 = vadd.f32 %v3122_v29, %v3868_v34  ;;  %v757_v24 = vadd.f32 %v3310_v20, %v3868_v34  ;;  %v771_v31 = vadd.f32 %v3308_v25, %v3868_v34  ;;  %v2592_v20 = vld [vmem:[%s2899_s29 + $0x10] sm:$0xff]  ;;  %v3898_v18 = vpop.permute.xlu0 %504 }
 0xaca   : > { %v975_v52 = vadd.f32 %v3415_v19, %v3868_v34  ;;  %v989_v39 = vadd.f32 %v3417_v38, %v3868_v34  ;;  %v1193_v28 = vadd.f32 %v3537_v7, %v3868_v34  ;;  %v1207_v29 = vadd.f32 %v3535_v46, %v3868_v34  ;;  %2363 = vmatmul.msk.bf16.vlgmr.msrb.gmra.mxu2 %vm456_vm12, %v3521_v16  ;;  %v2594_v19 = vld [vmem:[%s2899_s29 + $0x30] sm:$0xff] }
 0xacb   : > { %v558_v25 = vadd.f32 %v2592_v20, %v540_v35  ;;  %v559_v49 = vadd.f32 %v2593_v42, %v554_v30  ;;  %v775_v50 = vadd.f32 %v2594_v19, %v757_v24  ;;  %v776_v48 = vadd.f32 %v2595_v44, %v771_v31  ;;  %2367 = vmatmul.msk.bf16.vlgmr.msra.gmra.mxu3 %vm456_vm12, %v3521_v16  ;;  %v2596_v38 = vld [vmem:[%s2899_s29 + $0x50] sm:$0xff] }
 0xacc   : > { %v993_v7 = vadd.f32 %v2596_v38, %v975_v52  ;;  %v994_v43 = vadd.f32 %v2597_v9, %v989_v39  ;;  %v2598_v46 = vld [vmem:[%s2899_s29 + $0x70] sm:$0xff]  ;;  %v1212_v32 = vadd.f32 %v2599_v63, %v1207_v29  ;;  %v1411_v37 = vadd.f32 %v3656_v5, %v3868_v34 }
 0xacd   : > { %v1211_v47 = vadd.f32 %v2598_v46, %v1193_v28  ;;  %v562_v0 = vmul.f32 0.5, %v558_v25  ;;  %v563_v15 = vmul.f32 0.5, %v559_v49  ;;  %v779_v56 = vmul.f32 0.5, %v775_v50 }
 0xace   : > { %v780_v8 = vmul.f32 0.5, %v776_v48  ;;  %v997_v11 = vmul.f32 0.5, %v993_v7  ;;  %v998_v10 = vmul.f32 0.5, %v994_v43  ;;  %v1216_v16 = vmul.f32 0.5, %v1212_v32  ;;  %v2606_v48 = vld [vmem:[%s2899_s29 + $0x40] sm:$0xff] }
 0xacf   : > { %v1215_v36 = vmul.f32 0.5, %v1211_v47  ;;  %2519 = vtanh.f32 %v562_v0  ;;  %v1425_v60 = vadd.f32 %v3654_v1, %v3868_v34  ;;  %v1629_v57 = vadd.f32 %v3768_v6, %v3868_v34 }
 0xad0   : > { %2521 = vtanh.f32 %v563_v15  ;;  %v1643_v33 = vadd.f32 %v3770_v54, %v3868_v34  ;;  %v538_v40 = vadd.f32 %v3116_v26, %v3898_v18  ;;  %v552_v3 = vadd.f32 %v3118_v27, %v3898_v18 }
 0xad1   : > { %2523 = vtanh.f32 %v779_v56  ;;  %v1429_v5 = vadd.f32 %v2600_v4, %v1411_v37  ;;  %v1430_v13 = vadd.f32 %v2601_v12, %v1425_v60  ;;  %v1647_v1 = vadd.f32 %v3505_v62, %v1629_v57  ;;  %v2607_v56 = vld [vmem:[%s2899_s29 + $0x48] sm:$0xff] }
 0xad2   : > { %2525 = vtanh.f32 %v780_v8  ;;  %v1648_v6 = vadd.f32 %v3509_v2, %v1643_v33  ;;  %v556_v59 = vadd.f32 %v2602_v55, %v538_v40  ;;  %v557_v54 = vadd.f32 %v2603_v58, %v552_v3  ;;  %v3940_v3 = vpop.f32.mrf.mxu2  ;;  %v2608_v55 = vld [vmem:[%s2899_s29 + $0x60] sm:$0xff]  ;;  %v3947_v58 = vpop.f32.mrf.mxu3 }
 0xad3   : > { %2527 = vtanh.f32 %v997_v11  ;;  %v1433_v23 = vmul.f32 0.5, %v1429_v5  ;;  %v1434_v26 = vmul.f32 0.5, %v1430_v13  ;;  %v1651_v35 = vmul.f32 0.5, %v1647_v1 }
 0xad4   : > { %2529 = vtanh.f32 %v998_v10  ;;  %v1652_v27 = vmul.f32 0.5, %v1648_v6  ;;  %v560_v30 = vmul.f32 0.5, %v556_v59  ;;  %v561_v24 = vmul.f32 0.5, %v557_v54 }
 0xad5   : > { %v2520_v31 = vpop.eup %2519  ;;  %2531 = vtanh.f32 %v1215_v36  ;;  %v755_v62 = vadd.f32 %v3306_v22, %v3898_v18  ;;  %v769_v2 = vadd.f32 %v3304_v21, %v3898_v18  ;;  %v973_v52 = vadd.f32 %v3411_v14, %v3898_v18  ;;  %v2604_v22 = vld [vmem:[%s2899_s29 + $0x20] sm:$0xff]  ;;  %v2605_v21 = vld [vmem:[%s2899_s29 + $0x28] sm:$0xff] }
 0xad6   : > { %v2522_v39 = vpop.eup %2521  ;;  %v570_v28 = vmul.f32 0.5, %v2520_v31  ;;  %2533 = vtanh.f32 %v1216_v16  ;;  %v987_v29 = vadd.f32 %v3413_v17, %v3898_v18  ;;  %v1191_v20 = vadd.f32 %v3533_v41, %v3898_v18 }
 0xad7   : > { %v2524_v25 = vpop.eup %2523  ;;  %v571_v42 = vmul.f32 0.5, %v2522_v39  ;;  %2535 = vtanh.f32 %v1433_v23  ;;  %v773_v49 = vadd.f32 %v2604_v22, %v755_v62  ;;  %v774_v19 = vadd.f32 %v2605_v21, %v769_v2  ;;  %v2610_v22 = vld [vmem:[%s2899_s29 + $0x80] sm:$0xff] }
 0xad8   : > { %v2526_v50 = vpop.eup %2525  ;;  %v574_v14 = vadd.f32 0.5, %v570_v28  ;;  %v787_v44 = vmul.f32 0.5, %v2524_v25  ;;  %2537 = vtanh.f32 %v1434_v26  ;;  %v991_v38 = vadd.f32 %v2606_v48, %v973_v52 }
 0xad9   : > { %v2528_v7 = vpop.eup %2527  ;;  %v575_v9 = vadd.f32 0.5, %v571_v42  ;;  %v788_v17 = vmul.f32 0.5, %v2526_v50  ;;  %2539 = vtanh.f32 %v1651_v35  ;;  %v777_v41 = vmul.f32 0.5, %v773_v49  ;;  %v2609_v35 = vld [vmem:[%s2899_s29 + $0x68] sm:$0xff] }
 0xada   : > { %v2530_v43 = vpop.eup %2529  ;;  %578 = vst [vmem:[%s3933_s7 + $0x10] sm:$0xff] %v574_v14  ;;  %v791_v46 = vadd.f32 0.5, %v787_v44  ;;  %v1005_v47 = vmul.f32 0.5, %v2528_v7  ;;  %2541 = vtanh.f32 %v1652_v27  ;;  %v778_v63 = vmul.f32 0.5, %v774_v19  ;;  %v2611_v50 = vld [vmem:[%s2899_s29 + $0x88] sm:$0xff] }
 0xadb   : > { %v2532_v32 = vpop.eup %2531  ;;  %579 = vst [vmem:[%s3933_s7 + $0x18] sm:$0xff] %v575_v9  ;;  %v792_v0 = vadd.f32 0.5, %v788_v17  ;;  %v1006_v15 = vmul.f32 0.5, %v2530_v43  ;;  %2543 = vtanh.f32 %v560_v30  ;;  %v992_v8 = vadd.f32 %v2607_v56, %v987_v29  ;;  %v4088_v7 = vld [vmem:[#allocation21_spill] sm:$0xff] }
 0xadc   : > { %v2534_v11 = vpop.eup %2533  ;;  %2252 = vst [vmem:[%s3933_s7 + $0x30] sm:$0xff] %v791_v46  ;;  %v1009_v10 = vadd.f32 0.5, %v1005_v47  ;;  %v1223_v36 = vmul.f32 0.5, %v2532_v32  ;;  %2545 = vtanh.f32 %v561_v24  ;;  %v995_v16 = vmul.f32 0.5, %v991_v38  ;;  %v4089_v47 = vld [vmem:[#allocation22_spill] sm:$0xff]  ;;  %v1846_v32 = vpop.f32.mrf.mxu2  ;;  %v2612_v56 = vld [vmem:[%s2899_s29 + $0xa0] sm:$0xff] }
 0xadd   : > { %v2536_v37 = vpop.eup %2535  ;;  %2253 = vst [vmem:[%s3933_s7 + $0x38] sm:$0xff] %v792_v0  ;;  %v1010_v60 = vadd.f32 0.5, %v1006_v15  ;;  %v1224_v57 = vmul.f32 0.5, %v2534_v11  ;;  %2547 = vtanh.f32 %v777_v41  ;;  %v996_v33 = vmul.f32 0.5, %v992_v8  ;;  %v1860_v11 = vpop.f32.mrf.mxu3 }
 0xade   : > { %v2538_v40 = vpop.eup %2537  ;;  %2272 = vst [vmem:[%s3933_s7 + $0x50] sm:$0xff] %v1009_v10  ;;  %v1227_v4 = vadd.f32 0.5, %v1223_v36  ;;  %v1441_v5 = vmul.f32 0.5, %v2536_v37  ;;  %2549 = vtanh.f32 %v778_v63  ;;  %v1205_v12 = vadd.f32 %v3531_v45, %v3898_v18  ;;  %v2613_v36 = vld [vmem:[%s2899_s29 + $0xa8] sm:$0xff] }
 0xadf   : > { %v2540_v13 = vpop.eup %2539  ;;  %2273 = vst [vmem:[%s3933_s7 + $0x58] sm:$0xff] %v1010_v60  ;;  %v1228_v1 = vadd.f32 0.5, %v1224_v57  ;;  %v1442_v6 = vmul.f32 0.5, %v2538_v40  ;;  %2551 = vtanh.f32 %v995_v16  ;;  %v1209_v59 = vadd.f32 %v2608_v55, %v1191_v20 }
 0xae0   : > { %v2542_v54 = vpop.eup %2541  ;;  %2292 = vst [vmem:[%s3933_s7 + $0x70] sm:$0xff] %v1227_v4  ;;  %v1445_v23 = vadd.f32 0.5, %v1441_v5  ;;  %v1659_v26 = vmul.f32 0.5, %v2540_v13  ;;  %2553 = vtanh.f32 %v996_v33  ;;  %v1210_v27 = vadd.f32 %v2609_v35, %v1205_v12 }
 0xae1   : > { %v2544_v45 = vpop.eup %2543  ;;  %2293 = vst [vmem:[%s3933_s7 + $0x78] sm:$0xff] %v1228_v1  ;;  %v1446_v30 = vadd.f32 0.5, %v1442_v6  ;;  %v1660_v24 = vmul.f32 0.5, %v2542_v54  ;;  %v1213_v31 = vmul.f32 0.5, %v1209_v59  ;;  %v1409_v62 = vadd.f32 %v3652_v61, %v3898_v18  ;;  %v4090_v1 = vld [vmem:[#allocation13_spill] sm:$0xff]  ;;  %v4091_v59 = vld [vmem:[#allocation15_spill] sm:$0xff] }
 0xae2   : > { %v2546_v2 = vpop.eup %2545  ;;  %2312 = vst [vmem:[%s3933_s7 + $0x90] sm:$0xff] %v1445_v23  ;;  %v1663_v52 = vadd.f32 0.5, %v1659_v26  ;;  %v568_v39 = vmul.f32 0.5, %v2544_v45  ;;  %v1214_v28 = vmul.f32 0.5, %v1210_v27  ;;  %v1423_v29 = vadd.f32 %v3650_v51, %v3898_v18  ;;  %v4092_v23 = vld [vmem:[#allocation14_spill] sm:$0xff]  ;;  %v4093_v27 = vld [vmem:[#allocation16_spill] sm:$0xff] }
 0xae3   : > { %v2548_v20 = vpop.eup %2547  ;;  %2313 = vst [vmem:[%s3933_s7 + $0x98] sm:$0xff] %v1446_v30  ;;  %v1664_v25 = vadd.f32 0.5, %v1660_v24  ;;  %v569_v42 = vmul.f32 0.5, %v2546_v2  ;;  %2555 = vtanh.f32 %v1213_v31  ;;  %v1427_v49 = vadd.f32 %v2610_v22, %v1409_v62 }
 0xae4   : > { %v2550_v21 = vpop.eup %2549  ;;  %2332 = vst [vmem:[%s3933_s7 + $0xb0] sm:$0xff] %v1663_v52  ;;  %v572_v61 = vadd.f32 0.5, %v568_v39  ;;  %v785_v19 = vmul.f32 0.5, %v2548_v20  ;;  %2557 = vtanh.f32 %v1214_v28  ;;  %v1428_v14 = vadd.f32 %v2611_v50, %v1423_v29 }
 0xae5   : > { %v2552_v44 = vpop.eup %2551  ;;  %2333 = vst [vmem:[%s3933_s7 + $0xb8] sm:$0xff] %v1664_v25  ;;  %v573_v51 = vadd.f32 0.5, %v569_v42  ;;  %v786_v48 = vmul.f32 0.5, %v2550_v21  ;;  %v1431_v38 = vmul.f32 0.5, %v1427_v49  ;;  %v1627_v9 = vadd.f32 %v4088_v7, %v3898_v18 }
 0xae6   : > { %v2554_v17 = vpop.eup %2553  ;;  %576 = vst [vmem:[%s3933_s7] sm:$0xff] %v572_v61  ;;  %v789_v41 = vadd.f32 0.5, %v785_v19  ;;  %v1003_v43 = vmul.f32 0.5, %v2552_v44  ;;  %v1432_v46 = vmul.f32 0.5, %v1428_v14  ;;  %v1641_v63 = vadd.f32 %v4089_v47, %v3898_v18 }
 0xae7   : > { %577 = vst [vmem:[%s3933_s7 + $0x8] sm:$0xff] %v573_v51  ;;  %v790_v0 = vadd.f32 0.5, %v786_v48  ;;  %v1004_v15 = vmul.f32 0.5, %v2554_v17  ;;  %2559 = vtanh.f32 %v1431_v38  ;;  %v1645_v8 = vadd.f32 %v2612_v56, %v1627_v9 }
 0xae8   : > { %2250 = vst [vmem:[%s3933_s7 + $0x20] sm:$0xff] %v789_v41  ;;  %v1007_v10 = vadd.f32 0.5, %v1003_v43  ;;  %2561 = vtanh.f32 %v1432_v46  ;;  %v1646_v16 = vadd.f32 %v2613_v36, %v1641_v63  ;;  %v1845_v37 = vadd.f32 %v3940_v3, %v3898_v18 }
 0xae9   : > { %v2556_v60 = vpop.eup %2555  ;;  %2251 = vst [vmem:[%s3933_s7 + $0x28] sm:$0xff] %v790_v0  ;;  %v1008_v57 = vadd.f32 0.5, %v1004_v15  ;;  %v1649_v33 = vmul.f32 0.5, %v1645_v8  ;;  %v1859_v40 = vadd.f32 %v3947_v58, %v3898_v18  ;;  %v1847_v4 = vadd.f32 %v1846_v32, %v3868_v34 }
 0xaea   : > { %v2558_v5 = vpop.eup %2557  ;;  %2270 = vst [vmem:[%s3933_s7 + $0x40] sm:$0xff] %v1007_v10  ;;  %v1221_v12 = vmul.f32 0.5, %v2556_v60  ;;  %v1650_v13 = vmul.f32 0.5, %v1646_v16  ;;  %v1863_v6 = vadd.f32 %v4090_v1, %v1845_v37  ;;  %v1861_v55 = vadd.f32 %v1860_v11, %v3868_v34 }
 0xaeb   : > { %2271 = vst [vmem:[%s3933_s7 + $0x48] sm:$0xff] %v1008_v57  ;;  %v1222_v3 = vmul.f32 0.5, %v2558_v5  ;;  %2563 = vtanh.f32 %v1649_v33  ;;  %v1864_v54 = vadd.f32 %v4091_v59, %v1859_v40  ;;  %v1865_v26 = vadd.f32 %v4092_v23, %v1847_v4 }
 0xaec   : > { %v1225_v58 = vadd.f32 0.5, %v1221_v12  ;;  %2565 = vtanh.f32 %v1650_v13  ;;  %v1867_v35 = vmul.f32 0.5, %v1863_v6  ;;  %v1866_v45 = vadd.f32 %v4093_v27, %v1861_v55  ;;  %v4094_v6 = vld [vmem:[#allocation17_spill] sm:$0xff] }
 0xaed   : > { %v2560_v30 = vpop.eup %2559  ;;  %v1226_v24 = vadd.f32 0.5, %v1222_v3  ;;  %v1868_v31 = vmul.f32 0.5, %v1864_v54  ;;  %v1869_v62 = vmul.f32 0.5, %v1865_v26  ;;  %v4095_v3 = vld [vmem:[#allocation19_spill] sm:$0xff] }
 0xaee   : > { %v2562_v2 = vpop.eup %2561  ;;  %2290 = vst [vmem:[%s3933_s7 + $0x60] sm:$0xff] %v1225_v58  ;;  %v1439_v52 = vmul.f32 0.5, %v2560_v30  ;;  %2567 = vtanh.f32 %v1867_v35  ;;  %v1870_v39 = vmul.f32 0.5, %v1866_v45  ;;  %v4096_v45 = vld [vmem:[#allocation18_spill] sm:$0xff] }
 0xaef   : > { %2291 = vst [vmem:[%s3933_s7 + $0x68] sm:$0xff] %v1226_v24  ;;  %v1440_v28 = vmul.f32 0.5, %v2562_v2  ;;  %2569 = vtanh.f32 %v1868_v31 }
 0xaf0   : > { %v1443_v29 = vadd.f32 0.5, %v1439_v52  ;;  %2571 = vtanh.f32 %v1869_v62 }
 0xaf1   : > { %v2564_v20 = vpop.eup %2563  ;;  %v1444_v25 = vadd.f32 0.5, %v1440_v28  ;;  %2573 = vtanh.f32 %v1870_v39 }
 0xaf2   : > { %v2566_v42 = vpop.eup %2565  ;;  %2310 = vst [vmem:[%s3933_s7 + $0x80] sm:$0xff] %v1443_v29  ;;  %v1657_v22 = vmul.f32 0.5, %v2564_v20 }
 0xaf3   : > { %2311 = vst [vmem:[%s3933_s7 + $0x88] sm:$0xff] %v1444_v25  ;;  %v1658_v49 = vmul.f32 0.5, %v2566_v42 }
 0xaf4   : > { %v2568_v21 = vpop.eup %2567  ;;  %v1661_v61 = vadd.f32 0.5, %v1657_v22 }
 0xaf5   : > { %v2570_v19 = vpop.eup %2569  ;;  %v1662_v50 = vadd.f32 0.5, %v1658_v49  ;;  %v1875_v14 = vmul.f32 0.5, %v2568_v21 }
 0xaf6   : > { %v2572_v44 = vpop.eup %2571  ;;  %2330 = vst [vmem:[%s3933_s7 + $0xa0] sm:$0xff] %v1661_v61  ;;  %v1876_v51 = vmul.f32 0.5, %v2570_v19 }
 0xaf7   : > { %v2574_v48 = vpop.eup %2573  ;;  %2331 = vst [vmem:[%s3933_s7 + $0xa8] sm:$0xff] %v1662_v50  ;;  %v1879_v38 = vadd.f32 0.5, %v1875_v14  ;;  %v1877_v7 = vmul.f32 0.5, %v2572_v44 }
 0xaf8   : > { %v1880_v9 = vadd.f32 0.5, %v1876_v51  ;;  %v1878_v17 = vmul.f32 0.5, %v2574_v48 }
 0xaf9   : > { %2350 = vst [vmem:[%s3933_s7 + $0xc0] sm:$0xff] %v1879_v38  ;;  %v1881_v41 = vadd.f32 0.5, %v1877_v7 }
 0xafa   : > { %2351 = vst [vmem:[%s3933_s7 + $0xc8] sm:$0xff] %v1880_v9  ;;  %v1882_v43 = vadd.f32 0.5, %v1878_v17 }
 0xafb   : > { %2352 = vst [vmem:[%s3933_s7 + $0xd0] sm:$0xff] %v1881_v41 }
 0xafc   : > { %2353 = vst [vmem:[%s3933_s7 + $0xd8] sm:$0xff] %v1882_v43 }
 0xb4d   : > { %v2020_v46 = vpop.f32.mrf.mxu2 }
 0xb4e   : > { %v2021_v47 = vadd.f32 %v2020_v46, %v3093_v53  ;;  %v2033_v63 = vpop.f32.mrf.mxu3 }
 0xb4f   : > { %v2034_v32 = vadd.f32 %v2033_v63, %v3093_v53  ;;  %v2614_v53 = vld [vmem:[%s4053_s3] sm:$0xff] }
 0xb50   : > { %v2037_v0 = vmul.f32 0.5, %v2021_v47 }
 0xb51   : > { %v2038_v15 = vmul.f32 0.5, %v2034_v32 }
 0xb52   : > { %2575 = vtanh.f32 %v2037_v0 }
 0xb53   : > { %2577 = vtanh.f32 %v2038_v15 }
 0xb55   : > { %v2022_v56 = vpop.f32.mrf.mxu2 }
 0xb56   : > { %v2035_v8 = vpop.f32.mrf.mxu3 }
 0xb58   : > { %v2576_v11 = vpop.eup %2575 }
 0xb59   : > { %v2578_v10 = vpop.eup %2577  ;;  %v2041_v36 = vmul.f32 0.5, %v2576_v11 }
 0xb5a   : > { %v2042_v16 = vmul.f32 0.5, %v2578_v10 }
 0xb5b   : > { %v2043_v37 = vadd.f32 0.5, %v2041_v36 }
 0xb5c   : > { %v2044_v60 = vadd.f32 0.5, %v2042_v16 }
 0xb5d   : > { %v2045_v57 = vpack.c.bf16 %v2043_v37, %v2043_v37 }
 0xb5e   : > { %v2046_v33 = vpack.c.bf16 %v2044_v60, %v2044_v60 }
 0xb5f   : > { %v2048_v40 = vsel %vm521_vm13, %v2045_v57, 0 }
 0xb60   : > { %2060 = vmatpush.bf16.msrb.mxu0 %v2048_v40  ;;  %v2051_v4 = vsel %vm521_vm13, %v2046_v33, 0 }
 0xb61   : > { %2074 = vmatpush.bf16.msra.mxu1 %v2051_v4 }
 0xb63   : > { %2368 = vmatmul.msk.bf16.vlgmr.msrb.gmra.mxu0 %vm517_vm14, %v2614_v53 }
 0xb64   : > { %2369 = vmatmul.msk.bf16.vlgmr.msra.gmra.mxu1 %vm517_vm14, %v2614_v53 }
 0xbe0   : > { %v2062_v5 = vpop.f32.mrf.mxu0 }
 0xbe1   : > { %v2063_v12 = vadd.f32 %v2062_v5, %v3898_v18  ;;  %v2076_v13 = vpop.f32.mrf.mxu1 }
 0xbe2   : > { %v2077_v1 = vadd.f32 %v2076_v13, %v3898_v18  ;;  %v4097_v18 = vld [vmem:[#allocation20_spill] sm:$0xff] }
 0xbe3   : > { %v2081_v55 = vadd.f32 %v4094_v6, %v2063_v12 }
 0xbe4   : > { %v2082_v59 = vadd.f32 %v4095_v3, %v2077_v1 }
 0xbe5   : > { %v2085_v54 = vmul.f32 0.5, %v2081_v55 }
 0xbe6   : > { %v2086_v23 = vmul.f32 0.5, %v2082_v59 }
 0xbe7   : > { %2579 = vtanh.f32 %v2085_v54 }
 0xbe8   : > { %2581 = vtanh.f32 %v2086_v23  ;;  %v2064_v26 = vpop.f32.mrf.mxu0 }
 0xbe9   : > { %v2065_v58 = vadd.f32 %v2064_v26, %v3868_v34  ;;  %v2078_v35 = vpop.f32.mrf.mxu1 }
 0xbea   : > { %v2079_v27 = vadd.f32 %v2078_v35, %v3868_v34 }
 0xbeb   : > { %v2083_v30 = vadd.f32 %v4096_v45, %v2065_v58 }
 0xbec   : > { %v2084_v24 = vadd.f32 %v4097_v18, %v2079_v27 }
 0xbed   : > { %v2580_v31 = vpop.eup %2579  ;;  %v2087_v62 = vmul.f32 0.5, %v2083_v30 }
 0xbee   : > { %v2582_v2 = vpop.eup %2581  ;;  %v2093_v52 = vmul.f32 0.5, %v2580_v31  ;;  %v2088_v39 = vmul.f32 0.5, %v2084_v24 }
 0xbef   : > { %v2094_v28 = vmul.f32 0.5, %v2582_v2  ;;  %2583 = vtanh.f32 %v2087_v62 }
 0xbf0   : > { %v2097_v29 = vadd.f32 0.5, %v2093_v52  ;;  %2585 = vtanh.f32 %v2088_v39 }
 0xbf1   : > { %v2098_v20 = vadd.f32 0.5, %v2094_v28 }
 0xbf2   : > { %2370 = vst [vmem:[%s3933_s7 + $0xe0] sm:$0xff] %v2097_v29 }
 0xbf3   : > { %2371 = vst [vmem:[%s3933_s7 + $0xe8] sm:$0xff] %v2098_v20 }
 0xbf5   : > { %v2584_v34 = vpop.eup %2583 }
 0xbf6   : > { %v2586_v25 = vpop.eup %2585  ;;  %v2095_v42 = vmul.f32 0.5, %v2584_v34 }
 0xbf7   : > { %v2096_v22 = vmul.f32 0.5, %v2586_v25 }
 0xbf8   : > { %v2099_v49 = vadd.f32 0.5, %v2095_v42 }
 0xbf9   : > { %v2100_v21 = vadd.f32 0.5, %v2096_v22 }
 0xbfa   : > { %2372 = vst [vmem:[%s3933_s7 + $0xf0] sm:$0xff] %v2099_v49 }
 0xbfb   : > { %2373 = vst [vmem:[%s3933_s7 + $0xf8] sm:$0xff] %v2100_v21 }
 0xbfc   : > { %2702 = shalt.err (!%p2699_p8)
}
 0xbfd   : > { %s2760_s28 = smov 256  }
 0xbfe   : > { %2391 = dma.vmem_to_hbm [thread:$0]  (%p2848_p11), %s2121_s18, 4096, %s2123_s17, %s2107_s25, %s2760_s28, %s2760_s28, %s2758_s20  }
 0xbff PF: > { %s2137_s7 = sand.u32 1, %s2733_s21   ;;  %p4098_p9 = scmp.ge.s32.totalorder %s2745_s24, 2 }
 0xc00   : > { %s2138_s30 = scalar_lea.sflag [#allocation4], %s2137_s7 }
 0xc01   : > { %p2402_p10 = pnand %p4098_p9, %p2852_p12 }
 0xc03   : > { %p2403_p1 = pneg %p2402_p10 }
 0xc05   : > { %2728 = dma.done.wait (%p2403_p1), %s2138_s30, 4096  }
 0xc06   : > { %2730 = vsyncadd (%p2403_p1), %s2138_s30, 4294963200  ;;  %s4099_s29 = sld [smem:[#allocation11_spill]]  ;;  %p20_p2 = scmp.ge.s32.totalorder %s2821_s27, 4  }
 0xc07   : > { %s4100_s23 = sld [smem:[#allocation12_spill]]  ;;  %s4101_s21 = smov %s2737_s22 }
 0xc08   : > { %s4103_s24 = smov %s2821_s27  ;;  %22 = sbr.rel (!%p20_p2) target bundleno = 8 (0x8), region = 107 }
 0xc0c   : > { %s4102_s22 = smov %s4099_s29 }
 0xc0d   :  { %2144 = vsyncpa [#allocation3], 1 }
 0xc0e   :  { %2146 = vsyncpa [#allocation3 + $0x1], 1 }
 0xc0f   :  { %2147 = vsyncpa [#allocation6], 1 }
 0xc10   :  { %2148 = vsyncpa [#allocation4], 1 }
 0xc11   :  { %2150 = vsyncpa [#allocation4 + $0x1], 1 }

</bundles_post_ra>
